<compile_context>
chip_gen: v7x
topology: tpu7x:2x2x1
jax: 0.10.0
libtpu: 0.0.40
codegen_flags: <defaults>
</compile_context>

<pallas_src>
import functools

import jax
import jax.numpy as jnp
from jax.experimental import pallas as pl
from jax.experimental.pallas import tpu as pltpu


NUM_SAMPLES = 100  # matches the module default


# --------------------------------------------------------------------------
# Kernel
# --------------------------------------------------------------------------
def _sampling_softmax_kernel(mean_ref, std_ref, noise_ref, prob_ref, var_ref,
                             *, ts, num_samples):
    j = pl.program_id(1)  # sample chunk ("arbitrary", reduction axis)

    mean = mean_ref[...].astype(jnp.float32)             # (tb, C)
    std = std_ref[...].astype(jnp.float32)               # (tb, C)
    noise = noise_ref[...].astype(jnp.float32)            # (ts, tb, C)

    # Monte-Carlo samples for this chunk.
    samples = noise * std[None, :, :] + mean[None, :, :]  # (ts, tb, C)

    # softmax over the class (lane) axis
    m = jnp.max(samples, axis=-1, keepdims=True)           # (ts, tb, 1)
    e = jnp.exp(samples - m)                                # (ts, tb, C)
    denom = jnp.sum(e, axis=-1, keepdims=True)              # (ts, tb, 1)
    sm = e / denom                                          # (ts, tb, C)

    # two-pass statistics for this chunk (no cancellation)
    chunk_mean = jnp.sum(sm, axis=0) * jnp.float32(1.0 / ts)     # (tb, C)
    centered = sm - chunk_mean[None, :, :]
    chunk_m2 = jnp.sum(centered * centered, axis=0)               # (tb, C)

    @pl.when(j == 0)
    def _init():
        prob_ref[...] = chunk_mean          # running mean
        var_ref[...] = chunk_m2             # running M2 (sum of sq. deviations)

    @pl.when(j > 0)
    def _combine():
        # Chan's parallel combine of (n_a, mean_a, M2_a) with (ts, chunk_mean, chunk_m2)
        n_a = (j * ts).astype(jnp.float32)
        n_b = jnp.float32(ts)
        n_ab = n_a + n_b
        mean_a = prob_ref[...]
        delta = chunk_mean - mean_a
        prob_ref[...] = mean_a + delta * (n_b / n_ab)
        var_ref[...] = var_ref[...] + chunk_m2 + (delta * delta) * (n_a * n_b / n_ab)

    @pl.when(j == pl.num_programs(1) - 1)
    def _finalize():
        # unbiased sample variance (torch.var default, ddof=1)
        var_ref[...] = var_ref[...] * jnp.float32(1.0 / (num_samples - 1))


# --------------------------------------------------------------------------
# Tile picking helpers
# --------------------------------------------------------------------------
def _largest_divisor_leq(n, cap, multiple_of=1):
    best = None
    for d in range(1, n + 1):
        if n % d == 0 and d <= cap and d % multiple_of == 0:
            best = d
    return best


def _pick_batch_tile(B):
    if B % 8 == 0:
        # sublane-aligned tile, as large as possible up to 128
        tb = _largest_divisor_leq(B, 128, multiple_of=8)
        if tb is not None:
            return tb
    # fall back to the full batch (block == full dim sidesteps the (8,128) rule)
    return B


def _pick_sample_tile(num_samples, tb, C, vmem_budget_bytes=8 << 20):
    # ~8 live (ts, tb, C) f32 copies (noise double-buffer + intermediates)
    per_sample = max(1, 8 * tb * C * 4)
    cap = max(1, vmem_budget_bytes // per_sample)
    ts = _largest_divisor_leq(num_samples, cap)
    return ts if ts is not None else 1


# --------------------------------------------------------------------------
# Wrapper
# --------------------------------------------------------------------------
def sampling_softmax(mean_logits, variance_logits, *, noise=None, key=None,
                     num_samples=NUM_SAMPLES, tb=None, ts=None):
    """mean_logits, variance_logits: [B, C] -> (probability, variance), each [B, C].

    `noise` (optional): pre-drawn standard-normal noise of shape [num_samples, B, C].
    If omitted, it is drawn from `key` (or PRNGKey(0)).
    """
    B, C = mean_logits.shape
    assert variance_logits.shape == (B, C)
    assert num_samples >= 2

    if noise is None:
        if key is None:
            key = jax.random.PRNGKey(0)
        noise = jax.random.normal(key, (num_samples, B, C), dtype=jnp.float32)
    assert noise.shape == (num_samples, B, C)
    noise = noise.astype(jnp.float32)

    if tb is None:
        tb = _pick_batch_tile(B)
    if ts is None:
        ts = _pick_sample_tile(num_samples, tb, C)
    assert B % tb == 0 and num_samples % ts == 0

    grid = (B // tb, num_samples // ts)

    kernel = functools.partial(_sampling_softmax_kernel, ts=ts,
                               num_samples=num_samples)

    out_shape = (
        jax.ShapeDtypeStruct((B, C), jnp.float32),
        jax.ShapeDtypeStruct((B, C), jnp.float32),
    )
    return pl.pallas_call(
        kernel,
        out_shape=out_shape,
        grid_spec=pltpu.PrefetchScalarGridSpec(
            num_scalar_prefetch=0,
            grid=grid,
            in_specs=[
                pl.BlockSpec((tb, C), lambda i, j: (i, 0)),        # mean
                pl.BlockSpec((tb, C), lambda i, j: (i, 0)),        # std scale
                pl.BlockSpec((ts, tb, C), lambda i, j: (j, i, 0)),  # noise chunk
            ],
            out_specs=[
                pl.BlockSpec((tb, C), lambda i, j: (i, 0)),
                pl.BlockSpec((tb, C), lambda i, j: (i, 0)),
            ],
        ),
        compiler_params=pltpu.CompilerParams(
            dimension_semantics=("parallel", "arbitrary"),
        ),
    )(mean_logits.astype(jnp.float32), variance_logits.astype(jnp.float32), noise)


# --------------------------------------------------------------------------
# Self-test (same noise stream -> direct numerical comparison)
# --------------------------------------------------------------------------
def _reference(mean_logits, variance_logits, noise):
    samples = noise * variance_logits[None, :, :] + mean_logits[None, :, :]
    sm = jax.nn.softmax(samples, axis=-1)
    return jnp.mean(sm, axis=0), jnp.var(sm, axis=0, ddof=1)


if __name__ == "__main__":
    key = jax.random.PRNGKey(0)
    k_mean, k_var, k_noise = jax.random.split(key, 3)

    B, C, S = 8, 128, NUM_SAMPLES
    mean_logits = jax.random.normal(k_mean, (B, C), dtype=jnp.float32)
    # the module uses the "variance" logits directly as a scale
    variance_logits = jnp.abs(jax.random.normal(k_var, (B, C), dtype=jnp.float32)) * 0.25

    noise = jax.random.normal(k_noise, (S, B, C), dtype=jnp.float32)

    prob, var = sampling_softmax(mean_logits, variance_logits, noise=noise,
                                 num_samples=S)
    jax.block_until_ready((prob, var))

    ref_prob, ref_var = _reference(mean_logits, variance_logits, noise)

    assert prob.shape == (B, C) and var.shape == (B, C)
    assert bool(jnp.all(jnp.isfinite(prob))) and bool(jnp.all(jnp.isfinite(var)))
    assert bool(jnp.all(prob >= -1e-6)) and bool(jnp.all(var >= -1e-6))
    # mean of softmaxes -> every row sums to 1
    assert bool(jnp.allclose(jnp.sum(prob, axis=-1), 1.0, atol=1e-4))
    # direct comparison against the pure-JAX reference (same noise)
    assert bool(jnp.allclose(prob, ref_prob, atol=1e-5, rtol=1e-4))
    assert bool(jnp.allclose(var, ref_var, atol=1e-6, rtol=1e-3))

    print("KERNEL_OK")
</pallas_src>

<mosaic_0001>
module attributes {stable_mosaic.version = 11 : i64} {
  func.func @_sampling_softmax_kernel(%arg0: i32, %arg1: i32, %arg2: memref<8x128xf32, #tpu.memory_space<vmem>>, %arg3: memref<8x128xf32, #tpu.memory_space<vmem>>, %arg4: memref<100x8x128xf32, #tpu.memory_space<vmem>>, %arg5: memref<8x128xf32, #tpu.memory_space<vmem>>, %arg6: memref<8x128xf32, #tpu.memory_space<vmem>>) attributes {dimension_semantics = [#tpu.dimension_semantics<parallel>, #tpu.dimension_semantics<arbitrary>], iteration_bounds = array<i64: 1, 1>, scalar_prefetch = 0 : i64, scratch_operands = 0 : i64, tpu.core_type = #tpu.core_type<tc>, window_params = [{transform_indices = @transform_0, window_bounds = array<i64: 8, 128>}, {transform_indices = @transform_1, window_bounds = array<i64: 8, 128>}, {transform_indices = @transform_2, window_bounds = array<i64: 100, 8, 128>}, {transform_indices = @transform_3, window_bounds = array<i64: 8, 128>}, {transform_indices = @transform_4, window_bounds = array<i64: 8, 128>}]} {
    %c0 = arith.constant 0 : index
    %c0_0 = arith.constant 0 : index
    %0 = vector.load %arg2[%c0, %c0_0] : memref<8x128xf32, #tpu.memory_space<vmem>>, vector<8x128xf32>
    %c0_1 = arith.constant 0 : index
    %c0_2 = arith.constant 0 : index
    %1 = vector.load %arg3[%c0_1, %c0_2] : memref<8x128xf32, #tpu.memory_space<vmem>>, vector<8x128xf32>
    %c0_3 = arith.constant 0 : index
    %c0_4 = arith.constant 0 : index
    %c0_5 = arith.constant 0 : index
    %2 = vector.load %arg4[%c0_3, %c0_4, %c0_5] : memref<100x8x128xf32, #tpu.memory_space<vmem>>, vector<100x8x128xf32>
    %3 = vector.shape_cast %1 : vector<8x128xf32> to vector<1x8x128xf32>
    %4 = vector.broadcast %3 : vector<1x8x128xf32> to vector<100x8x128xf32>
    %5 = arith.mulf %2, %4 : vector<100x8x128xf32>
    %6 = vector.shape_cast %0 : vector<8x128xf32> to vector<1x8x128xf32>
    %7 = vector.broadcast %6 : vector<1x8x128xf32> to vector<100x8x128xf32>
    %8 = arith.addf %5, %7 : vector<100x8x128xf32>
    %cst = arith.constant dense<0xFF800000> : vector<100x8xf32>
    %9 = vector.multi_reduction <maximumf>, %8, %cst [2] : vector<100x8x128xf32> to vector<100x8xf32>
    %10 = vector.shape_cast %9 : vector<100x8xf32> to vector<100x8x1xf32>
    %11 = vector.broadcast %10 : vector<100x8x1xf32> to vector<100x8x128xf32>
    %12 = arith.subf %8, %11 : vector<100x8x128xf32>
    %13 = math.exp %12 : vector<100x8x128xf32>
    %cst_6 = arith.constant dense<0.000000e+00> : vector<100x8xf32>
    %14 = vector.multi_reduction <add>, %13, %cst_6 [2] : vector<100x8x128xf32> to vector<100x8xf32>
    %15 = vector.shape_cast %14 : vector<100x8xf32> to vector<100x8x1xf32>
    %16 = vector.broadcast %15 : vector<100x8x1xf32> to vector<100x8x128xf32>
    %17 = arith.divf %13, %16 : vector<100x8x128xf32>
    %cst_7 = arith.constant dense<0.000000e+00> : vector<8x128xf32>
    %18 = vector.multi_reduction <add>, %17, %cst_7 [0] : vector<100x8x128xf32> to vector<8x128xf32>
    %cst_8 = arith.constant 0.00999999977 : f32
    %19 = vector.broadcast %cst_8 : f32 to vector<8x128xf32>
    %20 = arith.mulf %18, %19 : vector<8x128xf32>
    %21 = vector.shape_cast %20 : vector<8x128xf32> to vector<1x8x128xf32>
    %22 = vector.broadcast %21 : vector<1x8x128xf32> to vector<100x8x128xf32>
    %23 = arith.subf %17, %22 : vector<100x8x128xf32>
    %24 = arith.mulf %23, %23 : vector<100x8x128xf32>
    %cst_9 = arith.constant dense<0.000000e+00> : vector<8x128xf32>
    %25 = vector.multi_reduction <add>, %24, %cst_9 [0] : vector<100x8x128xf32> to vector<8x128xf32>
    %c0_i32 = arith.constant 0 : i32
    %26 = arith.cmpi eq, %arg1, %c0_i32 : i32
    %27 = arith.extui %26 : i1 to i32
    %c0_i32_10 = arith.constant 0 : i32
    %28 = arith.cmpi ne, %27, %c0_i32_10 : i32
    scf.if %28 {
      %c0_15 = arith.constant 0 : index
      %c0_16 = arith.constant 0 : index
      %35 = vector.load %arg5[%c0_15, %c0_16] : memref<8x128xf32, #tpu.memory_space<vmem>>, vector<8x128xf32>
      tpu.vector_store %arg5[%c0_15, %c0_16], %20 {strides = array<i32>} : memref<8x128xf32, #tpu.memory_space<vmem>>, vector<8x128xf32>,
      %c0_17 = arith.constant 0 : index
      %c0_18 = arith.constant 0 : index
      %36 = vector.load %arg6[%c0_17, %c0_18] : memref<8x128xf32, #tpu.memory_space<vmem>>, vector<8x128xf32>
      tpu.vector_store %arg6[%c0_17, %c0_18], %25 {strides = array<i32>} : memref<8x128xf32, #tpu.memory_space<vmem>>, vector<8x128xf32>,
    } else {
    }
    %c0_i32_11 = arith.constant 0 : i32
    %29 = arith.cmpi sgt, %arg1, %c0_i32_11 : i32
    %30 = arith.extui %29 : i1 to i32
    %c0_i32_12 = arith.constant 0 : i32
    %31 = arith.cmpi ne, %30, %c0_i32_12 : i32
    scf.if %31 {
      %c100_i32 = arith.constant 100 : i32
      %35 = arith.muli %arg1, %c100_i32 : i32
      %36 = arith.sitofp %35 : i32 to f32
      %cst_15 = arith.constant 1.000000e+02 : f32
      %37 = arith.addf %36, %cst_15 : f32
      %c0_16 = arith.constant 0 : index
      %c0_17 = arith.constant 0 : index
      %38 = vector.load %arg5[%c0_16, %c0_17] : memref<8x128xf32, #tpu.memory_space<vmem>>, vector<8x128xf32>
      %39 = arith.subf %20, %38 : vector<8x128xf32>
      %cst_18 = arith.constant 1.000000e+02 : f32
      %40 = arith.divf %cst_18, %37 : f32
      %41 = vector.broadcast %40 : f32 to vector<8x128xf32>
      %42 = arith.mulf %39, %41 : vector<8x128xf32>
      %43 = arith.addf %38, %42 : vector<8x128xf32>
      %c0_19 = arith.constant 0 : index
      %c0_20 = arith.constant 0 : index
      %44 = vector.load %arg5[%c0_19, %c0_20] : memref<8x128xf32, #tpu.memory_space<vmem>>, vector<8x128xf32>
      tpu.vector_store %arg5[%c0_19, %c0_20], %43 {strides = array<i32>} : memref<8x128xf32, #tpu.memory_space<vmem>>, vector<8x128xf32>,
      %c0_21 = arith.constant 0 : index
      %c0_22 = arith.constant 0 : index
      %45 = vector.load %arg6[%c0_21, %c0_22] : memref<8x128xf32, #tpu.memory_space<vmem>>, vector<8x128xf32>
      %46 = arith.addf %45, %25 : vector<8x128xf32>
      %47 = arith.mulf %39, %39 : vector<8x128xf32>
      %cst_23 = arith.constant 1.000000e+02 : f32
      %48 = arith.mulf %36, %cst_23 : f32
      %49 = arith.divf %48, %37 : f32
      %50 = vector.broadcast %49 : f32 to vector<8x128xf32>
      %51 = arith.mulf %47, %50 : vector<8x128xf32>
      %52 = arith.addf %46, %51 : vector<8x128xf32>
      %c0_24 = arith.constant 0 : index
      %c0_25 = arith.constant 0 : index
      %53 = vector.load %arg6[%c0_24, %c0_25] : memref<8x128xf32, #tpu.memory_space<vmem>>, vector<8x128xf32>
      tpu.vector_store %arg6[%c0_24, %c0_25], %52 {strides = array<i32>} : memref<8x128xf32, #tpu.memory_space<vmem>>, vector<8x128xf32>,
    } else {
    }
    %c0_i32_13 = arith.constant 0 : i32
    %32 = arith.cmpi eq, %arg1, %c0_i32_13 : i32
    %33 = arith.extui %32 : i1 to i32
    %c0_i32_14 = arith.constant 0 : i32
    %34 = arith.cmpi ne, %33, %c0_i32_14 : i32
    scf.if %34 {
      %c0_15 = arith.constant 0 : index
      %c0_16 = arith.constant 0 : index
      %35 = vector.load %arg6[%c0_15, %c0_16] : memref<8x128xf32, #tpu.memory_space<vmem>>, vector<8x128xf32>
      %cst_17 = arith.constant 0.0101010101 : f32
      %36 = vector.broadcast %cst_17 : f32 to vector<8x128xf32>
      %37 = arith.mulf %35, %36 : vector<8x128xf32>
      %c0_18 = arith.constant 0 : index
      %c0_19 = arith.constant 0 : index
      %38 = vector.load %arg6[%c0_18, %c0_19] : memref<8x128xf32, #tpu.memory_space<vmem>>, vector<8x128xf32>
      tpu.vector_store %arg6[%c0_18, %c0_19], %37 {strides = array<i32>} : memref<8x128xf32, #tpu.memory_space<vmem>>, vector<8x128xf32>,
    } else {
    }
    return
  }
  func.func @transform_0(%arg0: i32, %arg1: i32) -> (i32, i32) {
    %c0_i32 = arith.constant 0 : i32
    %c0_i32_0 = arith.constant 0 : i32
    return %arg0, %c0_i32 : i32, i32
  }
  func.func @transform_1(%arg0: i32, %arg1: i32) -> (i32, i32) {
    %c0_i32 = arith.constant 0 : i32
    %c0_i32_0 = arith.constant 0 : i32
    return %arg0, %c0_i32 : i32, i32
  }
  func.func @transform_2(%arg0: i32, %arg1: i32) -> (i32, i32, i32) {
    %c0_i32 = arith.constant 0 : i32
    %c0_i32_0 = arith.constant 0 : i32
    return %arg1, %arg0, %c0_i32 : i32, i32, i32
  }
  func.func @transform_3(%arg0: i32, %arg1: i32) -> (i32, i32) {
    %c0_i32 = arith.constant 0 : i32
    %c0_i32_0 = arith.constant 0 : i32
    return %arg0, %c0_i32 : i32, i32
  }
  func.func @transform_4(%arg0: i32, %arg1: i32) -> (i32, i32) {
    %c0_i32 = arith.constant 0 : i32
    %c0_i32_0 = arith.constant 0 : i32
    return %arg0, %c0_i32 : i32, i32
  }
}

</mosaic_0001>

<bundles_post_ra>
// kernel: tpu_custom_call.1
= control target key start
LH: loop header
LB: loop body
LE: loop exit
PB: predicated region body
PF: predicated region fallthrough
CT: control target
= control target key end

     0   :  { %10 = vsyncpa [#allocation3], 0  ;;  %s4153_s0 = inlined_call_operand.hbm [shape: f32[8,128], index: 0, kind: input, shape index: {}]   ;;  %s4154_s1 = inlined_call_operand.hbm [shape: f32[8,128], index: 1, kind: input, shape index: {}]   ;;  %s4155_s2 = inlined_call_operand.hbm [shape: f32[100,8,128], index: 2, kind: input, shape index: {}]   ;;  %s4156_s3 = inlined_call_operand.hbm [shape: f32[8,128], index: 3, kind: output, shape index: {0}]   ;;  %s4157_s4 = inlined_call_operand.hbm [shape: f32[8,128], index: 4, kind: output, shape index: {1}]  }
   0x1   :  { %11 = vsyncpa [#allocation6], 0 }
   0x2   :  { %12 = vsyncpa [#allocation4], 0 }
   0x3   :  { %13 = vsyncpa [#allocation10], 0  ;;  %s2254_s15 = smov [#allocation5]   ;;  %s2255_s17 = smov [#allocation2]  }
   0x4   :  { %s30_s16 = sshll.u32 %s2254_s15, 4  ;;  %s20_s18 = sshll.u32 %s2255_s17, 4  ;;  %s31_s16 = int_to_ptr.vmem [resolvable:$true] %s30_s16  ;;  %s21_s18 = int_to_ptr.vmem [resolvable:$true] %s20_s18 }
   0x5   :  { %s2136_s21 = scalar_lea.hbm %s4154_s1, 128 }
   0x6   :  { %p2137_p0 = scmp.ne.s32.totalorder %s4154_s1, %s2136_s21  ;;  %p2140_p1 = scmp.lt.u32.totalorder %s2136_s21, %s4154_s1 }
   0x8   :  { %p2142_p2 = pnand %p2140_p1, %p2137_p0 }
   0xa   :  { %2145 = shalt.err (!%p2142_p2)
}
   0xb   :  { %s2146_s26 = scalar_lea.vmem %s31_s16, 128  ;;  %p2151_p4 = scmp.lt.s32.totalorder %s31_s16, %s31_s16 }
   0xc   :  { %p2147_p3 = scmp.ne.s32.totalorder %s31_s16, %s2146_s26  ;;  %p2152_p5 = scmp.lt.s32.totalorder %s2146_s26, %s2146_s26 }
   0xe   :  { %p2153_p6 = por %p2152_p5, %p2151_p4 }
  0x10   :  { %p2154_p7 = pnand %p2153_p6, %p2147_p3 }
  0x12   :  { %2157 = shalt.err (!%p2154_p7)
}
  0x13   :  { %33 = dma.hbm_to_vmem [thread:$0]  %s4154_s1, 128, %s31_s16, [#allocation6]  }
  0x14   :  { %s2158_s5 = scalar_lea.hbm %s4153_s0, 128 }
  0x15   :  { %p2159_p8 = scmp.ne.s32.totalorder %s4153_s0, %s2158_s5  ;;  %p2162_p9 = scmp.lt.u32.totalorder %s2158_s5, %s4153_s0 }
  0x17   :  { %p2164_p10 = pnand %p2162_p9, %p2159_p8 }
  0x19   :  { %2167 = shalt.err (!%p2164_p10)
}
  0x1a   :  { %s2168_s10 = scalar_lea.vmem %s21_s18, 128  ;;  %p2173_p12 = scmp.lt.s32.totalorder %s21_s18, %s21_s18 }
  0x1b   :  { %p2169_p11 = scmp.ne.s32.totalorder %s21_s18, %s2168_s10  ;;  %p2174_p13 = scmp.lt.s32.totalorder %s2168_s10, %s2168_s10 }
  0x1d   :  { %p2175_p0 = por %p2174_p13, %p2173_p12 }
  0x1f   :  { %p2176_p1 = pnand %p2175_p0, %p2169_p11 }
  0x21   :  { %2179 = shalt.err (!%p2176_p1)
}
  0x22   :  { %23 = dma.hbm_to_vmem [thread:$0]  %s4153_s0, 128, %s21_s18, [#allocation3]  }
  0x23   :  { %s2256_s12 = smov [#allocation7]   ;;  %s2180_s16 = scalar_lea.hbm %s4155_s2, 12800 }
  0x24   :  { %s39_s13 = sshll.u32 %s2256_s12, 4  ;;  %p2181_p2 = scmp.ne.s32.totalorder %s4155_s2, %s2180_s16  ;;  %s40_s13 = int_to_ptr.vmem [resolvable:$true] %s39_s13 }
  0x25   :  { %p2184_p3 = scmp.lt.u32.totalorder %s2180_s16, %s4155_s2 }
  0x27   :  { %p2186_p4 = pnand %p2184_p3, %p2181_p2 }
  0x29   :  { %2189 = shalt.err (!%p2186_p4)
}
  0x2a   :  { %s2190_s22 = scalar_lea.vmem %s40_s13, 12800  ;;  %p2195_p6 = scmp.lt.s32.totalorder %s40_s13, %s40_s13 }
  0x2b   :  { %p2191_p5 = scmp.ne.s32.totalorder %s40_s13, %s2190_s22  ;;  %p2196_p7 = scmp.lt.s32.totalorder %s2190_s22, %s2190_s22 }
  0x2d   :  { %p2197_p8 = por %p2196_p7, %p2195_p6 }
  0x2f   :  { %p2198_p9 = pnand %p2197_p8, %p2191_p5 }
  0x31   :  { %2201 = shalt.err (!%p2198_p9)
}
  0x32   :  { %s2257_s0 = smov 128   ;;  %s2258_s18 = smov 8  }
  0x33   :  { %45 = dma.hbm_to_vmem [thread:$0]  %s4155_s2, 12800, %s40_s13, [#allocation6], %s2257_s0, %s2257_s0, %s2258_s18  }
  0x34   :  { %2246 = dma.done.wait [#allocation3], 128  }
  0x35   :  { %2247 = vsyncadd [#allocation3], 4294967168 }
  0x36   :  { %2248 = dma.done.wait [#allocation6], 12928  }
  0x37   :  { %2249 = vsyncadd [#allocation6], 4294954368  ;;  %v2322_v0 = vld [vmem:[#allocation2] sm:$0xff]  ;;  %v2324_v1 = vld [vmem:[#allocation5] sm:$0xff]  ;;  %s2259_s2 = smov [#allocation8]  }
  0x38   :  { %v59_v2 = vld [vmem:[#allocation7 + $0x10] sm:$0xff]  ;;  %v57_v4 = vld [vmem:[#allocation7] sm:$0xff]  ;;  %v60_v5 = vld [vmem:[#allocation7 + $0x18] sm:$0xff]  ;;  %s1703_s25 = sshll.u32 %s2259_s2, 4  ;;  %s1704_s25 = int_to_ptr.vmem [resolvable:$true] %s1703_s25 }
  0x39   :  { %v159_v3 = vmul.f32 %v59_v2, %v2324_v1  ;;  %v58_v6 = vld [vmem:[#allocation7 + $0x8] sm:$0xff]  ;;  %v157_v7 = vmul.f32 %v57_v4, %v2324_v1  ;;  %v160_v8 = vmul.f32 %v60_v5, %v2324_v1  ;;  %v61_v12 = vld [vmem:[#allocation7 + $0x20] sm:$0xff]  ;;  %v64_v17 = vld [vmem:[#allocation7 + $0x38] sm:$0xff]  ;;  %s2202_s26 = scalar_lea.vmem %s1704_s25, 128  ;;  %p2207_p11 = scmp.lt.s32.totalorder %s1704_s25, %s1704_s25 }
  0x3a   :  { %v158_v9 = vmul.f32 %v58_v6, %v2324_v1  ;;  %v62_v10 = vld [vmem:[#allocation7 + $0x28] sm:$0xff]  ;;  %v161_v18 = vmul.f32 %v61_v12, %v2324_v1  ;;  %v63_v19 = vld [vmem:[#allocation7 + $0x30] sm:$0xff]  ;;  %v164_v21 = vmul.f32 %v64_v17, %v2324_v1  ;;  %v65_v25 = vld [vmem:[#allocation7 + $0x40] sm:$0xff]  ;;  %p2203_p10 = scmp.ne.s32.totalorder %s1704_s25, %s2202_s26  ;;  %p2208_p12 = scmp.lt.s32.totalorder %s2202_s26, %s2202_s26 }
  0x3b   :  { %v2331_v11 = vadd.f32 %v159_v3, %v2322_v0  ;;  %v2334_v13 = vadd.f32 %v157_v7, %v2322_v0  ;;  %v2338_v14 = vadd.f32 %v160_v8, %v2322_v0  ;;  %v162_v15 = vmul.f32 %v62_v10, %v2324_v1  ;;  %v66_v22 = vld [vmem:[#allocation7 + $0x48] sm:$0xff]  ;;  %v68_v28 = vld [vmem:[#allocation7 + $0x58] sm:$0xff]  ;;  %v67_v31 = vld [vmem:[#allocation7 + $0x50] sm:$0xff] }
  0x3c   :  { %v2343_v16 = vadd.f32 %v158_v9, %v2322_v0  ;;  %v2353_v23 = vadd.f32 %v161_v18, %v2322_v0  ;;  %v163_v24 = vmul.f32 %v63_v19, %v2324_v1  ;;  %v2358_v26 = vadd.f32 %v164_v21, %v2322_v0  ;;  %v70_v34 = vld [vmem:[#allocation7 + $0x68] sm:$0xff]  ;;  %v69_v37 = vld [vmem:[#allocation7 + $0x60] sm:$0xff]  ;;  %v72_v40 = vld [vmem:[#allocation7 + $0x78] sm:$0xff]  ;;  %p2209_p13 = por %p2208_p12, %p2207_p11 }
  0x3d   :  { %361 = vmax.xlane.f32.xlu1 %v2331_v11  ;;  %357 = vmax.xlane.f32.xlu0 %v2334_v13  ;;  %v2348_v20 = vadd.f32 %v162_v15, %v2322_v0  ;;  %v166_v27 = vmul.f32 %v66_v22, %v2324_v1  ;;  %v165_v30 = vmul.f32 %v65_v25, %v2324_v1  ;;  %v71_v43 = vld [vmem:[#allocation7 + $0x70] sm:$0xff]  ;;  %v74_v46 = vld [vmem:[#allocation7 + $0x88] sm:$0xff]  ;;  %v73_v49 = vld [vmem:[#allocation7 + $0x80] sm:$0xff] }
  0x3e   :  { %v2363_v29 = vadd.f32 %v163_v24, %v2322_v0  ;;  %v168_v33 = vmul.f32 %v68_v28, %v2324_v1  ;;  %v167_v36 = vmul.f32 %v67_v31, %v2324_v1  ;;  %v170_v39 = vmul.f32 %v70_v34, %v2324_v1  ;;  %v76_v52 = vld [vmem:[#allocation7 + $0x98] sm:$0xff]  ;;  %v75_v55 = vld [vmem:[#allocation7 + $0x90] sm:$0xff]  ;;  %v78_v58 = vld [vmem:[#allocation7 + $0xa8] sm:$0xff]  ;;  %p2210_p0 = pnand %p2209_p13, %p2203_p10 }
  0x3f   :  { %v2368_v32 = vadd.f32 %v166_v27, %v2322_v0  ;;  %v2373_v35 = vadd.f32 %v165_v30, %v2322_v0  ;;  %v169_v42 = vmul.f32 %v69_v37, %v2324_v1  ;;  %v172_v45 = vmul.f32 %v72_v40, %v2324_v1  ;;  %v77_v61 = vld [vmem:[#allocation7 + $0xa0] sm:$0xff]  ;;  %v80_v2 = vld [vmem:[#allocation7 + $0xb8] sm:$0xff]  ;;  %v79_v5 = vld [vmem:[#allocation7 + $0xb0] sm:$0xff] }
  0x40   :  { %v2378_v38 = vadd.f32 %v168_v33, %v2322_v0  ;;  %v2383_v41 = vadd.f32 %v167_v36, %v2322_v0  ;;  %v2388_v44 = vadd.f32 %v170_v39, %v2322_v0  ;;  %v171_v48 = vmul.f32 %v71_v43, %v2324_v1  ;;  %v82_v8 = vld [vmem:[#allocation7 + $0xc8] sm:$0xff]  ;;  %v81_v12 = vld [vmem:[#allocation7 + $0xc0] sm:$0xff]  ;;  %v84_v18 = vld [vmem:[#allocation7 + $0xd8] sm:$0xff] }
  0x41   :  { %363 = vmax.xlane.f32.xlu1 %v2338_v14  ;;  %359 = vmax.xlane.f32.xlu0 %v2343_v16  ;;  %v2393_v47 = vadd.f32 %v169_v42, %v2322_v0  ;;  %v2398_v50 = vadd.f32 %v172_v45, %v2322_v0  ;;  %v174_v51 = vmul.f32 %v74_v46, %v2324_v1  ;;  %v83_v22 = vld [vmem:[#allocation7 + $0xd0] sm:$0xff]  ;;  %v86_v27 = vld [vmem:[#allocation7 + $0xe8] sm:$0xff]  ;;  %v85_v31 = vld [vmem:[#allocation7 + $0xe0] sm:$0xff] }
  0x42   :  { %v2403_v53 = vadd.f32 %v171_v48, %v2322_v0  ;;  %v173_v54 = vmul.f32 %v73_v49, %v2324_v1  ;;  %v176_v57 = vmul.f32 %v76_v52, %v2324_v1  ;;  %v175_v60 = vmul.f32 %v75_v55, %v2324_v1  ;;  %v88_v36 = vld [vmem:[#allocation7 + $0xf8] sm:$0xff]  ;;  %v87_v40 = vld [vmem:[#allocation7 + $0xf0] sm:$0xff]  ;;  %v90_v45 = vld [vmem:[#allocation7 + $0x108] sm:$0xff] }
  0x43   :  { %v2408_v56 = vadd.f32 %v174_v51, %v2322_v0  ;;  %v178_v63 = vmul.f32 %v78_v58, %v2324_v1  ;;  %v177_v4 = vmul.f32 %v77_v61, %v2324_v1  ;;  %v180_v7 = vmul.f32 %v80_v2, %v2324_v1  ;;  %v89_v49 = vld [vmem:[#allocation7 + $0x100] sm:$0xff]  ;;  %v91_v58 = vld [vmem:[#allocation7 + $0x110] sm:$0xff] }
  0x44   :  { %v2413_v59 = vadd.f32 %v173_v54, %v2322_v0  ;;  %v2418_v62 = vadd.f32 %v176_v57, %v2322_v0  ;;  %v2423_v3 = vadd.f32 %v175_v60, %v2322_v0  ;;  %v179_v10 = vmul.f32 %v79_v5, %v2324_v1  ;;  %v92_v54 = vld [vmem:[#allocation7 + $0x118] sm:$0xff]  ;;  %v93_v5 = vld [vmem:[#allocation7 + $0x120] sm:$0xff] }
  0x45   :  { %367 = vmax.xlane.f32.xlu1 %v2348_v20  ;;  %365 = vmax.xlane.f32.xlu0 %v2353_v23  ;;  %v2428_v6 = vadd.f32 %v178_v63, %v2322_v0  ;;  %v2433_v9 = vadd.f32 %v177_v4, %v2322_v0  ;;  %v2438_v15 = vadd.f32 %v180_v7, %v2322_v0  ;;  %v94_v63 = vld [vmem:[#allocation7 + $0x128] sm:$0xff] }
  0x46   :  { %v182_v17 = vmul.f32 %v82_v8, %v2324_v1  ;;  %v2443_v19 = vadd.f32 %v179_v10, %v2322_v0  ;;  %v181_v21 = vmul.f32 %v81_v12, %v2324_v1  ;;  %v184_v25 = vmul.f32 %v84_v18, %v2324_v1  ;;  %v96_v10 = vld [vmem:[#allocation7 + $0x138] sm:$0xff]  ;;  %v95_v18 = vld [vmem:[#allocation7 + $0x130] sm:$0xff] }
  0x47   :  { %v183_v30 = vmul.f32 %v83_v22, %v2324_v1  ;;  %v186_v34 = vmul.f32 %v86_v27, %v2324_v1  ;;  %v185_v39 = vmul.f32 %v85_v31, %v2324_v1  ;;  %v188_v43 = vmul.f32 %v88_v36, %v2324_v1  ;;  %v97_v31 = vld [vmem:[#allocation7 + $0x140] sm:$0xff] }
  0x48   :  { %v2448_v24 = vadd.f32 %v182_v17, %v2322_v0  ;;  %v2453_v28 = vadd.f32 %v181_v21, %v2322_v0  ;;  %v2458_v33 = vadd.f32 %v184_v25, %v2322_v0  ;;  %v187_v48 = vmul.f32 %v87_v40, %v2324_v1  ;;  %v98_v25 = vld [vmem:[#allocation7 + $0x148] sm:$0xff] }
  0x49   :  { %371 = vmax.xlane.f32.xlu1 %v2358_v26  ;;  %369 = vmax.xlane.f32.xlu0 %v2363_v29  ;;  %v2463_v37 = vadd.f32 %v183_v30, %v2322_v0  ;;  %v2468_v42 = vadd.f32 %v186_v34, %v2322_v0  ;;  %v2473_v46 = vadd.f32 %v185_v39, %v2322_v0  ;;  %v100_v39 = vld [vmem:[#allocation7 + $0x158] sm:$0xff] }
  0x4a   :  { %v2478_v51 = vadd.f32 %v188_v43, %v2322_v0  ;;  %v190_v52 = vmul.f32 %v90_v45, %v2324_v1  ;;  %v2483_v55 = vadd.f32 %v187_v48, %v2322_v0  ;;  %v189_v57 = vmul.f32 %v89_v49, %v2324_v1  ;;  %v99_v45 = vld [vmem:[#allocation7 + $0x150] sm:$0xff] }
  0x4b   :  { %v192_v61 = vmul.f32 %v92_v54, %v2324_v1  ;;  %v191_v4 = vmul.f32 %v91_v58, %v2324_v1  ;;  %v194_v8 = vmul.f32 %v94_v63, %v2324_v1  ;;  %v193_v17 = vmul.f32 %v93_v5, %v2324_v1  ;;  %v101_v58 = vld [vmem:[#allocation7 + $0x160] sm:$0xff] }
  0x4c   :  { %v2488_v60 = vadd.f32 %v190_v52, %v2322_v0  ;;  %v2493_v2 = vadd.f32 %v189_v57, %v2322_v0  ;;  %v196_v22 = vmul.f32 %v96_v10, %v2324_v1  ;;  %v195_v30 = vmul.f32 %v95_v18, %v2324_v1  ;;  %v102_v52 = vld [vmem:[#allocation7 + $0x168] sm:$0xff]  ;;  %v104_v18 = vld [vmem:[#allocation7 + $0x178] sm:$0xff] }
  0x4d   :  { %375 = vmax.xlane.f32.xlu1 %v2368_v32  ;;  %373 = vmax.xlane.f32.xlu0 %v2373_v35  ;;  %v2498_v7 = vadd.f32 %v192_v61, %v2322_v0  ;;  %v2503_v12 = vadd.f32 %v191_v4, %v2322_v0  ;;  %v2508_v21 = vadd.f32 %v194_v8, %v2322_v0  ;;  %v103_v4 = vld [vmem:[#allocation7 + $0x170] sm:$0xff] }
  0x4e   :  { %v2513_v27 = vadd.f32 %v193_v17, %v2322_v0  ;;  %v2518_v34 = vadd.f32 %v196_v22, %v2322_v0  ;;  %v198_v36 = vmul.f32 %v98_v25, %v2324_v1  ;;  %v2523_v40 = vadd.f32 %v195_v30, %v2322_v0 }
  0x4f   :  { %v197_v43 = vmul.f32 %v97_v31, %v2324_v1  ;;  %v200_v49 = vmul.f32 %v100_v39, %v2324_v1  ;;  %v199_v57 = vmul.f32 %v99_v45, %v2324_v1  ;;  %v202_v63 = vmul.f32 %v102_v52, %v2324_v1  ;;  %v105_v31 = vld [vmem:[#allocation7 + $0x180] sm:$0xff]  ;;  %v107_v52 = vld [vmem:[#allocation7 + $0x190] sm:$0xff] }
  0x50   :  { %v2528_v48 = vadd.f32 %v198_v36, %v2322_v0  ;;  %v201_v8 = vmul.f32 %v101_v58, %v2324_v1  ;;  %v203_v17 = vmul.f32 %v103_v4, %v2324_v1  ;;  %v204_v30 = vmul.f32 %v104_v18, %v2324_v1 }
  0x51   :  { %379 = vmax.xlane.f32.xlu1 %v2378_v38  ;;  %377 = vmax.xlane.f32.xlu0 %v2383_v41  ;;  %v2533_v54 = vadd.f32 %v197_v43, %v2322_v0  ;;  %v2538_v61 = vadd.f32 %v200_v49, %v2322_v0  ;;  %v2543_v5 = vadd.f32 %v199_v57, %v2322_v0  ;;  %v106_v43 = vld [vmem:[#allocation7 + $0x188] sm:$0xff] }
  0x52   :  { %v2548_v10 = vadd.f32 %v202_v63, %v2322_v0  ;;  %v2553_v22 = vadd.f32 %v201_v8, %v2322_v0  ;;  %v2557_v25 = vadd.f32 %v203_v17, %v2322_v0  ;;  %v2563_v36 = vadd.f32 %v204_v30, %v2322_v0  ;;  %v108_v63 = vld [vmem:[#allocation7 + $0x198] sm:$0xff]  ;;  %v109_v17 = vld [vmem:[#allocation7 + $0x1a0] sm:$0xff] }
  0x53   :  { %4314 = vst [vmem:[#allocation15_spill] sm:$0xff] %v2538_v61  ;;  %4315 = vst [vmem:[#allocation16_spill] sm:$0xff] %v2543_v5  ;;  %v205_v39 = vmul.f32 %v105_v31, %v2324_v1  ;;  %v206_v49 = vmul.f32 %v106_v43, %v2324_v1  ;;  %v207_v58 = vmul.f32 %v107_v52, %v2324_v1  ;;  %v110_v31 = vld [vmem:[#allocation7 + $0x1a8] sm:$0xff] }
  0x54   :  { %4316 = vst [vmem:[#allocation17_spill] sm:$0xff] %v2548_v10  ;;  %4317 = vst [vmem:[#allocation18_spill] sm:$0xff] %v2553_v22  ;;  %v208_v8 = vmul.f32 %v108_v63, %v2324_v1  ;;  %v209_v30 = vmul.f32 %v109_v17, %v2324_v1  ;;  %v210_v43 = vmul.f32 %v110_v31, %v2324_v1  ;;  %v112_v63 = vld [vmem:[#allocation7 + $0x1b8] sm:$0xff] }
  0x55   :  { %383 = vmax.xlane.f32.xlu1 %v2388_v44  ;;  %381 = vmax.xlane.f32.xlu0 %v2393_v47  ;;  %4318 = vst [vmem:[#allocation19_spill] sm:$0xff] %v2557_v25  ;;  %4319 = vst [vmem:[#allocation20_spill] sm:$0xff] %v2563_v36  ;;  %v2568_v45 = vadd.f32 %v205_v39, %v2322_v0  ;;  %v2573_v57 = vadd.f32 %v206_v49, %v2322_v0  ;;  %v111_v49 = vld [vmem:[#allocation7 + $0x1b0] sm:$0xff] }
  0x56   :  { %v2578_v4 = vadd.f32 %v207_v58, %v2322_v0  ;;  %v2583_v18 = vadd.f32 %v208_v8, %v2322_v0  ;;  %v2588_v39 = vadd.f32 %v209_v30, %v2322_v0  ;;  %v2593_v52 = vadd.f32 %v210_v43, %v2322_v0  ;;  %v113_v30 = vld [vmem:[#allocation7 + $0x1c0] sm:$0xff]  ;;  %v114_v43 = vld [vmem:[#allocation7 + $0x1c8] sm:$0xff] }
  0x57   :  { %4320 = vst [vmem:[#allocation21_spill] sm:$0xff] %v2568_v45  ;;  %4321 = vst [vmem:[#allocation22_spill] sm:$0xff] %v2573_v57  ;;  %v211_v58 = vmul.f32 %v111_v49, %v2324_v1  ;;  %v212_v17 = vmul.f32 %v112_v63, %v2324_v1 }
  0x58   :  { %4322 = vst [vmem:[#allocation23_spill] sm:$0xff] %v2578_v4  ;;  %4323 = vst [vmem:[#allocation24_spill] sm:$0xff] %v2583_v18 }
  0x59   :  { %387 = vmax.xlane.f32.xlu1 %v2398_v50  ;;  %385 = vmax.xlane.f32.xlu0 %v2403_v53  ;;  %4324 = vst [vmem:[#allocation25_spill] sm:$0xff] %v2588_v39  ;;  %4325 = vst [vmem:[#allocation26_spill] sm:$0xff] %v2593_v52  ;;  %v2598_v8 = vadd.f32 %v211_v58, %v2322_v0  ;;  %v2603_v31 = vadd.f32 %v212_v17, %v2322_v0  ;;  %v115_v58 = vld [vmem:[#allocation7 + $0x1d0] sm:$0xff]  ;;  %v116_v17 = vld [vmem:[#allocation7 + $0x1d8] sm:$0xff] }
  0x5b   :  { %4326 = vst [vmem:[#allocation27_spill] sm:$0xff] %v2598_v8  ;;  %4327 = vst [vmem:[#allocation28_spill] sm:$0xff] %v2603_v31 }
  0x5d   :  { %391 = vmax.xlane.f32.xlu1 %v2408_v56  ;;  %389 = vmax.xlane.f32.xlu0 %v2413_v59 }
  0x61   :  { %395 = vmax.xlane.f32.xlu1 %v2418_v62  ;;  %393 = vmax.xlane.f32.xlu0 %v2423_v3 }
  0x65   :  { %399 = vmax.xlane.f32.xlu1 %v2428_v6  ;;  %397 = vmax.xlane.f32.xlu0 %v2433_v9 }
  0x69   :  { %403 = vmax.xlane.f32.xlu1 %v2438_v15  ;;  %401 = vmax.xlane.f32.xlu0 %v2443_v19 }
  0x6d   :  { %407 = vmax.xlane.f32.xlu1 %v2448_v24  ;;  %405 = vmax.xlane.f32.xlu0 %v2453_v28 }
  0x71   :  { %411 = vmax.xlane.f32.xlu1 %v2458_v33  ;;  %409 = vmax.xlane.f32.xlu0 %v2463_v37 }
  0x75   :  { %415 = vmax.xlane.f32.xlu1 %v2468_v42  ;;  %413 = vmax.xlane.f32.xlu0 %v2473_v46 }
  0x79   :  { %419 = vmax.xlane.f32.xlu1 %v2478_v51  ;;  %417 = vmax.xlane.f32.xlu0 %v2483_v55 }
  0x7d   :  { %423 = vmax.xlane.f32.xlu1 %v2488_v60  ;;  %421 = vmax.xlane.f32.xlu0 %v2493_v2 }
  0x81   :  { %427 = vmax.xlane.f32.xlu1 %v2498_v7  ;;  %425 = vmax.xlane.f32.xlu0 %v2503_v12 }
  0x85   :  { %431 = vmax.xlane.f32.xlu1 %v2508_v21  ;;  %429 = vmax.xlane.f32.xlu0 %v2513_v27 }
  0x89   :  { %435 = vmax.xlane.f32.xlu1 %v2518_v34  ;;  %433 = vmax.xlane.f32.xlu0 %v2523_v40 }
  0x8d   :  { %439 = vmax.xlane.f32.xlu1 %v2528_v48  ;;  %437 = vmax.xlane.f32.xlu0 %v2533_v54 }
  0x91   :  { %443 = vmax.xlane.f32.xlu1 %v2538_v61  ;;  %441 = vmax.xlane.f32.xlu0 %v2543_v5 }
  0x95   :  { %447 = vmax.xlane.f32.xlu1 %v2548_v10  ;;  %445 = vmax.xlane.f32.xlu0 %v2553_v22  ;;  %v120_v22 = vld [vmem:[#allocation7 + $0x1f8] sm:$0xff] }
  0x99   :  { %449 = vmax.xlane.f32.xlu1 %v2557_v25 }
  0x9d   :  { %451 = vmax.xlane.f32.xlu1 %v2563_v36 }
  0xa1   :  { %453 = vmax.xlane.f32.xlu1 %v2568_v45 }
  0xa5   :  { %455 = vmax.xlane.f32.xlu1 %v2573_v57 }
  0xa9   :  { %457 = vmax.xlane.f32.xlu1 %v2578_v4 }
  0xad   :  { %459 = vmax.xlane.f32.xlu1 %v2583_v18  ;;  %v118_v18 = vld [vmem:[#allocation7 + $0x1e8] sm:$0xff] }
  0xb1   :  { %461 = vmax.xlane.f32.xlu1 %v2588_v39  ;;  %v213_v39 = vmul.f32 %v113_v30, %v2324_v1 }
  0xb3   :  { %v2608_v49 = vadd.f32 %v213_v39, %v2322_v0  ;;  %v117_v39 = vld [vmem:[#allocation7 + $0x1e0] sm:$0xff] }
  0xb5   :  { %463 = vmax.xlane.f32.xlu1 %v2593_v52  ;;  %4328 = vst [vmem:[#allocation29_spill] sm:$0xff] %v2608_v49  ;;  %v214_v52 = vmul.f32 %v114_v43, %v2324_v1 }
  0xb7   :  { %v2613_v63 = vadd.f32 %v214_v52, %v2322_v0 }
  0xb9   :  { %465 = vmax.xlane.f32.xlu1 %v2598_v8  ;;  %v215_v8 = vmul.f32 %v115_v58, %v2324_v1 }
  0xbb   :  { %v2618_v30 = vadd.f32 %v215_v8, %v2322_v0  ;;  %v218_v8 = vmul.f32 %v118_v18, %v2324_v1 }
  0xbd   :  { %467 = vmax.xlane.f32.xlu1 %v2603_v31  ;;  %4329 = vst [vmem:[#allocation30_spill] sm:$0xff] %v2618_v30  ;;  %v216_v31 = vmul.f32 %v116_v17, %v2324_v1  ;;  %v119_v17 = vld [vmem:[#allocation7 + $0x1f0] sm:$0xff] }
  0xbe   :  { %v219_v36 = vmul.f32 %v119_v17, %v2324_v1 }
  0xbf   :  { %v2623_v43 = vadd.f32 %v216_v31, %v2322_v0 }
  0xc1   :  { %469 = vmax.xlane.f32.xlu1 %v2608_v49  ;;  %v217_v49 = vmul.f32 %v117_v39, %v2324_v1  ;;  %v2635_v39 = vadd.f32 %v218_v8, %v2322_v0 }
  0xc3   :  { %v2628_v58 = vadd.f32 %v217_v49, %v2322_v0 }
  0xc5   :  { %471 = vmax.xlane.f32.xlu1 %v2613_v63 }
  0xc9   :  { %473 = vmax.xlane.f32.xlu1 %v2618_v30 }
  0xca   :  { %v362_v52 = vpop.xlane.xlu1 %361  ;;  %v358_v4 = vpop.xlane.xlu0 %357 }
  0xcb   :  { %v559_v30 = vsub.f32 %v2331_v11, %v362_v52  ;;  %v557_v25 = vsub.f32 %v2334_v13, %v358_v4  ;;  %v2642_v11 = vadd.f32 %v219_v36, %v2322_v0  ;;  %v121_v13 = vld [vmem:[#allocation7 + $0x200] sm:$0xff] }
  0xcd   :  { %475 = vmax.xlane.f32.xlu1 %v2623_v43  ;;  %v661_v61 = vmul.f32 1.442695, %v559_v30 }
  0xce   :  { %v364_v57 = vpop.xlane.xlu1 %363  ;;  %v360_v45 = vpop.xlane.xlu0 %359 }
  0xcf   :  { %v558_v31 = vsub.f32 %v2343_v16, %v360_v45  ;;  %v560_v5 = vsub.f32 %v2338_v14, %v364_v57  ;;  %v220_v16 = vmul.f32 %v120_v22, %v2324_v1  ;;  %v657_v45 = vmul.f32 1.442695, %v557_v25 }
  0xd0   :  { %v221_v14 = vmul.f32 %v121_v13, %v2324_v1 }
  0xd1   :  { %477 = vmax.xlane.f32.xlu1 %v2628_v58  ;;  %v659_v49 = vmul.f32 1.442695, %v558_v31  ;;  %v663_v4 = vmul.f32 1.442695, %v560_v5  ;;  %v2648_v30 = vadd.f32 %v220_v16, %v2322_v0  ;;  %v122_v31 = vld [vmem:[#allocation7 + $0x208] sm:$0xff] }
  0xd2   :  { %v368_v10 = vpop.xlane.xlu1 %367  ;;  %v366_v18 = vpop.xlane.xlu0 %365 }
  0xd3   :  { %1734 = vpow2.f32 %v659_v49  ;;  %v561_v8 = vsub.f32 %v2353_v23, %v366_v18  ;;  %v562_v22 = vsub.f32 %v2348_v20, %v368_v10  ;;  %v2654_v23 = vadd.f32 %v221_v14, %v2322_v0 }
  0xd4   :  { %1736 = vpow2.f32 %v661_v61  ;;  %v222_v20 = vmul.f32 %v122_v31, %v2324_v1 }
  0xd5   :  { %479 = vmax.xlane.f32.xlu1 %v2635_v39  ;;  %1738 = vpow2.f32 %v657_v45  ;;  %v665_v36 = vmul.f32 1.442695, %v561_v8  ;;  %v667_v49 = vmul.f32 1.442695, %v562_v22  ;;  %v123_v45 = vld [vmem:[#allocation7 + $0x210] sm:$0xff] }
  0xd6   :  { %v372_v52 = vpop.xlane.xlu1 %371  ;;  %v370_v17 = vpop.xlane.xlu0 %369  ;;  %1740 = vpow2.f32 %v663_v4  ;;  %v2674_v4 = vadd.f32 %v222_v20, %v2322_v0  ;;  %v223_v14 = vmul.f32 %v123_v45, %v2324_v1  ;;  %v125_v45 = vld [vmem:[#allocation7 + $0x220] sm:$0xff] }
  0xd7   :  { %1742 = vpow2.f32 %v665_v36  ;;  %v563_v25 = vsub.f32 %v2363_v29, %v370_v17  ;;  %v564_v29 = vsub.f32 %v2358_v26, %v372_v52 }
  0xd8   :  { %1744 = vpow2.f32 %v667_v49  ;;  %v2687_v52 = vadd.f32 %v223_v14, %v2322_v0  ;;  %v225_v14 = vmul.f32 %v125_v45, %v2324_v1 }
  0xd9   :  { %481 = vmax.xlane.f32.xlu1 %v2642_v11  ;;  %v669_v16 = vmul.f32 1.442695, %v563_v25  ;;  %v124_v25 = vld [vmem:[#allocation7 + $0x218] sm:$0xff]  ;;  %v671_v26 = vmul.f32 1.442695, %v564_v29 }
  0xda   :  { %v376_v57 = vpop.xlane.xlu1 %375  ;;  %v374_v8 = vpop.xlane.xlu0 %373  ;;  %v224_v49 = vmul.f32 %v124_v25, %v2324_v1 }
  0xdb   :  { %1746 = vpow2.f32 %v669_v16  ;;  %v565_v22 = vsub.f32 %v2373_v35, %v374_v8  ;;  %v566_v8 = vsub.f32 %v2368_v32, %v376_v57  ;;  %v2709_v57 = vadd.f32 %v225_v14, %v2322_v0 }
  0xdc   :  { %1748 = vpow2.f32 %v671_v26  ;;  %v2696_v29 = vadd.f32 %v224_v49, %v2322_v0 }
  0xdd   :  { %483 = vmax.xlane.f32.xlu1 %v2648_v30  ;;  %v2656_v61 = vpop.eup %1734  ;;  %v673_v16 = vmul.f32 1.442695, %v565_v22  ;;  %v675_v32 = vmul.f32 1.442695, %v566_v8 }
  0xde   :  { %4330 = vst [vmem:[#allocation31_spill] sm:$0xff] %v2656_v61  ;;  %v2658_v5 = vpop.xlane.xlu1 %379  ;;  %859 = vadd.xlane.f32.xlu0 %v2656_v61  ;;  %v2664_v10 = vpop.eup %1736  ;;  %v129_v61 = vld [vmem:[#allocation7 + $0x240] sm:$0xff] }
  0xdf   :  { %4331 = vst [vmem:[#allocation32_spill] sm:$0xff] %v2664_v10  ;;  %v2669_v13 = vpop.eup %1738  ;;  %v378_v35 = vpop.xlane.xlu0 %377  ;;  %1750 = vpow2.f32 %v673_v16 }
  0xe0   :  { %4332 = vst [vmem:[#allocation33_spill] sm:$0xff] %v2669_v13  ;;  %v2677_v36 = vpop.eup %1740  ;;  %v567_v22 = vsub.f32 %v2383_v41, %v378_v35  ;;  %1752 = vpow2.f32 %v675_v32  ;;  %v568_v35 = vsub.f32 %v2378_v38, %v2658_v5 }
  0xe1   :  { %485 = vmax.xlane.f32.xlu1 %v2654_v23  ;;  %4333 = vst [vmem:[#allocation34_spill] sm:$0xff] %v2677_v36  ;;  %v2683_v31 = vpop.eup %1742 }
  0xe2   :  { %v2666_v18 = vpop.xlane.xlu1 %383  ;;  %861 = vadd.xlane.f32.xlu0 %v2664_v10  ;;  %4334 = vst [vmem:[#allocation35_spill] sm:$0xff] %v2683_v31  ;;  %v126_v10 = vld [vmem:[#allocation7 + $0x228] sm:$0xff]  ;;  %v677_v16 = vmul.f32 1.442695, %v567_v22  ;;  %v679_v38 = vmul.f32 1.442695, %v568_v35 }
  0xe3   :  { %v226_v49 = vmul.f32 %v126_v10, %v2324_v1  ;;  %v382_v41 = vpop.xlane.xlu0 %381 }
  0xe4   :  { %1754 = vpow2.f32 %v677_v16  ;;  %v569_v22 = vsub.f32 %v2393_v47, %v382_v41  ;;  %v570_v41 = vsub.f32 %v2388_v44, %v2666_v18 }
  0xe5   :  { %857 = vadd.xlane.f32.xlu1 %v2669_v13  ;;  %v2719_v8 = vadd.f32 %v226_v49, %v2322_v0  ;;  %1756 = vpow2.f32 %v679_v38  ;;  %v131_v13 = vld [vmem:[#allocation7 + $0x250] sm:$0xff] }
  0xe6   :  { %v2679_v17 = vpop.xlane.xlu1 %387  ;;  %863 = vadd.xlane.f32.xlu0 %v2677_v36  ;;  %v2699_v36 = vpop.eup %1744  ;;  %v681_v16 = vmul.f32 1.442695, %v569_v22  ;;  %v683_v44 = vmul.f32 1.442695, %v570_v41 }
  0xe7   :  { %4335 = vst [vmem:[#allocation36_spill] sm:$0xff] %v2699_v36  ;;  %v2705_v26 = vpop.eup %1746  ;;  %v386_v47 = vpop.xlane.xlu0 %385 }
  0xe8   :  { %4336 = vst [vmem:[#allocation37_spill] sm:$0xff] %v2705_v26  ;;  %1758 = vpow2.f32 %v681_v16  ;;  %v571_v22 = vsub.f32 %v2403_v53, %v386_v47  ;;  %v572_v47 = vsub.f32 %v2398_v50, %v2679_v17 }
  0xe9   :  { %487 = vmax.xlane.f32.xlu1 %v2674_v4  ;;  %1760 = vpow2.f32 %v683_v44 }
  0xea   :  { %v2690_v20 = vpop.xlane.xlu1 %391  ;;  %865 = vadd.xlane.f32.xlu0 %v2683_v31  ;;  %v127_v31 = vld [vmem:[#allocation7 + $0x230] sm:$0xff]  ;;  %v685_v16 = vmul.f32 1.442695, %v571_v22  ;;  %v687_v50 = vmul.f32 1.442695, %v572_v47 }
  0xeb   :  { %v227_v14 = vmul.f32 %v127_v31, %v2324_v1  ;;  %v390_v53 = vpop.xlane.xlu0 %389 }
  0xec   :  { %1762 = vpow2.f32 %v685_v16  ;;  %v573_v22 = vsub.f32 %v2413_v59, %v390_v53  ;;  %v574_v53 = vsub.f32 %v2408_v56, %v2690_v20 }
  0xed   :  { %489 = vmax.xlane.f32.xlu1 %v2687_v52  ;;  %v2732_v5 = vadd.f32 %v227_v14, %v2322_v0  ;;  %v229_v14 = vmul.f32 %v129_v61, %v2324_v1  ;;  %1764 = vpow2.f32 %v687_v50 }
  0xee   :  { %v2701_v25 = vpop.xlane.xlu1 %395  ;;  %867 = vadd.xlane.f32.xlu0 %v2699_v36  ;;  %v2722_v36 = vpop.eup %1748  ;;  %v689_v16 = vmul.f32 1.442695, %v573_v22  ;;  %v691_v56 = vmul.f32 1.442695, %v574_v53 }
  0xef   :  { %4337 = vst [vmem:[#allocation38_spill] sm:$0xff] %v2722_v36  ;;  %v2728_v32 = vpop.eup %1750  ;;  %v2755_v18 = vadd.f32 %v229_v14, %v2322_v0  ;;  %v231_v14 = vmul.f32 %v131_v13, %v2324_v1  ;;  %v394_v59 = vpop.xlane.xlu0 %393 }
  0xf0   :  { %4338 = vst [vmem:[#allocation39_spill] sm:$0xff] %v2728_v32  ;;  %1766 = vpow2.f32 %v689_v16  ;;  %v575_v22 = vsub.f32 %v2423_v3, %v394_v59  ;;  %v576_v59 = vsub.f32 %v2418_v62, %v2701_v25 }
  0xf1   :  { %491 = vmax.xlane.f32.xlu1 %v2696_v29  ;;  %4341 = vst [vmem:[#allocation42_spill] sm:$0xff] %v2755_v18  ;;  %v2778_v17 = vadd.f32 %v231_v14, %v2322_v0  ;;  %1768 = vpow2.f32 %v691_v56 }
  0xf2   :  { %v2712_v45 = vpop.xlane.xlu1 %399  ;;  %869 = vadd.xlane.f32.xlu0 %v2705_v26  ;;  %v128_v26 = vld [vmem:[#allocation7 + $0x238] sm:$0xff]  ;;  %v693_v16 = vmul.f32 1.442695, %v575_v22  ;;  %v695_v62 = vmul.f32 1.442695, %v576_v59 }
  0xf3   :  { %v228_v31 = vmul.f32 %v128_v26, %v2324_v1  ;;  %4344 = vst [vmem:[#allocation45_spill] sm:$0xff] %v2778_v17  ;;  %v398_v3 = vpop.xlane.xlu0 %397 }
  0xf4   :  { %1770 = vpow2.f32 %v693_v16  ;;  %v577_v22 = vsub.f32 %v2433_v9, %v398_v3  ;;  %v578_v3 = vsub.f32 %v2428_v6, %v2712_v45 }
  0xf5   :  { %493 = vmax.xlane.f32.xlu1 %v2709_v57  ;;  %v2742_v35 = vadd.f32 %v228_v31, %v2322_v0  ;;  %1772 = vpow2.f32 %v695_v62 }
  0xf6   :  { %v2724_v10 = vpop.xlane.xlu1 %403  ;;  %871 = vadd.xlane.f32.xlu0 %v2722_v36  ;;  %v2745_v36 = vpop.eup %1752  ;;  %v697_v16 = vmul.f32 1.442695, %v577_v22  ;;  %v699_v6 = vmul.f32 1.442695, %v578_v3 }
  0xf7   :  { %4339 = vst [vmem:[#allocation40_spill] sm:$0xff] %v2745_v36  ;;  %v2751_v38 = vpop.eup %1754  ;;  %v402_v9 = vpop.xlane.xlu0 %401 }
  0xf8   :  { %4340 = vst [vmem:[#allocation41_spill] sm:$0xff] %v2751_v38  ;;  %1774 = vpow2.f32 %v697_v16  ;;  %v579_v22 = vsub.f32 %v2443_v19, %v402_v9  ;;  %v580_v9 = vsub.f32 %v2438_v15, %v2724_v10 }
  0xf9   :  { %495 = vmax.xlane.f32.xlu1 %v2719_v8  ;;  %1776 = vpow2.f32 %v699_v6 }
  0xfa   :  { %v2735_v49 = vpop.xlane.xlu1 %407  ;;  %873 = vadd.xlane.f32.xlu0 %v2728_v32  ;;  %v130_v32 = vld [vmem:[#allocation7 + $0x248] sm:$0xff]  ;;  %v701_v16 = vmul.f32 1.442695, %v579_v22  ;;  %v703_v15 = vmul.f32 1.442695, %v580_v9 }
  0xfb   :  { %v230_v61 = vmul.f32 %v130_v32, %v2324_v1  ;;  %v406_v19 = vpop.xlane.xlu0 %405 }
  0xfc   :  { %1778 = vpow2.f32 %v701_v16  ;;  %v581_v22 = vsub.f32 %v2453_v28, %v406_v19  ;;  %v582_v19 = vsub.f32 %v2448_v24, %v2735_v49 }
  0xfd   :  { %497 = vmax.xlane.f32.xlu1 %v2732_v5  ;;  %v2765_v41 = vadd.f32 %v230_v61, %v2322_v0  ;;  %1780 = vpow2.f32 %v703_v15 }
  0xfe   :  { %v2747_v26 = vpop.xlane.xlu1 %411  ;;  %875 = vadd.xlane.f32.xlu0 %v2745_v36  ;;  %v2768_v36 = vpop.eup %1756  ;;  %v705_v16 = vmul.f32 1.442695, %v581_v22  ;;  %v707_v24 = vmul.f32 1.442695, %v582_v19  ;;  %v2902_v19 = vld [vmem:[#allocation2] sm:$0xff] }
  0xff   :  { %4342 = vst [vmem:[#allocation43_spill] sm:$0xff] %v2768_v36  ;;  %v2774_v44 = vpop.eup %1758  ;;  %v410_v28 = vpop.xlane.xlu0 %409 }
 0x100   :  { %4343 = vst [vmem:[#allocation44_spill] sm:$0xff] %v2774_v44  ;;  %1782 = vpow2.f32 %v705_v16  ;;  %v583_v22 = vsub.f32 %v2463_v37, %v410_v28  ;;  %v584_v28 = vsub.f32 %v2458_v33, %v2747_v26 }
 0x101   :  { %499 = vmax.xlane.f32.xlu1 %v2742_v35  ;;  %1784 = vpow2.f32 %v707_v24 }
 0x102   :  { %v2758_v31 = vpop.xlane.xlu1 %415  ;;  %877 = vadd.xlane.f32.xlu0 %v2751_v38  ;;  %v132_v38 = vld [vmem:[#allocation7 + $0x258] sm:$0xff]  ;;  %v709_v16 = vmul.f32 1.442695, %v583_v22  ;;  %v711_v26 = vmul.f32 1.442695, %v584_v28 }
 0x103   :  { %v232_v13 = vmul.f32 %v132_v38, %v2324_v1  ;;  %v414_v37 = vpop.xlane.xlu0 %413 }
 0x104   :  { %1786 = vpow2.f32 %v709_v16  ;;  %v585_v24 = vsub.f32 %v2473_v46, %v414_v37  ;;  %v586_v37 = vsub.f32 %v2468_v42, %v2758_v31 }
 0x105   :  { %501 = vmax.xlane.f32.xlu1 %v2755_v18  ;;  %v133_v18 = vld [vmem:[#allocation7 + $0x260] sm:$0xff]  ;;  %v2788_v47 = vadd.f32 %v232_v13, %v2322_v0  ;;  %1788 = vpow2.f32 %v711_v26 }
 0x106   :  { %v2770_v32 = vpop.xlane.xlu1 %419  ;;  %879 = vadd.xlane.f32.xlu0 %v2768_v36  ;;  %v233_v14 = vmul.f32 %v133_v18, %v2324_v1  ;;  %v2791_v36 = vpop.eup %1760  ;;  %v713_v16 = vmul.f32 1.442695, %v585_v24  ;;  %v715_v42 = vmul.f32 1.442695, %v586_v37 }
 0x107   :  { %4345 = vst [vmem:[#allocation46_spill] sm:$0xff] %v2791_v36  ;;  %v2797_v50 = vpop.eup %1762  ;;  %v418_v46 = vpop.xlane.xlu0 %417 }
 0x108   :  { %4346 = vst [vmem:[#allocation47_spill] sm:$0xff] %v2797_v50  ;;  %v2801_v20 = vadd.f32 %v233_v14, %v2322_v0  ;;  %1790 = vpow2.f32 %v713_v16  ;;  %v587_v24 = vsub.f32 %v2483_v55, %v418_v46  ;;  %v588_v46 = vsub.f32 %v2478_v51, %v2770_v32 }
 0x109   :  { %503 = vmax.xlane.f32.xlu1 %v2765_v41  ;;  %1792 = vpow2.f32 %v715_v42 }
 0x10a   :  { %v2781_v61 = vpop.xlane.xlu1 %423  ;;  %881 = vadd.xlane.f32.xlu0 %v2774_v44  ;;  %v134_v44 = vld [vmem:[#allocation7 + $0x268] sm:$0xff]  ;;  %4347 = vst [vmem:[#allocation48_spill] sm:$0xff] %v2801_v20  ;;  %v717_v16 = vmul.f32 1.442695, %v587_v24  ;;  %v719_v51 = vmul.f32 1.442695, %v588_v46 }
 0x10b   :  { %v234_v18 = vmul.f32 %v134_v44, %v2324_v1  ;;  %v422_v55 = vpop.xlane.xlu0 %421 }
 0x10c   :  { %1794 = vpow2.f32 %v717_v16  ;;  %v589_v24 = vsub.f32 %v2493_v2, %v422_v55  ;;  %v590_v2 = vsub.f32 %v2488_v60, %v2781_v61 }
 0x10d   :  { %505 = vmax.xlane.f32.xlu1 %v2778_v17  ;;  %v135_v17 = vld [vmem:[#allocation7 + $0x270] sm:$0xff]  ;;  %v2811_v53 = vadd.f32 %v234_v18, %v2322_v0 }
 0x10e   :  { %v2793_v38 = vpop.xlane.xlu1 %427  ;;  %883 = vadd.xlane.f32.xlu0 %v2791_v36  ;;  %v235_v14 = vmul.f32 %v135_v17, %v2324_v1  ;;  %v2814_v36 = vpop.eup %1764  ;;  %v721_v16 = vmul.f32 1.442695, %v589_v24  ;;  %1796 = vpow2.f32 %v719_v51  ;;  %v723_v60 = vmul.f32 1.442695, %v590_v2 }
 0x10f   :  { %4348 = vst [vmem:[#allocation49_spill] sm:$0xff] %v2814_v36  ;;  %v2820_v56 = vpop.eup %1766  ;;  %v426_v32 = vpop.xlane.xlu0 %425 }
 0x110   :  { %4349 = vst [vmem:[#allocation50_spill] sm:$0xff] %v2820_v56  ;;  %v2824_v25 = vadd.f32 %v235_v14, %v2322_v0  ;;  %1798 = vpow2.f32 %v721_v16  ;;  %v591_v24 = vsub.f32 %v2503_v12, %v426_v32  ;;  %v592_v12 = vsub.f32 %v2498_v7, %v2793_v38 }
 0x111   :  { %507 = vmax.xlane.f32.xlu1 %v2788_v47 }
 0x112   :  { %v2804_v13 = vpop.xlane.xlu1 %431  ;;  %885 = vadd.xlane.f32.xlu0 %v2797_v50  ;;  %v136_v50 = vld [vmem:[#allocation7 + $0x278] sm:$0xff]  ;;  %4350 = vst [vmem:[#allocation51_spill] sm:$0xff] %v2824_v25  ;;  %v725_v16 = vmul.f32 1.442695, %v591_v24 }
 0x113   :  { %v236_v17 = vmul.f32 %v136_v50, %v2324_v1  ;;  %v152_v24 = vld [vmem:[#allocation7 + $0x2f8] sm:$0xff] }
 0x115   :  { %509 = vmax.xlane.f32.xlu1 %v2801_v20  ;;  %v137_v20 = vld [vmem:[#allocation7 + $0x280] sm:$0xff]  ;;  %v2834_v59 = vadd.f32 %v236_v17, %v2322_v0 }
 0x116   :  { %v2816_v44 = vpop.xlane.xlu1 %435  ;;  %887 = vadd.xlane.f32.xlu0 %v2814_v36  ;;  %v237_v14 = vmul.f32 %v137_v20, %v2324_v1  ;;  %v2837_v36 = vpop.eup %1768  ;;  %1800 = vpow2.f32 %v723_v60 }
 0x117   :  { %4351 = vst [vmem:[#allocation52_spill] sm:$0xff] %v2837_v36  ;;  %v2843_v62 = vpop.eup %1770  ;;  %1802 = vpow2.f32 %v725_v16  ;;  %v153_v16 = vld [vmem:[#allocation7 + $0x300] sm:$0xff] }
 0x118   :  { %4352 = vst [vmem:[#allocation53_spill] sm:$0xff] %v2843_v62  ;;  %v2847_v45 = vadd.f32 %v237_v14, %v2322_v0 }
 0x119   :  { %511 = vmax.xlane.f32.xlu1 %v2811_v53 }
 0x11a   :  { %v2827_v18 = vpop.xlane.xlu1 %439  ;;  %889 = vadd.xlane.f32.xlu0 %v2820_v56  ;;  %v138_v56 = vld [vmem:[#allocation7 + $0x288] sm:$0xff]  ;;  %4353 = vst [vmem:[#allocation54_spill] sm:$0xff] %v2847_v45 }
 0x11b   :  { %v238_v20 = vmul.f32 %v138_v56, %v2324_v1 }
 0x11d   :  { %513 = vmax.xlane.f32.xlu1 %v2824_v25  ;;  %v139_v25 = vld [vmem:[#allocation7 + $0x290] sm:$0xff]  ;;  %v2857_v3 = vadd.f32 %v238_v20, %v2322_v0 }
 0x11e   :  { %v2839_v50 = vpop.xlane.xlu1 %443  ;;  %891 = vadd.xlane.f32.xlu0 %v2837_v36  ;;  %v239_v14 = vmul.f32 %v139_v25, %v2324_v1  ;;  %v2860_v36 = vpop.eup %1772 }
 0x11f   :  { %4354 = vst [vmem:[#allocation55_spill] sm:$0xff] %v2860_v36  ;;  %v2866_v6 = vpop.eup %1774 }
 0x120   :  { %4355 = vst [vmem:[#allocation56_spill] sm:$0xff] %v2866_v6  ;;  %v2870_v10 = vadd.f32 %v239_v14, %v2322_v0 }
 0x121   :  { %515 = vmax.xlane.f32.xlu1 %v2834_v59 }
 0x122   :  { %v2850_v17 = vpop.xlane.xlu1 %447  ;;  %893 = vadd.xlane.f32.xlu0 %v2843_v62  ;;  %v140_v62 = vld [vmem:[#allocation7 + $0x298] sm:$0xff]  ;;  %4356 = vst [vmem:[#allocation57_spill] sm:$0xff] %v2870_v10 }
 0x123   :  { %v240_v25 = vmul.f32 %v140_v62, %v2324_v1 }
 0x125   :  { %517 = vmax.xlane.f32.xlu1 %v2847_v45  ;;  %v141_v45 = vld [vmem:[#allocation7 + $0x2a0] sm:$0xff]  ;;  %v2880_v9 = vadd.f32 %v240_v25, %v2322_v0 }
 0x126   :  { %v2862_v56 = vpop.xlane.xlu1 %449  ;;  %895 = vadd.xlane.f32.xlu0 %v2860_v36  ;;  %v241_v14 = vmul.f32 %v141_v45, %v2324_v1  ;;  %v2883_v36 = vpop.eup %1776 }
 0x127   :  { %4357 = vst [vmem:[#allocation58_spill] sm:$0xff] %v2883_v36  ;;  %v2889_v15 = vpop.eup %1778 }
 0x128   :  { %4358 = vst [vmem:[#allocation59_spill] sm:$0xff] %v2889_v15  ;;  %v2893_v49 = vadd.f32 %v241_v14, %v2322_v0  ;;  %v2907_v14 = vld [vmem:[#allocation5] sm:$0xff] }
 0x129   :  { %519 = vmax.xlane.f32.xlu1 %v2857_v3 }
 0x12a   :  { %v2873_v20 = vpop.xlane.xlu1 %451  ;;  %897 = vadd.xlane.f32.xlu0 %v2866_v6  ;;  %v142_v6 = vld [vmem:[#allocation7 + $0x2a8] sm:$0xff]  ;;  %4359 = vst [vmem:[#allocation60_spill] sm:$0xff] %v2893_v49 }
 0x12b   :  { %v242_v45 = vmul.f32 %v142_v6, %v2324_v1  ;;  %v2910_v6 = vpop.eup %1780 }
 0x12c   :  { %4360 = vst [vmem:[#allocation61_spill] sm:$0xff] %v2910_v6  ;;  %v2916_v33 = vpop.eup %1782 }
 0x12d   :  { %521 = vmax.xlane.f32.xlu1 %v2870_v10  ;;  %v143_v10 = vld [vmem:[#allocation7 + $0x2b0] sm:$0xff]  ;;  %v2905_v0 = vadd.f32 %v2902_v19, %v242_v45  ;;  %4361 = vst [vmem:[#allocation62_spill] sm:$0xff] %v2916_v33 }
 0x12e   :  { %v2885_v62 = vpop.xlane.xlu1 %453  ;;  %899 = vadd.xlane.f32.xlu0 %v2883_v36  ;;  %v243_v1 = vmul.f32 %v2907_v14, %v143_v10 }
 0x130   :  { %v2920_v45 = vadd.f32 %v2902_v19, %v243_v1 }
 0x131   :  { %523 = vmax.xlane.f32.xlu1 %v2880_v9 }
 0x132   :  { %v2896_v25 = vpop.xlane.xlu1 %455  ;;  %901 = vadd.xlane.f32.xlu0 %v2889_v15  ;;  %v144_v15 = vld [vmem:[#allocation7 + $0x2b8] sm:$0xff]  ;;  %4362 = vst [vmem:[#allocation63_spill] sm:$0xff] %v2920_v45 }
 0x133   :  { %v244_v10 = vmul.f32 %v2907_v14, %v144_v15 }
 0x135   :  { %525 = vmax.xlane.f32.xlu1 %v2893_v49  ;;  %v145_v49 = vld [vmem:[#allocation7 + $0x2c0] sm:$0xff]  ;;  %v2930_v28 = vadd.f32 %v2902_v19, %v244_v10 }
 0x136   :  { %v2912_v22 = vpop.xlane.xlu1 %457  ;;  %903 = vadd.xlane.f32.xlu0 %v2910_v6  ;;  %v245_v1 = vmul.f32 %v2907_v14, %v145_v49  ;;  %v2933_v6 = vpop.eup %1784 }
 0x137   :  { %4363 = vst [vmem:[#allocation64_spill] sm:$0xff] %v2930_v28  ;;  %4364 = vst [vmem:[#allocation65_spill] sm:$0xff] %v2933_v6  ;;  %v2939_v26 = vpop.eup %1786 }
 0x138   :  { %4365 = vst [vmem:[#allocation66_spill] sm:$0xff] %v2939_v26  ;;  %v2943_v31 = vadd.f32 %v2902_v19, %v245_v1 }
 0x139   :  { %527 = vmax.xlane.f32.xlu1 %v2905_v0 }
 0x13a   :  { %v2923_v36 = vpop.xlane.xlu1 %459  ;;  %905 = vadd.xlane.f32.xlu0 %v2916_v33  ;;  %v146_v33 = vld [vmem:[#allocation7 + $0x2c8] sm:$0xff]  ;;  %4366 = vst [vmem:[#allocation67_spill] sm:$0xff] %v2943_v31 }
 0x13b   :  { %v246_v49 = vmul.f32 %v2907_v14, %v146_v33 }
 0x13d   :  { %529 = vmax.xlane.f32.xlu1 %v2920_v45  ;;  %v147_v45 = vld [vmem:[#allocation7 + $0x2d0] sm:$0xff]  ;;  %v2953_v37 = vadd.f32 %v2902_v19, %v246_v49 }
 0x13e   :  { %v2935_v15 = vpop.xlane.xlu1 %461  ;;  %907 = vadd.xlane.f32.xlu0 %v2933_v6  ;;  %v247_v1 = vmul.f32 %v2907_v14, %v147_v45  ;;  %v2956_v6 = vpop.eup %1788 }
 0x13f   :  { %4367 = vst [vmem:[#allocation68_spill] sm:$0xff] %v2956_v6  ;;  %v2962_v42 = vpop.eup %1790 }
 0x140   :  { %4368 = vst [vmem:[#allocation69_spill] sm:$0xff] %v2962_v42  ;;  %v2966_v49 = vadd.f32 %v2902_v19, %v247_v1  ;;  %v2979_v1 = vpop.eup %1792 }
 0x141   :  { %531 = vmax.xlane.f32.xlu1 %v2930_v28  ;;  %v149_v28 = vld [vmem:[#allocation7 + $0x2e0] sm:$0xff]  ;;  %4371 = vst [vmem:[#allocation72_spill] sm:$0xff] %v2979_v1  ;;  %v2985_v51 = vpop.eup %1794 }
 0x142   :  { %v2946_v10 = vpop.xlane.xlu1 %463  ;;  %909 = vadd.xlane.f32.xlu0 %v2939_v26  ;;  %v148_v26 = vld [vmem:[#allocation7 + $0x2d8] sm:$0xff]  ;;  %4369 = vst [vmem:[#allocation70_spill] sm:$0xff] %v2966_v49  ;;  %v249_v46 = vmul.f32 %v2907_v14, %v149_v28  ;;  %4372 = vst [vmem:[#allocation73_spill] sm:$0xff] %v2985_v51 }
 0x143   :  { %v248_v45 = vmul.f32 %v2907_v14, %v148_v26 }
 0x144   :  { %v2989_v61 = vadd.f32 %v2902_v19, %v249_v46 }
 0x145   :  { %533 = vmax.xlane.f32.xlu1 %v2943_v31  ;;  %v2976_v55 = vadd.f32 %v2902_v19, %v248_v45 }
 0x146   :  { %v2958_v33 = vpop.xlane.xlu1 %465  ;;  %911 = vadd.xlane.f32.xlu0 %v2956_v6  ;;  %v430_v6 = vpop.xlane.xlu0 %429  ;;  %4373 = vst [vmem:[#allocation74_spill] sm:$0xff] %v2989_v61 }
 0x147   :  { %4370 = vst [vmem:[#allocation71_spill] sm:$0xff] %v2976_v55  ;;  %v593_v7 = vsub.f32 %v2513_v27, %v430_v6  ;;  %v253_v6 = vmul.f32 %v2907_v14, %v153_v16 }
 0x149   :  { %535 = vmax.xlane.f32.xlu1 %v2953_v37 }
 0x14a   :  { %v2969_v31 = vpop.xlane.xlu1 %467  ;;  %913 = vadd.xlane.f32.xlu0 %v2962_v42  ;;  %v150_v42 = vld [vmem:[#allocation7 + $0x2e8] sm:$0xff]  ;;  %v434_v32 = vpop.xlane.xlu0 %433 }
 0x14b   :  { %v250_v28 = vmul.f32 %v2907_v14, %v150_v42 }
 0x14d   :  { %537 = vmax.xlane.f32.xlu1 %v2966_v49  ;;  %v151_v49 = vld [vmem:[#allocation7 + $0x2f0] sm:$0xff]  ;;  %v2997_v2 = vadd.f32 %v2902_v19, %v250_v28 }
 0x14e   :  { %v2981_v26 = vpop.xlane.xlu1 %469  ;;  %915 = vadd.xlane.f32.xlu0 %v2979_v1  ;;  %v251_v46 = vmul.f32 %v2907_v14, %v151_v49  ;;  %v3000_v1 = vpop.eup %1796  ;;  %v252_v49 = vmul.f32 %v2907_v14, %v152_v24  ;;  %v154_v24 = vld [vmem:[#allocation7 + $0x308] sm:$0xff] }
 0x14f   :  { %4374 = vst [vmem:[#allocation75_spill] sm:$0xff] %v2997_v2  ;;  %4375 = vst [vmem:[#allocation76_spill] sm:$0xff] %v3000_v1  ;;  %v3005_v60 = vpop.eup %1798 }
 0x150   :  { %4376 = vst [vmem:[#allocation77_spill] sm:$0xff] %v3005_v60  ;;  %v3010_v38 = vadd.f32 %v2902_v19, %v251_v46  ;;  %v3018_v27 = vadd.f32 %v2902_v19, %v252_v49  ;;  %v254_v49 = vmul.f32 %v2907_v14, %v154_v24 }
 0x151   :  { %539 = vmax.xlane.f32.xlu1 %v2976_v55  ;;  %v729_v55 = vmul.f32 1.442695, %v593_v7  ;;  %v3031_v7 = vadd.f32 %v2902_v19, %v253_v6 }
 0x152   :  { %v472_v45 = vpop.xlane.xlu1 %471  ;;  %917 = vadd.xlane.f32.xlu0 %v2985_v51  ;;  %v727_v51 = vmul.f32 1.442695, %v592_v12  ;;  %4377 = vst [vmem:[#allocation78_spill] sm:$0xff] %v3010_v38  ;;  %v3021_v12 = vpop.eup %1800 }
 0x153   :  { %v614_v16 = vsub.f32 %v2613_v63, %v472_v45 }
 0x154   :  { %1804 = vpow2.f32 %v727_v51 }
 0x155   :  { %541 = vmax.xlane.f32.xlu1 %v2989_v61  ;;  %v438_v61 = vpop.xlane.xlu0 %437  ;;  %1806 = vpow2.f32 %v729_v55  ;;  %v596_v55 = vsub.f32 %v2518_v34, %v2816_v44  ;;  %v771_v24 = vmul.f32 1.442695, %v614_v16 }
 0x156   :  { %v3002_v42 = vpop.xlane.xlu1 %473  ;;  %919 = vadd.xlane.f32.xlu0 %v3000_v1  ;;  %v594_v1 = vsub.f32 %v2508_v21, %v2804_v13  ;;  %v595_v21 = vsub.f32 %v2523_v40, %v434_v32  ;;  %v3040_v40 = vadd.f32 %v2902_v19, %v254_v49  ;;  %v597_v44 = vsub.f32 %v2533_v54, %v438_v61 }
 0x157   :  { %v735_v34 = vmul.f32 1.442695, %v596_v55  ;;  %v598_v54 = vsub.f32 %v2528_v48, %v2827_v18  ;;  %v4379_v48 = vld [vmem:[#allocation16_spill] sm:$0xff] }
 0x158   :  { %v731_v51 = vmul.f32 1.442695, %v594_v1  ;;  %v733_v1 = vmul.f32 1.442695, %v595_v21  ;;  %v737_v61 = vmul.f32 1.442695, %v597_v44 }
 0x159   :  { %543 = vmax.xlane.f32.xlu1 %v2997_v2  ;;  %v442_v13 = vpop.xlane.xlu0 %441  ;;  %v155_v2 = vld [vmem:[#allocation7 + $0x310] sm:$0xff] }
 0x15a   :  { %v476_v28 = vpop.xlane.xlu1 %475  ;;  %921 = vadd.xlane.f32.xlu0 %v3005_v60  ;;  %v3026_v60 = vpop.eup %1802  ;;  %1808 = vpow2.f32 %v731_v51  ;;  %v255_v32 = vmul.f32 %v2907_v14, %v155_v2  ;;  %v156_v51 = vld [vmem:[#allocation7 + $0x318] sm:$0xff]  ;;  %v599_v18 = vsub.f32 %v4379_v48, %v442_v13  ;;  %v4381_v44 = vld [vmem:[#allocation15_spill] sm:$0xff] }
 0x15b   :  { %4378 = vst [vmem:[#allocation79_spill] sm:$0xff] %v3026_v60  ;;  %v616_v63 = vsub.f32 %v2623_v43, %v476_v28  ;;  %1810 = vpow2.f32 %v733_v1  ;;  %v256_v2 = vmul.f32 %v2907_v14, %v156_v51 }
 0x15c   :  { %v3052_v21 = vadd.f32 %v2902_v19, %v255_v32  ;;  %1812 = vpow2.f32 %v771_v24  ;;  %v739_v24 = vmul.f32 1.442695, %v598_v54 }
 0x15d   :  { %545 = vmax.xlane.f32.xlu1 %v3010_v38  ;;  %v775_v43 = vmul.f32 1.442695, %v616_v63  ;;  %1814 = vpow2.f32 %v735_v34  ;;  %v3065_v14 = vadd.f32 %v2902_v19, %v256_v2  ;;  %v600_v2 = vsub.f32 %v4381_v44, %v2839_v50 }
 0x15e   :  { %v3023_v46 = vpop.xlane.xlu1 %477  ;;  %923 = vadd.xlane.f32.xlu0 %v3021_v12  ;;  %v3043_v6 = vpop.eup %1804 }
 0x15f   :  { %v3055_v49 = vpop.eup %1806  ;;  %1816 = vpow2.f32 %v775_v43  ;;  %v741_v43 = vmul.f32 1.442695, %v599_v18 }
 0x160   :  { %1818 = vpow2.f32 %v737_v61 }
 0x161   :  { %547 = vmax.xlane.f32.xlu1 %v3018_v27 }
 0x162   :  { %v480_v38 = vpop.xlane.xlu1 %479  ;;  %925 = vadd.xlane.f32.xlu0 %v3026_v60  ;;  %v446_v60 = vpop.xlane.xlu0 %445 }
 0x163   :  { %v618_v28 = vsub.f32 %v2635_v39, %v480_v38 }
 0x164   :  { %v3067_v1 = vpop.eup %1808 }
 0x165   :  { %549 = vmax.xlane.f32.xlu1 %v3031_v7  ;;  %v779_v32 = vmul.f32 1.442695, %v618_v28  ;;  %v3077_v19 = vpop.eup %1810 }
 0x166   :  { %v3046_v45 = vpop.xlane.xlu1 %481  ;;  %927 = vadd.xlane.f32.xlu0 %v3043_v6 }
 0x167   :  { %1820 = vpow2.f32 %v779_v32  ;;  %v743_v32 = vmul.f32 1.442695, %v600_v2 }
 0x168   :  { %1822 = vpow2.f32 %v739_v24 }
 0x169   :  { %551 = vmax.xlane.f32.xlu1 %v3040_v40 }
 0x16a   :  { %v484_v16 = vpop.xlane.xlu1 %483  ;;  %929 = vadd.xlane.f32.xlu0 %v3055_v49 }
 0x16b   :  { %v3061_v55 = vpop.xlane.xlu0 %859  ;;  %v620_v39 = vsub.f32 %v2648_v30, %v484_v16  ;;  %v3082_v30 = vpop.eup %1812 }
 0x16c   :  { %4380 = vst [vmem:[#allocation16_spill] sm:$0xff] %v3082_v30  ;;  %v3089_v28 = vpop.eup %1814 }
 0x16d   :  { %553 = vmax.xlane.f32.xlu1 %v3052_v21  ;;  %v783_v51 = vmul.f32 1.442695, %v620_v39  ;;  %v3093_v61 = vpop.eup %1816  ;;  %v4383_v39 = vld [vmem:[#allocation18_spill] sm:$0xff] }
 0x16e   :  { %v3070_v38 = vpop.xlane.xlu1 %485  ;;  %931 = vadd.xlane.f32.xlu0 %v3067_v1  ;;  %4382 = vst [vmem:[#allocation15_spill] sm:$0xff] %v3093_v61  ;;  %v601_v24 = vsub.f32 %v4383_v39, %v446_v60  ;;  %v3099_v18 = vpop.eup %1818 }
 0x16f   :  { %v3074_v63 = vpop.xlane.xlu0 %861  ;;  %1824 = vpow2.f32 %v783_v51  ;;  %v4385_v51 = vld [vmem:[#allocation17_spill] sm:$0xff] }
 0x170   :  { %1826 = vpow2.f32 %v741_v43  ;;  %v602_v2 = vsub.f32 %v4385_v51, %v2850_v17  ;;  %v745_v43 = vmul.f32 1.442695, %v601_v24 }
 0x171   :  { %555 = vmax.xlane.f32.xlu1 %v3065_v14 }
 0x172   :  { %v3079_v34 = vpop.xlane.xlu1 %857  ;;  %933 = vadd.xlane.f32.xlu0 %v3077_v19 }
 0x173   :  { %v3086_v13 = vpop.xlane.xlu0 %863 }
 0x175   :  { %971 = vadd.xlane.f32.xlu1 %v3082_v30 }
 0x176   :  { %v488_v16 = vpop.xlane.xlu1 %487  ;;  %935 = vadd.xlane.f32.xlu0 %v3089_v28 }
 0x177   :  { %v622_v54 = vsub.f32 %v2674_v4, %v488_v16  ;;  %v3096_v50 = vpop.xlane.xlu0 %865  ;;  %v3104_v4 = vpop.eup %1820 }
 0x178   :  { %4384 = vst [vmem:[#allocation18_spill] sm:$0xff] %v3104_v4  ;;  %v3111_v16 = vpop.eup %1822 }
 0x179   :  { %v787_v48 = vmul.f32 1.442695, %v622_v54  ;;  %975 = vadd.xlane.f32.xlu1 %v3093_v61  ;;  %4386 = vst [vmem:[#allocation17_spill] sm:$0xff] %v3111_v16  ;;  %v747_v61 = vmul.f32 1.442695, %v602_v2  ;;  %v4390_v2 = vld [vmem:[#allocation20_spill] sm:$0xff] }
 0x17a   :  { %v3101_v44 = vpop.xlane.xlu1 %489  ;;  %937 = vadd.xlane.f32.xlu0 %v3099_v18 }
 0x17b   :  { %1828 = vpow2.f32 %v787_v48  ;;  %v3108_v60 = vpop.xlane.xlu0 %867  ;;  %v3115_v48 = vpop.eup %1824 }
 0x17c   :  { %1830 = vpow2.f32 %v743_v32  ;;  %4387 = vst [vmem:[#allocation80_spill] sm:$0xff] %v3115_v48  ;;  %v4388_v32 = vld [vmem:[#allocation19_spill] sm:$0xff]  ;;  %v3122_v51 = vpop.eup %1826 }
 0x17d   :  { %979 = vadd.xlane.f32.xlu1 %v3104_v4  ;;  %v603_v30 = vsub.f32 %v4388_v32, %v2862_v56  ;;  %1832 = vpow2.f32 %v745_v43  ;;  %4389 = vst [vmem:[#allocation19_spill] sm:$0xff] %v3122_v51 }
 0x17e   :  { %v492_v54 = vpop.xlane.xlu1 %491  ;;  %939 = vadd.xlane.f32.xlu0 %v3111_v16 }
 0x17f   :  { %v624_v39 = vsub.f32 %v2696_v29, %v492_v54  ;;  %v3119_v17 = vpop.xlane.xlu0 %869  ;;  %v749_v29 = vmul.f32 1.442695, %v603_v30  ;;  %v604_v54 = vsub.f32 %v4390_v2, %v2873_v20  ;;  %v4393_v30 = vld [vmem:[#allocation21_spill] sm:$0xff] }
 0x181   :  { %v791_v24 = vmul.f32 1.442695, %v624_v39  ;;  %983 = vadd.xlane.f32.xlu1 %v3115_v48 }
 0x182   :  { %v3124_v4 = vpop.xlane.xlu1 %493  ;;  %941 = vadd.xlane.f32.xlu0 %v3122_v51 }
 0x183   :  { %1834 = vpow2.f32 %v791_v24  ;;  %v3129_v16 = vpop.xlane.xlu0 %871  ;;  %v751_v24 = vmul.f32 1.442695, %v604_v54 }
 0x184   :  { %1836 = vpow2.f32 %v747_v61  ;;  %v605_v61 = vsub.f32 %v4393_v30, %v2885_v62 }
 0x185   :  { %v3131_v56 = vpop.eup %1828  ;;  %1838 = vpow2.f32 %v749_v29 }
 0x186   :  { %4391 = vst [vmem:[#allocation20_spill] sm:$0xff] %v3131_v56  ;;  %v3133_v43 = vpop.eup %1830  ;;  %987 = vadd.xlane.f32.xlu1 %v3131_v56  ;;  %v496_v39 = vpop.xlane.xlu1 %495  ;;  %v753_v56 = vmul.f32 1.442695, %v605_v61 }
 0x187   :  { %4392 = vst [vmem:[#allocation81_spill] sm:$0xff] %v3133_v43  ;;  %v626_v32 = vsub.f32 %v2719_v8, %v496_v39  ;;  %943 = vadd.xlane.f32.xlu0 %v3133_v43  ;;  %v3140_v48 = vpop.xlane.xlu0 %873  ;;  %v3142_v2 = vpop.eup %1832  ;;  %v4395_v8 = vld [vmem:[#allocation22_spill] sm:$0xff] }
 0x188   :  { %4394 = vst [vmem:[#allocation21_spill] sm:$0xff] %v3142_v2  ;;  %v606_v39 = vsub.f32 %v4395_v8, %v2896_v25 }
 0x189   :  { %v795_v20 = vmul.f32 1.442695, %v626_v32 }
 0x18a   :  { %v3144_v51 = vpop.xlane.xlu1 %497 }
 0x18b   :  { %1840 = vpow2.f32 %v795_v20  ;;  %945 = vadd.xlane.f32.xlu0 %v3142_v2  ;;  %v3149_v29 = vpop.xlane.xlu0 %875  ;;  %v755_v20 = vmul.f32 1.442695, %v606_v39 }
 0x18c   :  { %1842 = vpow2.f32 %v751_v24  ;;  %v4398_v24 = vld [vmem:[#allocation23_spill] sm:$0xff] }
 0x18d   :  { %v3151_v54 = vpop.eup %1834  ;;  %1844 = vpow2.f32 %v753_v56  ;;  %v607_v61 = vsub.f32 %v4398_v24, %v2912_v22 }
 0x18e   :  { %4396 = vst [vmem:[#allocation22_spill] sm:$0xff] %v3151_v54  ;;  %v3153_v62 = vpop.eup %1836  ;;  %991 = vadd.xlane.f32.xlu1 %v3151_v54  ;;  %v500_v32 = vpop.xlane.xlu1 %499 }
 0x18f   :  { %4397 = vst [vmem:[#allocation82_spill] sm:$0xff] %v3153_v62  ;;  %v628_v30 = vsub.f32 %v2742_v35, %v500_v32  ;;  %947 = vadd.xlane.f32.xlu0 %v3153_v62  ;;  %v3160_v2 = vpop.xlane.xlu0 %877  ;;  %v3162_v8 = vpop.eup %1838  ;;  %v757_v54 = vmul.f32 1.442695, %v607_v61  ;;  %v4400_v35 = vld [vmem:[#allocation24_spill] sm:$0xff] }
 0x190   :  { %4399 = vst [vmem:[#allocation23_spill] sm:$0xff] %v3162_v8  ;;  %v608_v32 = vsub.f32 %v4400_v35, %v2923_v36 }
 0x191   :  { %v799_v25 = vmul.f32 1.442695, %v628_v30 }
 0x192   :  { %v3164_v43 = vpop.xlane.xlu1 %501 }
 0x193   :  { %1846 = vpow2.f32 %v799_v25  ;;  %949 = vadd.xlane.f32.xlu0 %v3162_v8  ;;  %v3169_v56 = vpop.xlane.xlu0 %879  ;;  %v759_v25 = vmul.f32 1.442695, %v608_v32 }
 0x194   :  { %1848 = vpow2.f32 %v755_v20  ;;  %v4403_v20 = vld [vmem:[#allocation25_spill] sm:$0xff] }
 0x195   :  { %v3171_v39 = vpop.eup %1840  ;;  %1850 = vpow2.f32 %v757_v54  ;;  %v609_v61 = vsub.f32 %v4403_v20, %v2935_v15 }
 0x196   :  { %4401 = vst [vmem:[#allocation24_spill] sm:$0xff] %v3171_v39  ;;  %v3173_v22 = vpop.eup %1842  ;;  %995 = vadd.xlane.f32.xlu1 %v3171_v39  ;;  %v504_v30 = vpop.xlane.xlu1 %503 }
 0x197   :  { %4402 = vst [vmem:[#allocation83_spill] sm:$0xff] %v3173_v22  ;;  %v630_v24 = vsub.f32 %v2765_v41, %v504_v30  ;;  %951 = vadd.xlane.f32.xlu0 %v3173_v22  ;;  %v3180_v8 = vpop.xlane.xlu0 %881  ;;  %v3182_v35 = vpop.eup %1844  ;;  %v761_v39 = vmul.f32 1.442695, %v609_v61  ;;  %v4405_v41 = vld [vmem:[#allocation26_spill] sm:$0xff] }
 0x198   :  { %4404 = vst [vmem:[#allocation25_spill] sm:$0xff] %v3182_v35  ;;  %v610_v30 = vsub.f32 %v4405_v41, %v2946_v10 }
 0x199   :  { %v803_v36 = vmul.f32 1.442695, %v630_v24 }
 0x19a   :  { %v3184_v62 = vpop.xlane.xlu1 %505 }
 0x19b   :  { %1852 = vpow2.f32 %v803_v36  ;;  %953 = vadd.xlane.f32.xlu0 %v3182_v35  ;;  %v3189_v54 = vpop.xlane.xlu0 %883  ;;  %v763_v36 = vmul.f32 1.442695, %v610_v30 }
 0x19c   :  { %1854 = vpow2.f32 %v759_v25  ;;  %v4408_v25 = vld [vmem:[#allocation27_spill] sm:$0xff] }
 0x19d   :  { %v3191_v32 = vpop.eup %1846  ;;  %1856 = vpow2.f32 %v761_v39  ;;  %v611_v61 = vsub.f32 %v4408_v25, %v2958_v33 }
 0x19e   :  { %4406 = vst [vmem:[#allocation26_spill] sm:$0xff] %v3191_v32  ;;  %v3193_v15 = vpop.eup %1848  ;;  %999 = vadd.xlane.f32.xlu1 %v3191_v32  ;;  %v508_v24 = vpop.xlane.xlu1 %507 }
 0x19f   :  { %4407 = vst [vmem:[#allocation84_spill] sm:$0xff] %v3193_v15  ;;  %v632_v20 = vsub.f32 %v2788_v47, %v508_v24  ;;  %955 = vadd.xlane.f32.xlu0 %v3193_v15  ;;  %v3200_v35 = vpop.xlane.xlu0 %885  ;;  %v3202_v41 = vpop.eup %1850  ;;  %v765_v32 = vmul.f32 1.442695, %v611_v61  ;;  %v4410_v47 = vld [vmem:[#allocation28_spill] sm:$0xff] }
 0x1a0   :  { %4409 = vst [vmem:[#allocation27_spill] sm:$0xff] %v3202_v41  ;;  %v612_v24 = vsub.f32 %v4410_v47, %v2969_v31 }
 0x1a1   :  { %v807_v10 = vmul.f32 1.442695, %v632_v20 }
 0x1a2   :  { %v3204_v22 = vpop.xlane.xlu1 %509 }
 0x1a3   :  { %1858 = vpow2.f32 %v807_v10  ;;  %957 = vadd.xlane.f32.xlu0 %v3202_v41  ;;  %v3209_v39 = vpop.xlane.xlu0 %887  ;;  %v767_v10 = vmul.f32 1.442695, %v612_v24 }
 0x1a4   :  { %1860 = vpow2.f32 %v763_v36  ;;  %v4412_v36 = vld [vmem:[#allocation29_spill] sm:$0xff] }
 0x1a5   :  { %v3211_v30 = vpop.eup %1852  ;;  %1862 = vpow2.f32 %v765_v32  ;;  %v613_v61 = vsub.f32 %v4412_v36, %v2981_v26 }
 0x1a6   :  { %4411 = vst [vmem:[#allocation28_spill] sm:$0xff] %v3211_v30  ;;  %v3213_v33 = vpop.eup %1854  ;;  %1003 = vadd.xlane.f32.xlu1 %v3211_v30  ;;  %v512_v20 = vpop.xlane.xlu1 %511 }
 0x1a7   :  { %v634_v25 = vsub.f32 %v2811_v53, %v512_v20  ;;  %959 = vadd.xlane.f32.xlu0 %v3213_v33  ;;  %v3220_v41 = vpop.xlane.xlu0 %889  ;;  %v3222_v47 = vpop.eup %1856  ;;  %v769_v30 = vmul.f32 1.442695, %v613_v61  ;;  %v4414_v53 = vld [vmem:[#allocation30_spill] sm:$0xff] }
 0x1a8   :  { %4413 = vst [vmem:[#allocation29_spill] sm:$0xff] %v3222_v47  ;;  %v615_v20 = vsub.f32 %v4414_v53, %v3002_v42 }
 0x1a9   :  { %v811_v31 = vmul.f32 1.442695, %v634_v25 }
 0x1aa   :  { %v3224_v15 = vpop.xlane.xlu1 %513 }
 0x1ab   :  { %1864 = vpow2.f32 %v811_v31  ;;  %961 = vadd.xlane.f32.xlu0 %v3222_v47  ;;  %v3229_v32 = vpop.xlane.xlu0 %891  ;;  %v773_v31 = vmul.f32 1.442695, %v615_v20 }
 0x1ac   :  { %1866 = vpow2.f32 %v767_v10  ;;  %v617_v10 = vsub.f32 %v2628_v58, %v3023_v46 }
 0x1ad   :  { %v3231_v24 = vpop.eup %1858  ;;  %1868 = vpow2.f32 %v769_v30 }
 0x1ae   :  { %4415 = vst [vmem:[#allocation30_spill] sm:$0xff] %v3231_v24  ;;  %v3233_v26 = vpop.eup %1860  ;;  %1007 = vadd.xlane.f32.xlu1 %v3231_v24  ;;  %v516_v25 = vpop.xlane.xlu1 %515  ;;  %v777_v24 = vmul.f32 1.442695, %v617_v10 }
 0x1af   :  { %v636_v36 = vsub.f32 %v2834_v59, %v516_v25  ;;  %963 = vadd.xlane.f32.xlu0 %v3233_v26  ;;  %v3240_v61 = vpop.xlane.xlu0 %893  ;;  %v3242_v53 = vpop.eup %1862  ;;  %v619_v59 = vsub.f32 %v2642_v11, %v3046_v45 }
 0x1b1   :  { %v815_v42 = vmul.f32 1.442695, %v636_v36  ;;  %v781_v36 = vmul.f32 1.442695, %v619_v59 }
 0x1b2   :  { %v3244_v47 = vpop.xlane.xlu1 %517 }
 0x1b3   :  { %1870 = vpow2.f32 %v815_v42  ;;  %965 = vadd.xlane.f32.xlu0 %v3242_v53  ;;  %v3249_v30 = vpop.xlane.xlu0 %895 }
 0x1b4   :  { %1872 = vpow2.f32 %v773_v31  ;;  %v621_v31 = vsub.f32 %v2654_v23, %v3070_v38 }
 0x1b5   :  { %v3251_v20 = vpop.eup %1864  ;;  %1874 = vpow2.f32 %v777_v24 }
 0x1b6   :  { %4416 = vst [vmem:[#allocation85_spill] sm:$0xff] %v3251_v20  ;;  %v3253_v58 = vpop.eup %1866  ;;  %1011 = vadd.xlane.f32.xlu1 %v3251_v20  ;;  %v520_v46 = vpop.xlane.xlu1 %519  ;;  %v785_v20 = vmul.f32 1.442695, %v621_v31 }
 0x1b7   :  { %v638_v25 = vsub.f32 %v2857_v3, %v520_v46  ;;  %967 = vadd.xlane.f32.xlu0 %v3253_v58  ;;  %v3260_v10 = vpop.xlane.xlu0 %897  ;;  %v3262_v45 = vpop.eup %1868  ;;  %v623_v3 = vsub.f32 %v2687_v52, %v3101_v44 }
 0x1b9   :  { %v819_v11 = vmul.f32 1.442695, %v638_v25  ;;  %v789_v25 = vmul.f32 1.442695, %v623_v3 }
 0x1ba   :  { %v3264_v42 = vpop.xlane.xlu1 %521 }
 0x1bb   :  { %1876 = vpow2.f32 %v819_v11  ;;  %969 = vadd.xlane.f32.xlu0 %v3262_v45  ;;  %v3269_v24 = vpop.xlane.xlu0 %899 }
 0x1bc   :  { %1878 = vpow2.f32 %v781_v36  ;;  %v625_v36 = vsub.f32 %v2709_v57, %v3124_v4 }
 0x1bd   :  { %v3271_v59 = vpop.eup %1870  ;;  %1880 = vpow2.f32 %v785_v20 }
 0x1be   :  { %4417 = vst [vmem:[#allocation86_spill] sm:$0xff] %v3271_v59  ;;  %v3273_v23 = vpop.eup %1872  ;;  %1015 = vadd.xlane.f32.xlu1 %v3271_v59  ;;  %v524_v38 = vpop.xlane.xlu1 %523  ;;  %v793_v59 = vmul.f32 1.442695, %v625_v36 }
 0x1bf   :  { %v640_v46 = vsub.f32 %v2880_v9, %v524_v38  ;;  %973 = vadd.xlane.f32.xlu0 %v3273_v23  ;;  %v3280_v31 = vpop.xlane.xlu0 %901  ;;  %v3282_v44 = vpop.eup %1874  ;;  %v627_v9 = vsub.f32 %v2732_v5, %v3144_v51 }
 0x1c0   :  { %4418 = vst [vmem:[#allocation87_spill] sm:$0xff] %v3282_v44 }
 0x1c1   :  { %v823_v52 = vmul.f32 1.442695, %v640_v46  ;;  %v797_v46 = vmul.f32 1.442695, %v627_v9 }
 0x1c2   :  { %v3284_v11 = vpop.xlane.xlu1 %525 }
 0x1c3   :  { %1882 = vpow2.f32 %v823_v52  ;;  %977 = vadd.xlane.f32.xlu0 %v3282_v44  ;;  %v3289_v20 = vpop.xlane.xlu0 %903 }
 0x1c4   :  { %1884 = vpow2.f32 %v789_v25  ;;  %v4421_v25 = vld [vmem:[#allocation42_spill] sm:$0xff] }
 0x1c5   :  { %v3291_v3 = vpop.eup %1876  ;;  %1886 = vpow2.f32 %v793_v59  ;;  %v629_v36 = vsub.f32 %v4421_v25, %v3164_v43  ;;  %v4426_v25 = vld [vmem:[#allocation64_spill] sm:$0xff] }
 0x1c6   :  { %4419 = vst [vmem:[#allocation88_spill] sm:$0xff] %v3291_v3  ;;  %v3293_v57 = vpop.eup %1878  ;;  %1019 = vadd.xlane.f32.xlu1 %v3291_v3  ;;  %v528_v4 = vpop.xlane.xlu1 %527 }
 0x1c7   :  { %4420 = vst [vmem:[#allocation89_spill] sm:$0xff] %v3293_v57  ;;  %v642_v38 = vsub.f32 %v2905_v0, %v528_v4  ;;  %981 = vadd.xlane.f32.xlu0 %v3293_v57  ;;  %v3300_v52 = vpop.xlane.xlu0 %905  ;;  %v3302_v51 = vpop.eup %1880  ;;  %v801_v3 = vmul.f32 1.442695, %v629_v36  ;;  %v4423_v0 = vld [vmem:[#allocation45_spill] sm:$0xff] }
 0x1c8   :  { %4422 = vst [vmem:[#allocation42_spill] sm:$0xff] %v3302_v51  ;;  %v631_v4 = vsub.f32 %v4423_v0, %v3184_v62  ;;  %v4427_v62 = vld [vmem:[#allocation48_spill] sm:$0xff] }
 0x1c9   :  { %v827_v5 = vmul.f32 1.442695, %v642_v38  ;;  %v633_v36 = vsub.f32 %v4427_v62, %v3204_v22 }
 0x1ca   :  { %v3304_v44 = vpop.xlane.xlu1 %529 }
 0x1cb   :  { %1888 = vpow2.f32 %v827_v5  ;;  %985 = vadd.xlane.f32.xlu0 %v3302_v51  ;;  %v3309_v59 = vpop.xlane.xlu0 %907 }
 0x1cc   :  { %1890 = vpow2.f32 %v797_v46  ;;  %v805_v46 = vmul.f32 1.442695, %v631_v4 }
 0x1cd   :  { %v3311_v9 = vpop.eup %1882  ;;  %1892 = vrcp.f32 %v3079_v34 }
 0x1ce   :  { %4424 = vst [vmem:[#allocation45_spill] sm:$0xff] %v3311_v9  ;;  %v3313_v43 = vpop.eup %1884  ;;  %1023 = vadd.xlane.f32.xlu1 %v3311_v9  ;;  %v532_v38 = vpop.xlane.xlu1 %531  ;;  %1894 = vrcp.f32 %v3061_v55  ;;  %v809_v55 = vmul.f32 1.442695, %v633_v36 }
 0x1cf   :  { %4425 = vst [vmem:[#allocation90_spill] sm:$0xff] %v3313_v43  ;;  %v644_v5 = vsub.f32 %v4426_v25, %v532_v38  ;;  %989 = vadd.xlane.f32.xlu0 %v3313_v43  ;;  %1896 = vpow2.f32 %v801_v3  ;;  %v3322_v0 = vpop.xlane.xlu0 %909  ;;  %v3324_v57 = vpop.eup %1886  ;;  %v4429_v3 = vld [vmem:[#allocation51_spill] sm:$0xff] }
 0x1d0   :  { %4428 = vst [vmem:[#allocation64_spill] sm:$0xff] %v3324_v57  ;;  %1898 = vrcp.f32 %v3074_v63  ;;  %v635_v4 = vsub.f32 %v4429_v3, %v3224_v15  ;;  %v4432_v15 = vld [vmem:[#allocation54_spill] sm:$0xff] }
 0x1d1   :  { %v831_v51 = vmul.f32 1.442695, %v644_v5  ;;  %v637_v62 = vsub.f32 %v4432_v15, %v3244_v47  ;;  %v4435_v47 = vld [vmem:[#allocation57_spill] sm:$0xff] }
 0x1d2   :  { %v3327_v34 = vpop.xlane.xlu1 %533 }
 0x1d3   :  { %1900 = vpow2.f32 %v831_v51  ;;  %993 = vadd.xlane.f32.xlu0 %v3324_v57  ;;  %v3332_v38 = vpop.xlane.xlu0 %911 }
 0x1d4   :  { %1902 = vpow2.f32 %v805_v46  ;;  %v813_v46 = vmul.f32 1.442695, %v635_v4  ;;  %v817_v4 = vmul.f32 1.442695, %v637_v62 }
 0x1d5   :  { %v3334_v22 = vpop.eup %1888  ;;  %1904 = vrcp.f32 %v3086_v13  ;;  %v4433_v13 = vld [vmem:[#allocation33_spill] sm:$0xff] }
 0x1d6   :  { %4430 = vst [vmem:[#allocation48_spill] sm:$0xff] %v3334_v22  ;;  %v3336_v25 = vpop.eup %1890  ;;  %1027 = vadd.xlane.f32.xlu1 %v3334_v22  ;;  %v536_v5 = vpop.xlane.xlu1 %535  ;;  %1906 = vpow2.f32 %v809_v55 }
 0x1d7   :  { %4431 = vst [vmem:[#allocation51_spill] sm:$0xff] %v3336_v25  ;;  %v646_v63 = vsub.f32 %v2953_v37, %v536_v5  ;;  %997 = vadd.xlane.f32.xlu0 %v3336_v25  ;;  %v1893_v51 = vpop.eup %1892  ;;  %v3344_v36 = vpop.xlane.xlu0 %913  ;;  %1908 = vrcp.f32 %v3096_v50  ;;  %v639_v5 = vsub.f32 %v4435_v47, %v3264_v42  ;;  %v4437_v25 = vld [vmem:[#allocation31_spill] sm:$0xff]  ;;  %v4441_v47 = vld [vmem:[#allocation32_spill] sm:$0xff] }
 0x1d8   :  { %v1895_v3 = vpop.eup %1894  ;;  %v3352_v37 = vmul.f32 %v1893_v51, %v4433_v13  ;;  %v4439_v42 = vld [vmem:[#allocation71_spill] sm:$0xff] }
 0x1d9   :  { %v835_v9 = vmul.f32 1.442695, %v646_v63  ;;  %v3346_v57 = vpop.eup %1896  ;;  %v3362_v50 = vmul.f32 %v1895_v3, %v4437_v25  ;;  %v821_v62 = vmul.f32 1.442695, %v639_v5  ;;  %v4440_v25 = vld [vmem:[#allocation60_spill] sm:$0xff] }
 0x1da   :  { %v3349_v22 = vpop.xlane.xlu1 %537  ;;  %4434 = vst [vmem:[#allocation54_spill] sm:$0xff] %v3352_v37  ;;  %v1899_v55 = vpop.eup %1898  ;;  %v641_v3 = vsub.f32 %v4440_v25, %v3284_v11 }
 0x1db   :  { %1910 = vpow2.f32 %v835_v9  ;;  %1001 = vadd.xlane.f32.xlu0 %v3346_v57  ;;  %v3357_v15 = vpop.xlane.xlu0 %915  ;;  %4438 = vst [vmem:[#allocation57_spill] sm:$0xff] %v3362_v50  ;;  %v1257_v51 = vadd.f32 %v3362_v50, %v3352_v37 }
 0x1dc   :  { %1912 = vpow2.f32 %v813_v46  ;;  %v825_v5 = vmul.f32 1.442695, %v641_v3 }
 0x1dd   :  { %v3359_v63 = vpop.eup %1900  ;;  %1914 = vrcp.f32 %v3108_v60 }
 0x1de   :  { %4436 = vst [vmem:[#allocation33_spill] sm:$0xff] %v3359_v63  ;;  %v3364_v43 = vpop.eup %1902  ;;  %1031 = vadd.xlane.f32.xlu1 %v3359_v63  ;;  %v540_v9 = vpop.xlane.xlu1 %539  ;;  %1916 = vrcp.f32 %v3119_v17  ;;  %v3378_v63 = vmul.f32 %v1899_v55, %v4441_v47  ;;  %v4444_v55 = vld [vmem:[#allocation63_spill] sm:$0xff] }
 0x1df   :  { %v648_v46 = vsub.f32 %v4439_v42, %v540_v9  ;;  %1005 = vadd.xlane.f32.xlu0 %v3364_v43  ;;  %1918 = vpow2.f32 %v817_v4  ;;  %v3375_v13 = vpop.xlane.xlu0 %917  ;;  %v1905_v60 = vpop.eup %1904  ;;  %v643_v9 = vsub.f32 %v4444_v55, %v3304_v44  ;;  %v4451_v44 = vld [vmem:[#allocation75_spill] sm:$0xff] }
 0x1e0   :  { %4442 = vst [vmem:[#allocation31_spill] sm:$0xff] %v3378_v63  ;;  %1920 = vrcp.f32 %v3129_v16  ;;  %v3381_v37 = vpop.eup %1906  ;;  %v1258_v4 = vadd.f32 %v1257_v51, %v3378_v63 }
 0x1e1   :  { %v839_v50 = vmul.f32 1.442695, %v648_v46  ;;  %4443 = vst [vmem:[#allocation71_spill] sm:$0xff] %v3381_v37  ;;  %1922 = vrcp.f32 %v3140_v48  ;;  %v1909_v11 = vpop.eup %1908  ;;  %v4446_v46 = vld [vmem:[#allocation34_spill] sm:$0xff]  ;;  %v829_v55 = vmul.f32 1.442695, %v643_v9 }
 0x1e2   :  { %v3384_v17 = vpop.xlane.xlu1 %541  ;;  %v3395_v25 = vmul.f32 %v1905_v60, %v4446_v46  ;;  %v4452_v46 = vld [vmem:[#allocation67_spill] sm:$0xff]  ;;  %v4455_v9 = vld [vmem:[#allocation70_spill] sm:$0xff] }
 0x1e3   :  { %1924 = vpow2.f32 %v839_v50  ;;  %1009 = vadd.xlane.f32.xlu0 %v3381_v37  ;;  %v3390_v42 = vpop.xlane.xlu0 %919 }
 0x1e4   :  { %1926 = vpow2.f32 %v821_v62  ;;  %4447 = vst [vmem:[#allocation32_spill] sm:$0xff] %v3395_v25  ;;  %v1259_v51 = vadd.f32 %v1258_v4, %v3395_v25  ;;  %v4449_v62 = vld [vmem:[#allocation35_spill] sm:$0xff] }
 0x1e5   :  { %v3392_v16 = vpop.eup %1910  ;;  %1928 = vrcp.f32 %v3149_v29  ;;  %v3403_v3 = vmul.f32 %v1909_v11, %v4449_v62  ;;  %v645_v29 = vsub.f32 %v4452_v46, %v3327_v34  ;;  %v4453_v62 = vld [vmem:[#allocation36_spill] sm:$0xff] }
 0x1e6   :  { %4445 = vst [vmem:[#allocation60_spill] sm:$0xff] %v3392_v16  ;;  %v3397_v48 = vpop.eup %1912  ;;  %1035 = vadd.xlane.f32.xlu1 %v3392_v16  ;;  %v544_v50 = vpop.xlane.xlu1 %543  ;;  %1930 = vrcp.f32 %v3160_v2 }
 0x1e7   :  { %4448 = vst [vmem:[#allocation63_spill] sm:$0xff] %v3397_v48  ;;  %4450 = vst [vmem:[#allocation34_spill] sm:$0xff] %v3403_v3  ;;  %v650_v47 = vsub.f32 %v4451_v44, %v544_v50  ;;  %1013 = vadd.xlane.f32.xlu0 %v3397_v48  ;;  %v1915_v60 = vpop.eup %1914  ;;  %1932 = vpow2.f32 %v825_v5  ;;  %v3410_v63 = vpop.xlane.xlu0 %921  ;;  %v1260_v50 = vadd.f32 %v1259_v51, %v3403_v3  ;;  %v833_v34 = vmul.f32 1.442695, %v645_v29 }
 0x1e8   :  { %v1917_v16 = vpop.eup %1916  ;;  %1934 = vrcp.f32 %v3169_v56  ;;  %v3417_v44 = vmul.f32 %v1915_v60, %v4453_v62  ;;  %v4456_v56 = vld [vmem:[#allocation37_spill] sm:$0xff] }
 0x1e9   :  { %v843_v37 = vmul.f32 1.442695, %v650_v47  ;;  %v3412_v4 = vpop.eup %1918  ;;  %v647_v47 = vsub.f32 %v4455_v9, %v3349_v22  ;;  %v3427_v48 = vmul.f32 %v1917_v16, %v4456_v56 }
 0x1ea   :  { %v546_v11 = vpop.xlane.xlu1 %545  ;;  %v1921_v2 = vpop.eup %1920  ;;  %4454 = vst [vmem:[#allocation35_spill] sm:$0xff] %v3417_v44  ;;  %v1261_v60 = vadd.f32 %v1260_v50, %v3417_v44  ;;  %v4460_v44 = vld [vmem:[#allocation39_spill] sm:$0xff] }
 0x1eb   :  { %1936 = vpow2.f32 %v843_v37  ;;  %1017 = vadd.xlane.f32.xlu0 %v3412_v4  ;;  %v1923_v5 = vpop.eup %1922  ;;  %v3422_v46 = vpop.xlane.xlu0 %923  ;;  %4457 = vst [vmem:[#allocation75_spill] sm:$0xff] %v3427_v48  ;;  %v837_v62 = vmul.f32 1.442695, %v647_v47 }
 0x1ec   :  { %1938 = vpow2.f32 %v829_v55  ;;  %v4458_v55 = vld [vmem:[#allocation38_spill] sm:$0xff]  ;;  %v1262_v50 = vadd.f32 %v1261_v60, %v3427_v48 }
 0x1ed   :  { %v3424_v25 = vpop.eup %1924  ;;  %1940 = vrcp.f32 %v3180_v8  ;;  %v3435_v29 = vmul.f32 %v1921_v2, %v4458_v55  ;;  %v4459_v8 = vld [vmem:[#allocation74_spill] sm:$0xff]  ;;  %v3446_v2 = vmul.f32 %v1923_v5, %v4460_v44 }
 0x1ee   :  { %v3430_v51 = vpop.eup %1926  ;;  %1039 = vadd.xlane.f32.xlu1 %v3424_v25  ;;  %v548_v37 = vpop.xlane.xlu1 %547  ;;  %1942 = vrcp.f32 %v3189_v54  ;;  %v649_v9 = vsub.f32 %v4459_v8, %v3384_v17  ;;  %v4462_v5 = vld [vmem:[#allocation78_spill] sm:$0xff]  ;;  %v4463_v8 = vld [vmem:[#allocation41_spill] sm:$0xff] }
 0x1ef   :  { %v652_v22 = vsub.f32 %v3018_v27, %v548_v37  ;;  %1021 = vadd.xlane.f32.xlu0 %v3430_v51  ;;  %v1929_v16 = vpop.eup %1928  ;;  %1944 = vpow2.f32 %v833_v34  ;;  %v3442_v56 = vpop.xlane.xlu0 %925  ;;  %v1263_v47 = vadd.f32 %v1262_v50, %v3435_v29  ;;  %v4461_v37 = vld [vmem:[#allocation40_spill] sm:$0xff]  ;;  %v651_v55 = vsub.f32 %v4462_v5, %v546_v11  ;;  %v4464_v11 = vld [vmem:[#allocation43_spill] sm:$0xff] }
 0x1f0   :  { %v1931_v3 = vpop.eup %1930  ;;  %1946 = vrcp.f32 %v3200_v35  ;;  %v3454_v17 = vmul.f32 %v1929_v16, %v4461_v37  ;;  %v841_v44 = vmul.f32 1.442695, %v649_v9 }
 0x1f1   :  { %v847_v54 = vmul.f32 1.442695, %v652_v22  ;;  %v3449_v27 = vpop.eup %1932  ;;  %1948 = vrcp.f32 %v3209_v39  ;;  %v1264_v39 = vadd.f32 %v1263_v47, %v3446_v2  ;;  %v3464_v48 = vmul.f32 %v1931_v3, %v4463_v8 }
 0x1f2   :  { %v550_v34 = vpop.xlane.xlu1 %549  ;;  %v1935_v60 = vpop.eup %1934  ;;  %v845_v3 = vmul.f32 1.442695, %v651_v55 }
 0x1f3   :  { %1950 = vpow2.f32 %v847_v54  ;;  %1025 = vadd.xlane.f32.xlu0 %v3449_v27  ;;  %v3458_v35 = vpop.xlane.xlu0 %927  ;;  %v1265_v9 = vadd.f32 %v1264_v39, %v3454_v17  ;;  %v3472_v54 = vmul.f32 %v1935_v60, %v4464_v11  ;;  %v4465_v11 = vld [vmem:[#allocation44_spill] sm:$0xff] }
 0x1f4   :  { %1952 = vpow2.f32 %v837_v62 }
 0x1f5   :  { %v3460_v22 = vpop.eup %1936  ;;  %1954 = vrcp.f32 %v3220_v41  ;;  %v653_v41 = vsub.f32 %v3031_v7, %v550_v34  ;;  %v1266_v8 = vadd.f32 %v1265_v9, %v3464_v48  ;;  %v4467_v34 = vld [vmem:[#allocation46_spill] sm:$0xff] }
 0x1f6   :  { %v3467_v16 = vpop.eup %1938  ;;  %1043 = vadd.xlane.f32.xlu1 %v3460_v22  ;;  %v552_v50 = vpop.xlane.xlu1 %551  ;;  %1956 = vrcp.f32 %v3229_v32 }
 0x1f7   :  { %v1941_v62 = vpop.eup %1940  ;;  %v654_v47 = vsub.f32 %v3040_v40, %v552_v50  ;;  %1029 = vadd.xlane.f32.xlu0 %v3467_v16  ;;  %1958 = vpow2.f32 %v841_v44  ;;  %v3478_v37 = vpop.xlane.xlu0 %929  ;;  %v1267_v55 = vadd.f32 %v1266_v8, %v3472_v54 }
 0x1f8   :  { %v1943_v5 = vpop.eup %1942  ;;  %1960 = vrcp.f32 %v3240_v61  ;;  %v3485_v32 = vmul.f32 %v1941_v62, %v4465_v11  ;;  %v849_v61 = vmul.f32 1.442695, %v653_v41 }
 0x1f9   :  { %v851_v39 = vmul.f32 1.442695, %v654_v47  ;;  %v3482_v60 = vpop.eup %1944  ;;  %1962 = vrcp.f32 %v3249_v30  ;;  %v3491_v50 = vmul.f32 %v1943_v5, %v4467_v34 }
 0x1fa   :  { %4466 = vst [vmem:[#allocation67_spill] sm:$0xff] %v3485_v32  ;;  %v554_v40 = vpop.xlane.xlu1 %553  ;;  %v1947_v44 = vpop.eup %1946  ;;  %v1268_v8 = vadd.f32 %v1267_v55, %v3485_v32 }
 0x1fb   :  { %1964 = vpow2.f32 %v851_v39  ;;  %1033 = vadd.xlane.f32.xlu0 %v3482_v60  ;;  %v1949_v7 = vpop.eup %1948  ;;  %4468 = vst [vmem:[#allocation36_spill] sm:$0xff] %v3491_v50  ;;  %v655_v9 = vsub.f32 %v3052_v21, %v554_v40  ;;  %v3494_v47 = vpop.xlane.xlu0 %931  ;;  %v4469_v39 = vld [vmem:[#allocation47_spill] sm:$0xff] }
 0x1fc   :  { %1966 = vpow2.f32 %v845_v3  ;;  %v3503_v11 = vmul.f32 %v1947_v44, %v4469_v39  ;;  %v1269_v41 = vadd.f32 %v1268_v8, %v3491_v50 }
 0x1fd   :  { %v3496_v62 = vpop.eup %1950  ;;  %1968 = vrcp.f32 %v3260_v10  ;;  %v4471_v10 = vld [vmem:[#allocation49_spill] sm:$0xff]  ;;  %v853_v55 = vmul.f32 1.442695, %v655_v9  ;;  %v4475_v9 = vld [vmem:[#allocation52_spill] sm:$0xff] }
 0x1fe   :  { %v3499_v30 = vpop.eup %1952  ;;  %4470 = vst [vmem:[#allocation70_spill] sm:$0xff] %v3503_v11  ;;  %1047 = vadd.xlane.f32.xlu1 %v3496_v62  ;;  %v556_v5 = vpop.xlane.xlu1 %555  ;;  %1970 = vrcp.f32 %v3269_v24  ;;  %v3511_v40 = vmul.f32 %v1949_v7, %v4471_v10  ;;  %v1270_v24 = vadd.f32 %v1269_v41, %v3503_v11  ;;  %v4477_v41 = vld [vmem:[#allocation53_spill] sm:$0xff] }
 0x1ff   :  { %v1955_v3 = vpop.eup %1954  ;;  %v656_v21 = vsub.f32 %v3065_v14, %v556_v5  ;;  %1037 = vadd.xlane.f32.xlu0 %v3499_v30  ;;  %1972 = vpow2.f32 %v849_v61  ;;  %v3513_v34 = vpop.xlane.xlu0 %933  ;;  %v4473_v14 = vld [vmem:[#allocation50_spill] sm:$0xff]  ;;  %v4489_v11 = vld [vmem:[#allocation65_spill] sm:$0xff] }
 0x200   :  { %4472 = vst [vmem:[#allocation37_spill] sm:$0xff] %v3511_v40  ;;  %v1957_v44 = vpop.eup %1956  ;;  %1974 = vrcp.f32 %v3280_v31  ;;  %v3520_v5 = vmul.f32 %v1955_v3, %v4473_v14  ;;  %v1271_v61 = vadd.f32 %v1270_v24, %v3511_v40 }
 0x201   :  { %v855_v39 = vmul.f32 1.442695, %v656_v21  ;;  %v3516_v32 = vpop.eup %1958  ;;  %1976 = vrcp.f32 %v3289_v20  ;;  %v3526_v10 = vmul.f32 %v1957_v44, %v4475_v9  ;;  %v4479_v44 = vld [vmem:[#allocation55_spill] sm:$0xff] }
 0x202   :  { %4474 = vst [vmem:[#allocation38_spill] sm:$0xff] %v3520_v5  ;;  %v1961_v8 = vpop.eup %1960  ;;  %v1272_v20 = vadd.f32 %v1271_v61, %v3520_v5 }
 0x203   :  { %1978 = vpow2.f32 %v855_v39  ;;  %1041 = vadd.xlane.f32.xlu0 %v3516_v32  ;;  %v1963_v7 = vpop.eup %1962  ;;  %4476 = vst [vmem:[#allocation74_spill] sm:$0xff] %v3526_v10  ;;  %v3528_v31 = vpop.xlane.xlu0 %935  ;;  %v3537_v39 = vmul.f32 %v1961_v8, %v4477_v41  ;;  %v4481_v41 = vld [vmem:[#allocation56_spill] sm:$0xff] }
 0x204   :  { %1980 = vpow2.f32 %v853_v55  ;;  %v1273_v55 = vadd.f32 %v1272_v20, %v3526_v10  ;;  %v3544_v14 = vmul.f32 %v1963_v7, %v4479_v44  ;;  %v4483_v44 = vld [vmem:[#allocation58_spill] sm:$0xff] }
 0x205   :  { %v3530_v21 = vpop.eup %1964  ;;  %1982 = vrcp.f32 %v3300_v52  ;;  %4478 = vst [vmem:[#allocation39_spill] sm:$0xff] %v3537_v39 }
 0x206   :  { %v3533_v3 = vpop.eup %1966  ;;  %1051 = vadd.xlane.f32.xlu1 %v3530_v21  ;;  %1984 = vrcp.f32 %v3309_v59  ;;  %4480 = vst [vmem:[#allocation40_spill] sm:$0xff] %v3544_v14  ;;  %v1274_v8 = vadd.f32 %v1273_v55, %v3537_v39 }
 0x207   :  { %v1969_v24 = vpop.eup %1968  ;;  %1045 = vadd.xlane.f32.xlu0 %v3533_v3  ;;  %v3546_v52 = vpop.xlane.xlu0 %937  ;;  %1986 = vrcp.f32 %v3322_v0 }
 0x208   :  { %v1971_v9 = vpop.eup %1970  ;;  %v3553_v5 = vmul.f32 %v1969_v24, %v4481_v41  ;;  %1988 = vrcp.f32 %v3332_v38  ;;  %v1275_v7 = vadd.f32 %v1274_v8, %v3544_v14  ;;  %v4485_v41 = vld [vmem:[#allocation59_spill] sm:$0xff]  ;;  %v4486_v8 = vld [vmem:[#allocation61_spill] sm:$0xff] }
 0x209   :  { %v3549_v61 = vpop.eup %1972  ;;  %v3559_v10 = vmul.f32 %v1971_v9, %v4483_v44  ;;  %1990 = vrcp.f32 %v3344_v36 }
 0x20a   :  { %4482 = vst [vmem:[#allocation78_spill] sm:$0xff] %v3553_v5  ;;  %v1975_v59 = vpop.eup %1974  ;;  %v1276_v24 = vadd.f32 %v1275_v7, %v3553_v5  ;;  %1992 = vrcp.f32 %v3357_v15 }
 0x20b   :  { %1049 = vadd.xlane.f32.xlu0 %v3549_v61  ;;  %v1977_v20 = vpop.eup %1976  ;;  %4484 = vst [vmem:[#allocation41_spill] sm:$0xff] %v3559_v10  ;;  %v940_v40 = vpop.xlane.xlu0 %939  ;;  %v3568_v39 = vmul.f32 %v1975_v59, %v4485_v41  ;;  %1994 = vrcp.f32 %v3375_v13  ;;  %v4488_v59 = vld [vmem:[#allocation62_spill] sm:$0xff] }
 0x20c   :  { %v1277_v9 = vadd.f32 %v1276_v24, %v3559_v10  ;;  %v3575_v44 = vmul.f32 %v1977_v20, %v4486_v8  ;;  %1996 = vrcp.f32 %v3390_v42  ;;  %v4491_v13 = vld [vmem:[#allocation66_spill] sm:$0xff]  ;;  %v4492_v42 = vld [vmem:[#allocation68_spill] sm:$0xff] }
 0x20d   :  { %v3561_v0 = vpop.eup %1978  ;;  %1998 = vrcp.f32 %v3410_v63  ;;  %v4494_v63 = vld [vmem:[#allocation69_spill] sm:$0xff] }
 0x20e   :  { %v3564_v55 = vpop.eup %1980  ;;  %1055 = vadd.xlane.f32.xlu1 %v3561_v0  ;;  %4487 = vst [vmem:[#allocation43_spill] sm:$0xff] %v3575_v44  ;;  %v1278_v7 = vadd.f32 %v1277_v9, %v3568_v39  ;;  %2000 = vrcp.f32 %v3422_v46  ;;  %v4495_v46 = vld [vmem:[#allocation72_spill] sm:$0xff] }
 0x20f   :  { %v1983_v38 = vpop.eup %1982  ;;  %1053 = vadd.xlane.f32.xlu0 %v3564_v55  ;;  %v942_v36 = vpop.xlane.xlu0 %941  ;;  %2002 = vrcp.f32 %v3442_v56  ;;  %v4496_v56 = vld [vmem:[#allocation73_spill] sm:$0xff] }
 0x210   :  { %v1985_v14 = vpop.eup %1984  ;;  %v3580_v41 = vmul.f32 %v1983_v38, %v4488_v59  ;;  %v1279_v15 = vadd.f32 %v1278_v7, %v3575_v44  ;;  %2004 = vrcp.f32 %v3458_v35  ;;  %v4497_v35 = vld [vmem:[#allocation76_spill] sm:$0xff] }
 0x211   :  { %v1987_v5 = vpop.eup %1986  ;;  %v3585_v50 = vmul.f32 %v1985_v14, %v4489_v11  ;;  %2006 = vrcp.f32 %v3478_v37  ;;  %v4498_v37 = vld [vmem:[#allocation77_spill] sm:$0xff] }
 0x212   :  { %v1989_v20 = vpop.eup %1988  ;;  %v1280_v8 = vadd.f32 %v1279_v15, %v3580_v41  ;;  %v3590_v10 = vmul.f32 %v1987_v5, %v4491_v13  ;;  %2008 = vrcp.f32 %v3494_v47 }
 0x213   :  { %4490 = vst [vmem:[#allocation44_spill] sm:$0xff] %v3585_v50  ;;  %v1991_v9 = vpop.eup %1990  ;;  %v3595_v59 = vmul.f32 %v1989_v20, %v4492_v42  ;;  %2010 = vrcp.f32 %v3513_v34  ;;  %v4499_v34 = vld [vmem:[#allocation79_spill] sm:$0xff] }
 0x214   :  { %v944_v24 = vpop.xlane.xlu0 %943  ;;  %v1281_v38 = vadd.f32 %v1280_v8, %v3585_v50  ;;  %v1993_v11 = vpop.eup %1992  ;;  %v3600_v44 = vmul.f32 %v1991_v9, %v4494_v63  ;;  %2012 = vrcp.f32 %v3528_v31 }
 0x215   :  { %4493 = vst [vmem:[#allocation46_spill] sm:$0xff] %v3595_v59  ;;  %v1995_v15 = vpop.eup %1994  ;;  %v3605_v13 = vmul.f32 %v1993_v11, %v4495_v46  ;;  %2014 = vrcp.f32 %v3546_v52 }
 0x216   :  { %v1282_v14 = vadd.f32 %v1281_v38, %v3590_v10  ;;  %v1997_v20 = vpop.eup %1996  ;;  %v3610_v50 = vmul.f32 %v1995_v15, %v4496_v56  ;;  %2016 = vrcp.f32 %v940_v40 }
 0x217   :  { %v1999_v38 = vpop.eup %1998  ;;  %v3615_v63 = vmul.f32 %v1997_v20, %v4497_v35  ;;  %2018 = vrcp.f32 %v942_v36 }
 0x218   :  { %v946_v7 = vpop.xlane.xlu0 %945  ;;  %v1283_v5 = vadd.f32 %v1282_v14, %v3595_v59  ;;  %v2001_v11 = vpop.eup %2000  ;;  %v3620_v59 = vmul.f32 %v1999_v38, %v4498_v37  ;;  %2020 = vrcp.f32 %v944_v24 }
 0x219   :  { %v3625_v47 = vmul.f32 %v2001_v11, %v3021_v12  ;;  %2022 = vrcp.f32 %v946_v7 }
 0x21a   :  { %v1284_v42 = vadd.f32 %v1283_v5, %v3600_v44  ;;  %v2003_v5 = vpop.eup %2002 }
 0x21b   :  { %v2005_v20 = vpop.eup %2004  ;;  %v3630_v35 = vmul.f32 %v2003_v5, %v4499_v34 }
 0x21c   :  { %v948_v8 = vpop.xlane.xlu0 %947  ;;  %v1285_v9 = vadd.f32 %v1284_v42, %v3605_v13  ;;  %v3634_v31 = vmul.f32 %v2005_v20, %v3043_v6 }
 0x21d   :  { %2024 = vrcp.f32 %v948_v8 }
 0x21e   :  { %v1286_v46 = vadd.f32 %v1285_v9, %v3610_v50  ;;  %v2007_v9 = vpop.eup %2006 }
 0x21f   :  { %v2009_v37 = vpop.eup %2008  ;;  %v3638_v11 = vmul.f32 %v2007_v9, %v3055_v49 }
 0x220   :  { %v950_v14 = vpop.xlane.xlu0 %949  ;;  %v1287_v15 = vadd.f32 %v1286_v46, %v3615_v63  ;;  %v2011_v52 = vpop.eup %2010 }
 0x221   :  { %v3646_v20 = vmul.f32 %v2011_v52, %v3077_v19  ;;  %2026 = vrcp.f32 %v950_v14 }
 0x222   :  { %v1288_v56 = vadd.f32 %v1287_v15, %v3620_v59  ;;  %v3642_v15 = vmul.f32 %v2009_v37, %v3067_v1  ;;  %v4500_v37 = vld [vmem:[#allocation17_spill] sm:$0xff] }
 0x224   :  { %v952_v42 = vpop.xlane.xlu0 %951  ;;  %v1289_v38 = vadd.f32 %v1288_v56, %v3625_v47  ;;  %v2013_v56 = vpop.eup %2012 }
 0x225   :  { %v2015_v36 = vpop.eup %2014  ;;  %v3650_v34 = vmul.f32 %v2013_v56, %v3089_v28  ;;  %2028 = vrcp.f32 %v952_v42 }
 0x226   :  { %v1290_v12 = vadd.f32 %v1289_v38, %v3630_v35  ;;  %v2017_v9 = vpop.eup %2016  ;;  %v3654_v38 = vmul.f32 %v2015_v36, %v3099_v18 }
 0x227   :  { %v2019_v7 = vpop.eup %2018 }
 0x228   :  { %v954_v46 = vpop.xlane.xlu0 %953  ;;  %v1291_v5 = vadd.f32 %v1290_v12, %v3634_v31  ;;  %v3658_v12 = vmul.f32 %v2017_v9, %v4500_v37  ;;  %v2021_v52 = vpop.eup %2020 }
 0x229   :  { %2030 = vrcp.f32 %v954_v46  ;;  %v2023_v14 = vpop.eup %2022 }
 0x22a   :  { %v1292_v6 = vadd.f32 %v1291_v5, %v3638_v11  ;;  %4501 = vst [vmem:[#allocation47_spill] sm:$0xff] %v3658_v12  ;;  %v4502_v5 = vld [vmem:[#allocation19_spill] sm:$0xff] }
 0x22b   :  { %v3662_v56 = vmul.f32 %v2019_v7, %v4502_v5 }
 0x22c   :  { %v956_v40 = vpop.xlane.xlu0 %955  ;;  %v1293_v49 = vadd.f32 %v1292_v6, %v3642_v15  ;;  %v4504_v6 = vld [vmem:[#allocation81_spill] sm:$0xff] }
 0x22d   :  { %4503 = vst [vmem:[#allocation49_spill] sm:$0xff] %v3662_v56  ;;  %2032 = vrcp.f32 %v956_v40  ;;  %v3666_v36 = vmul.f32 %v2021_v52, %v4504_v6  ;;  %v4510_v6 = vld [vmem:[#allocation23_spill] sm:$0xff] }
 0x22e   :  { %v1294_v1 = vadd.f32 %v1293_v49, %v3646_v20  ;;  %v2025_v49 = vpop.eup %2024 }
 0x22f   :  { %4505 = vst [vmem:[#allocation50_spill] sm:$0xff] %v3666_v36  ;;  %v2027_v46 = vpop.eup %2026 }
 0x230   :  { %v958_v24 = vpop.xlane.xlu0 %957  ;;  %v1295_v19 = vadd.f32 %v1294_v1, %v3650_v34  ;;  %v4506_v1 = vld [vmem:[#allocation21_spill] sm:$0xff] }
 0x231   :  { %2034 = vrcp.f32 %v958_v24  ;;  %v3670_v37 = vmul.f32 %v2023_v14, %v4506_v1  ;;  %v3678_v24 = vmul.f32 %v2027_v46, %v4510_v6  ;;  %v4511_v1 = vld [vmem:[#allocation83_spill] sm:$0xff]  ;;  %v4514_v6 = vld [vmem:[#allocation84_spill] sm:$0xff] }
 0x232   :  { %v1296_v28 = vadd.f32 %v1295_v19, %v3654_v38  ;;  %v4508_v19 = vld [vmem:[#allocation82_spill] sm:$0xff] }
 0x233   :  { %4507 = vst [vmem:[#allocation52_spill] sm:$0xff] %v3670_v37  ;;  %v3674_v5 = vmul.f32 %v2025_v49, %v4508_v19  ;;  %v4513_v19 = vld [vmem:[#allocation25_spill] sm:$0xff] }
 0x234   :  { %v960_v8 = vpop.xlane.xlu0 %959  ;;  %v1297_v18 = vadd.f32 %v1296_v28, %v3658_v12  ;;  %v2029_v28 = vpop.eup %2028 }
 0x235   :  { %2036 = vrcp.f32 %v960_v8  ;;  %4509 = vst [vmem:[#allocation53_spill] sm:$0xff] %v3674_v5  ;;  %v972_v12 = vpop.xlane.xlu1 %971  ;;  %v3682_v8 = vmul.f32 %v2029_v28, %v4511_v1  ;;  %v4515_v1 = vld [vmem:[#allocation27_spill] sm:$0xff] }
 0x236   :  { %v1298_v9 = vadd.f32 %v1297_v18, %v3662_v56  ;;  %v2031_v18 = vpop.eup %2030 }
 0x237   :  { %4512 = vst [vmem:[#allocation55_spill] sm:$0xff] %v3682_v8  ;;  %v3686_v56 = vmul.f32 %v2031_v18, %v4513_v19 }
 0x238   :  { %v962_v42 = vpop.xlane.xlu0 %961  ;;  %v1299_v7 = vadd.f32 %v1298_v9, %v3666_v36  ;;  %v2033_v36 = vpop.eup %2032 }
 0x239   :  { %2038 = vrcp.f32 %v962_v42 }
 0x23a   :  { %v1300_v52 = vadd.f32 %v1299_v7, %v3670_v37  ;;  %v976_v7 = vpop.xlane.xlu1 %975  ;;  %v3690_v37 = vmul.f32 %v2033_v36, %v4514_v6  ;;  %v4518_v6 = vld [vmem:[#allocation29_spill] sm:$0xff] }
 0x23b   :  { %v2035_v42 = vpop.eup %2034 }
 0x23c   :  { %v964_v40 = vpop.xlane.xlu0 %963  ;;  %v1301_v14 = vadd.f32 %v1300_v52, %v3674_v5  ;;  %v3694_v5 = vmul.f32 %v2035_v42, %v4515_v1 }
 0x23d   :  { %2040 = vrcp.f32 %v964_v40 }
 0x23e   :  { %v1302_v49 = vadd.f32 %v1301_v14, %v3678_v24  ;;  %4516 = vst [vmem:[#allocation56_spill] sm:$0xff] %v3694_v5 }
 0x23f   :  { %v2037_v52 = vpop.eup %2036 }
 0x240   :  { %v966_v9 = vpop.xlane.xlu0 %965  ;;  %v1303_v46 = vadd.f32 %v1302_v49, %v3682_v8  ;;  %v3698_v14 = vmul.f32 %v2037_v52, %v3213_v33  ;;  %v980_v8 = vpop.xlane.xlu1 %979 }
 0x241   :  { %2042 = vrcp.f32 %v966_v9 }
 0x242   :  { %v1304_v28 = vadd.f32 %v1303_v46, %v3686_v56  ;;  %4517 = vst [vmem:[#allocation58_spill] sm:$0xff] %v3698_v14 }
 0x243   :  { %v2039_v9 = vpop.eup %2038 }
 0x244   :  { %v968_v40 = vpop.xlane.xlu0 %967  ;;  %v1305_v18 = vadd.f32 %v1304_v28, %v3690_v37 }
 0x245   :  { %2044 = vrcp.f32 %v968_v40  ;;  %v3702_v40 = vmul.f32 %v2039_v9, %v4518_v6 }
 0x246   :  { %2046 = vrcp.f32 %v972_v12  ;;  %v1306_v36 = vadd.f32 %v1305_v18, %v3694_v5 }
 0x247   :  { %v2041_v49 = vpop.eup %2040  ;;  %4519 = vst [vmem:[#allocation59_spill] sm:$0xff] %v3702_v40 }
 0x248   :  { %v970_v19 = vpop.xlane.xlu0 %969  ;;  %v1307_v42 = vadd.f32 %v1306_v36, %v3698_v14  ;;  %v3706_v12 = vmul.f32 %v2041_v49, %v3233_v26 }
 0x249   :  { %2048 = vrcp.f32 %v970_v19  ;;  %v984_v19 = vpop.xlane.xlu1 %983 }
 0x24a   :  { %2050 = vrcp.f32 %v976_v7  ;;  %4520 = vst [vmem:[#allocation61_spill] sm:$0xff] %v3706_v12  ;;  %v1308_v33 = vadd.f32 %v1307_v42, %v3702_v40 }
 0x24b   :  { %v2043_v46 = vpop.eup %2042 }
 0x24c   :  { %v974_v28 = vpop.xlane.xlu0 %973  ;;  %v3710_v52 = vmul.f32 %v2043_v46, %v3242_v53  ;;  %v1309_v9 = vadd.f32 %v1308_v33, %v3706_v12 }
 0x24d   :  { %2052 = vrcp.f32 %v974_v28  ;;  %v988_v42 = vpop.xlane.xlu1 %987  ;;  %v4524_v28 = vld [vmem:[#allocation16_spill] sm:$0xff] }
 0x24e   :  { %4521 = vst [vmem:[#allocation62_spill] sm:$0xff] %v3710_v52  ;;  %2054 = vrcp.f32 %v980_v8  ;;  %v1310_v26 = vadd.f32 %v1309_v9, %v3710_v52  ;;  %v4570_v52 = vld [vmem:[#allocation60_spill] sm:$0xff] }
 0x24f   :  { %v2045_v1 = vpop.eup %2044 }
 0x250   :  { %v3714_v18 = vmul.f32 %v2045_v1, %v3253_v58  ;;  %v978_v7 = vpop.xlane.xlu0 %977  ;;  %v2047_v36 = vpop.eup %2046 }
 0x251   :  { %2056 = vrcp.f32 %v978_v7  ;;  %v3722_v33 = vmul.f32 %v2047_v36, %v4524_v28  ;;  %v4529_v28 = vld [vmem:[#allocation87_spill] sm:$0xff] }
 0x252   :  { %4522 = vst [vmem:[#allocation65_spill] sm:$0xff] %v3714_v18  ;;  %2058 = vrcp.f32 %v984_v19  ;;  %v1311_v6 = vadd.f32 %v1310_v26, %v3714_v18  ;;  %v992_v26 = vpop.xlane.xlu1 %991 }
 0x253   :  { %v2049_v49 = vpop.eup %2048  ;;  %4525 = vst [vmem:[#allocation68_spill] sm:$0xff] %v3722_v33 }
 0x254   :  { %v3719_v53 = vmul.f32 %v2049_v49, %v3262_v45  ;;  %v982_v46 = vpop.xlane.xlu0 %981  ;;  %v2051_v8 = vpop.eup %2050  ;;  %v4527_v49 = vld [vmem:[#allocation15_spill] sm:$0xff] }
 0x255   :  { %2060 = vrcp.f32 %v982_v46  ;;  %v3730_v18 = vmul.f32 %v2051_v8, %v4527_v49  ;;  %v4533_v49 = vld [vmem:[#allocation89_spill] sm:$0xff] }
 0x256   :  { %4523 = vst [vmem:[#allocation66_spill] sm:$0xff] %v3719_v53  ;;  %v1312_v58 = vadd.f32 %v1311_v6, %v3719_v53  ;;  %2062 = vrcp.f32 %v988_v42 }
 0x257   :  { %v2053_v1 = vpop.eup %2052  ;;  %4528 = vst [vmem:[#allocation72_spill] sm:$0xff] %v3730_v18 }
 0x258   :  { %v1313_v9 = vadd.f32 %v1312_v58, %v3722_v33  ;;  %v3727_v19 = vmul.f32 %v2053_v1, %v3273_v23  ;;  %v986_v7 = vpop.xlane.xlu0 %985  ;;  %v2055_v45 = vpop.eup %2054  ;;  %v4531_v1 = vld [vmem:[#allocation18_spill] sm:$0xff] }
 0x259   :  { %2064 = vrcp.f32 %v986_v7  ;;  %v996_v33 = vpop.xlane.xlu1 %995  ;;  %v3738_v53 = vmul.f32 %v2055_v45, %v4531_v1  ;;  %v4537_v1 = vld [vmem:[#allocation42_spill] sm:$0xff] }
 0x25a   :  { %4526 = vst [vmem:[#allocation69_spill] sm:$0xff] %v3727_v19  ;;  %v1314_v46 = vadd.f32 %v1313_v9, %v3727_v19  ;;  %2066 = vrcp.f32 %v992_v26 }
 0x25b   :  { %v2057_v36 = vpop.eup %2056  ;;  %4532 = vst [vmem:[#allocation76_spill] sm:$0xff] %v3738_v53 }
 0x25c   :  { %v1315_v6 = vadd.f32 %v1314_v46, %v3730_v18  ;;  %v3735_v42 = vmul.f32 %v2057_v36, %v4529_v28  ;;  %v990_v58 = vpop.xlane.xlu0 %989  ;;  %v2059_v23 = vpop.eup %2058  ;;  %v4535_v28 = vld [vmem:[#allocation80_spill] sm:$0xff] }
 0x25d   :  { %2068 = vrcp.f32 %v990_v58  ;;  %v1000_v18 = vpop.xlane.xlu1 %999  ;;  %v3746_v19 = vmul.f32 %v2059_v23, %v4535_v28  ;;  %v4541_v28 = vld [vmem:[#allocation90_spill] sm:$0xff] }
 0x25e   :  { %4530 = vst [vmem:[#allocation73_spill] sm:$0xff] %v3735_v42  ;;  %v1316_v7 = vadd.f32 %v1315_v6, %v3735_v42  ;;  %2070 = vrcp.f32 %v996_v33 }
 0x25f   :  { %v2061_v8 = vpop.eup %2060  ;;  %4536 = vst [vmem:[#allocation79_spill] sm:$0xff] %v3746_v19 }
 0x260   :  { %v1317_v9 = vadd.f32 %v1316_v7, %v3738_v53  ;;  %v3743_v26 = vmul.f32 %v2061_v8, %v4533_v49  ;;  %v994_v46 = vpop.xlane.xlu0 %993  ;;  %v2063_v36 = vpop.eup %2062  ;;  %v4539_v49 = vld [vmem:[#allocation20_spill] sm:$0xff] }
 0x261   :  { %2072 = vrcp.f32 %v994_v46  ;;  %v1004_v53 = vpop.xlane.xlu1 %1003  ;;  %v3754_v42 = vmul.f32 %v2063_v36, %v4539_v49  ;;  %v4545_v49 = vld [vmem:[#allocation64_spill] sm:$0xff] }
 0x262   :  { %4534 = vst [vmem:[#allocation77_spill] sm:$0xff] %v3743_v26  ;;  %v1318_v58 = vadd.f32 %v1317_v9, %v3743_v26  ;;  %2074 = vrcp.f32 %v1000_v18 }
 0x263   :  { %v2065_v45 = vpop.eup %2064  ;;  %4540 = vst [vmem:[#allocation19_spill] sm:$0xff] %v3754_v42 }
 0x264   :  { %v1319_v6 = vadd.f32 %v1318_v58, %v3746_v19  ;;  %v3751_v33 = vmul.f32 %v2065_v45, %v4537_v1  ;;  %v998_v7 = vpop.xlane.xlu0 %997  ;;  %v2067_v8 = vpop.eup %2066  ;;  %v4543_v1 = vld [vmem:[#allocation22_spill] sm:$0xff] }
 0x265   :  { %2076 = vrcp.f32 %v998_v7  ;;  %v1008_v19 = vpop.xlane.xlu1 %1007  ;;  %v3762_v26 = vmul.f32 %v2067_v8, %v4543_v1  ;;  %v4549_v1 = vld [vmem:[#allocation51_spill] sm:$0xff] }
 0x266   :  { %4538 = vst [vmem:[#allocation17_spill] sm:$0xff] %v3751_v33  ;;  %v1320_v46 = vadd.f32 %v1319_v6, %v3751_v33  ;;  %2078 = vrcp.f32 %v1004_v53 }
 0x267   :  { %v2069_v23 = vpop.eup %2068  ;;  %4544 = vst [vmem:[#allocation21_spill] sm:$0xff] %v3762_v26 }
 0x268   :  { %v1321_v9 = vadd.f32 %v1320_v46, %v3754_v42  ;;  %v3759_v18 = vmul.f32 %v2069_v23, %v4541_v28  ;;  %v1002_v58 = vpop.xlane.xlu0 %1001  ;;  %v2071_v45 = vpop.eup %2070  ;;  %v4547_v28 = vld [vmem:[#allocation24_spill] sm:$0xff] }
 0x269   :  { %2080 = vrcp.f32 %v1002_v58  ;;  %v1012_v42 = vpop.xlane.xlu1 %1011  ;;  %v3770_v33 = vmul.f32 %v2071_v45, %v4547_v28 }
 0x26a   :  { %4542 = vst [vmem:[#allocation81_spill] sm:$0xff] %v3759_v18  ;;  %v1322_v7 = vadd.f32 %v1321_v9, %v3759_v18  ;;  %2082 = vrcp.f32 %v1008_v19 }
 0x26b   :  { %v2073_v36 = vpop.eup %2072  ;;  %4548 = vst [vmem:[#allocation23_spill] sm:$0xff] %v3770_v33 }
 0x26c   :  { %v1323_v6 = vadd.f32 %v1322_v7, %v3762_v26  ;;  %v3767_v53 = vmul.f32 %v2073_v36, %v4545_v49  ;;  %v1006_v46 = vpop.xlane.xlu0 %1005  ;;  %v2075_v23 = vpop.eup %2074  ;;  %v4551_v49 = vld [vmem:[#allocation26_spill] sm:$0xff] }
 0x26d   :  { %2084 = vrcp.f32 %v1006_v46  ;;  %v1016_v26 = vpop.xlane.xlu1 %1015  ;;  %v3778_v18 = vmul.f32 %v2075_v23, %v4551_v49 }
 0x26e   :  { %4546 = vst [vmem:[#allocation82_spill] sm:$0xff] %v3767_v53  ;;  %v1324_v58 = vadd.f32 %v1323_v6, %v3767_v53  ;;  %2086 = vrcp.f32 %v1012_v42 }
 0x26f   :  { %v2077_v8 = vpop.eup %2076  ;;  %4552 = vst [vmem:[#allocation25_spill] sm:$0xff] %v3778_v18 }
 0x270   :  { %v1325_v9 = vadd.f32 %v1324_v58, %v3770_v33  ;;  %v3775_v19 = vmul.f32 %v2077_v8, %v4549_v1  ;;  %v1010_v7 = vpop.xlane.xlu0 %1009  ;;  %v2079_v36 = vpop.eup %2078  ;;  %v4554_v1 = vld [vmem:[#allocation28_spill] sm:$0xff] }
 0x271   :  { %2088 = vrcp.f32 %v1010_v7  ;;  %v1020_v58 = vpop.xlane.xlu1 %1019  ;;  %v3786_v33 = vmul.f32 %v2079_v36, %v4554_v1  ;;  %v4559_v1 = vld [vmem:[#allocation71_spill] sm:$0xff] }
 0x272   :  { %4550 = vst [vmem:[#allocation83_spill] sm:$0xff] %v3775_v19  ;;  %v1326_v46 = vadd.f32 %v1325_v9, %v3775_v19  ;;  %2090 = vrcp.f32 %v1016_v26 }
 0x273   :  { %v2081_v45 = vpop.eup %2080  ;;  %4555 = vst [vmem:[#allocation27_spill] sm:$0xff] %v3786_v33 }
 0x274   :  { %v1327_v6 = vadd.f32 %v1326_v46, %v3778_v18  ;;  %v3783_v42 = vmul.f32 %v2081_v45, %v3346_v57  ;;  %v1014_v28 = vpop.xlane.xlu0 %1013  ;;  %v2083_v8 = vpop.eup %2082  ;;  %v4557_v45 = vld [vmem:[#allocation30_spill] sm:$0xff] }
 0x275   :  { %2092 = vrcp.f32 %v1014_v28  ;;  %v1024_v46 = vpop.xlane.xlu1 %1023  ;;  %v3794_v18 = vmul.f32 %v2083_v8, %v4557_v45  ;;  %v4563_v45 = vld [vmem:[#allocation63_spill] sm:$0xff] }
 0x276   :  { %4553 = vst [vmem:[#allocation84_spill] sm:$0xff] %v3783_v42  ;;  %v1328_v7 = vadd.f32 %v1327_v6, %v3783_v42  ;;  %2094 = vrcp.f32 %v1020_v58 }
 0x277   :  { %v2085_v23 = vpop.eup %2084  ;;  %4558 = vst [vmem:[#allocation16_spill] sm:$0xff] %v3794_v18 }
 0x278   :  { %v1329_v9 = vadd.f32 %v1328_v7, %v3786_v33  ;;  %v3791_v26 = vmul.f32 %v2085_v23, %v3364_v43  ;;  %v1018_v49 = vpop.xlane.xlu0 %1017  ;;  %v2087_v57 = vpop.eup %2086  ;;  %v4561_v23 = vld [vmem:[#allocation85_spill] sm:$0xff] }
 0x279   :  { %2096 = vrcp.f32 %v1018_v49  ;;  %v1028_v33 = vpop.xlane.xlu1 %1027  ;;  %v3802_v42 = vmul.f32 %v2087_v57, %v4561_v23 }
 0x27a   :  { %4556 = vst [vmem:[#allocation29_spill] sm:$0xff] %v3791_v26  ;;  %v1330_v28 = vadd.f32 %v1329_v9, %v3791_v26  ;;  %2098 = vrcp.f32 %v1024_v46 }
 0x27b   :  { %v2089_v36 = vpop.eup %2088  ;;  %4562 = vst [vmem:[#allocation87_spill] sm:$0xff] %v3802_v42 }
 0x27c   :  { %v1331_v6 = vadd.f32 %v1330_v28, %v3794_v18  ;;  %v3799_v58 = vmul.f32 %v2089_v36, %v4559_v1  ;;  %v1022_v7 = vpop.xlane.xlu0 %1021  ;;  %v2091_v43 = vpop.eup %2090  ;;  %v4565_v1 = vld [vmem:[#allocation86_spill] sm:$0xff] }
 0x27d   :  { %2100 = vrcp.f32 %v1022_v7  ;;  %v1032_v18 = vpop.xlane.xlu1 %1031  ;;  %v3810_v26 = vmul.f32 %v2091_v43, %v4565_v1 }
 0x27e   :  { %4560 = vst [vmem:[#allocation15_spill] sm:$0xff] %v3799_v58  ;;  %v1332_v49 = vadd.f32 %v1331_v6, %v3799_v58  ;;  %2102 = vrcp.f32 %v1028_v33 }
 0x27f   :  { %v2093_v8 = vpop.eup %2092 }
 0x280   :  { %v1333_v9 = vadd.f32 %v1332_v49, %v3802_v42  ;;  %v3807_v46 = vmul.f32 %v2093_v8, %v4563_v45  ;;  %v1026_v28 = vpop.xlane.xlu0 %1025  ;;  %v2095_v36 = vpop.eup %2094  ;;  %v4566_v45 = vld [vmem:[#allocation88_spill] sm:$0xff] }
 0x281   :  { %2104 = vrcp.f32 %v1026_v28  ;;  %v1036_v49 = vpop.xlane.xlu1 %1035  ;;  %v3818_v42 = vmul.f32 %v2095_v36, %v4566_v45 }
 0x282   :  { %4564 = vst [vmem:[#allocation18_spill] sm:$0xff] %v3807_v46  ;;  %v1334_v7 = vadd.f32 %v1333_v9, %v3807_v46  ;;  %2106 = vrcp.f32 %v1032_v18 }
 0x283   :  { %v2097_v57 = vpop.eup %2096 }
 0x284   :  { %v1335_v6 = vadd.f32 %v1334_v7, %v3810_v26  ;;  %v3815_v33 = vmul.f32 %v2097_v57, %v3412_v4  ;;  %v1030_v23 = vpop.xlane.xlu0 %1029  ;;  %v2099_v8 = vpop.eup %2098  ;;  %v4567_v57 = vld [vmem:[#allocation45_spill] sm:$0xff] }
 0x285   :  { %2108 = vrcp.f32 %v1030_v23  ;;  %v1040_v7 = vpop.xlane.xlu1 %1039  ;;  %v3826_v46 = vmul.f32 %v2099_v8, %v4567_v57 }
 0x286   :  { %v1336_v28 = vadd.f32 %v1335_v6, %v3815_v33  ;;  %2110 = vrcp.f32 %v1036_v49 }
 0x287   :  { %v2101_v43 = vpop.eup %2100 }
 0x288   :  { %v1337_v9 = vadd.f32 %v1336_v28, %v3818_v42  ;;  %v3823_v18 = vmul.f32 %v2101_v43, %v3430_v51  ;;  %v1034_v1 = vpop.xlane.xlu0 %1033  ;;  %v2103_v4 = vpop.eup %2102  ;;  %v4568_v43 = vld [vmem:[#allocation48_spill] sm:$0xff] }
 0x289   :  { %2112 = vrcp.f32 %v1034_v1  ;;  %v1044_v28 = vpop.xlane.xlu1 %1043  ;;  %v3834_v58 = vmul.f32 %v2103_v4, %v4568_v43 }
 0x28a   :  { %v1338_v23 = vadd.f32 %v1337_v9, %v3823_v18  ;;  %2114 = vrcp.f32 %v1040_v7 }
 0x28b   :  { %v2105_v36 = vpop.eup %2104 }
 0x28c   :  { %v1339_v6 = vadd.f32 %v1338_v23, %v3826_v46  ;;  %v3831_v49 = vmul.f32 %v2105_v36, %v3449_v27  ;;  %v1038_v45 = vpop.xlane.xlu0 %1037  ;;  %v2107_v51 = vpop.eup %2106  ;;  %v4569_v36 = vld [vmem:[#allocation33_spill] sm:$0xff] }
 0x28d   :  { %2116 = vrcp.f32 %v1038_v45  ;;  %v1048_v23 = vpop.xlane.xlu1 %1047  ;;  %v1232_v19 = vmul.f32 %v2107_v51, %v4569_v36 }
 0x28e   :  { %v1340_v1 = vadd.f32 %v1339_v6, %v3831_v49  ;;  %2118 = vrcp.f32 %v1044_v28 }
 0x28f   :  { %v2109_v8 = vpop.eup %2108 }
 0x290   :  { %v1341_v9 = vadd.f32 %v1340_v1, %v3834_v58  ;;  %v3839_v7 = vmul.f32 %v2109_v8, %v3467_v16  ;;  %v1042_v57 = vpop.xlane.xlu0 %1041  ;;  %v2111_v27 = vpop.eup %2110 }
 0x291   :  { %2120 = vrcp.f32 %v1042_v57  ;;  %v1236_v16 = vmul.f32 %v2111_v27, %v4570_v52 }
 0x292   :  { %v1342_v45 = vadd.f32 %v1341_v9, %v3839_v7  ;;  %2122 = vrcp.f32 %v1048_v23 }
 0x293   :  { %v2113_v53 = vpop.eup %2112  ;;  %v1052_v28 = vpop.xlane.xlu1 %1051 }
 0x294   :  { %v1343_v4 = vadd.f32 %v1342_v45, %v1232_v19  ;;  %v1234_v43 = vmul.f32 %v2113_v53, %v3482_v60  ;;  %v1046_v6 = vpop.xlane.xlu0 %1045  ;;  %v2115_v1 = vpop.eup %2114 }
 0x295   :  { %2124 = vrcp.f32 %v1046_v6  ;;  %v1240_v36 = vmul.f32 %v2115_v1, %v3424_v25 }
 0x296   :  { %v1344_v8 = vadd.f32 %v1343_v4, %v1234_v43  ;;  %2126 = vrcp.f32 %v1052_v28 }
 0x297   :  { %v2117_v12 = vpop.eup %2116 }
 0x298   :  { %v1345_v40 = vadd.f32 %v1344_v8, %v1236_v16  ;;  %v1238_v57 = vmul.f32 %v2117_v12, %v3499_v30  ;;  %v1050_v51 = vpop.xlane.xlu0 %1049  ;;  %v2119_v9 = vpop.eup %2118 }
 0x299   :  { %2128 = vrcp.f32 %v1050_v51  ;;  %v1244_v27 = vmul.f32 %v2119_v9, %v3460_v22 }
 0x29a   :  { %v1346_v45 = vadd.f32 %v1345_v40, %v1238_v57 }
 0x29b   :  { %v2121_v60 = vpop.eup %2120  ;;  %v1056_v53 = vpop.xlane.xlu1 %1055 }
 0x29c   :  { %v1347_v23 = vadd.f32 %v1346_v45, %v1240_v36  ;;  %v1242_v6 = vmul.f32 %v2121_v60, %v3516_v32  ;;  %2130 = vrcp.f32 %v1056_v53  ;;  %v1054_v14 = vpop.xlane.xlu0 %1053  ;;  %v2123_v52 = vpop.eup %2122 }
 0x29d   :  { %2132 = vrcp.f32 %v1054_v14  ;;  %v1248_v25 = vmul.f32 %v2123_v52, %v3496_v62 }
 0x29e   :  { %v1348_v4 = vadd.f32 %v1347_v23, %v1242_v6 }
 0x29f   :  { %v2125_v30 = vpop.eup %2124 }
 0x2a0   :  { %v1349_v12 = vadd.f32 %v1348_v4, %v1244_v27  ;;  %v1246_v28 = vmul.f32 %v2125_v30, %v3533_v3  ;;  %v2127_v8 = vpop.eup %2126 }
 0x2a1   :  { %v1252_v60 = vmul.f32 %v2127_v8, %v3530_v21 }
 0x2a2   :  { %v1350_v40 = vadd.f32 %v1349_v12, %v1246_v28 }
 0x2a3   :  { %v2129_v1 = vpop.eup %2128 }
 0x2a4   :  { %v1351_v51 = vadd.f32 %v1350_v40, %v1248_v25  ;;  %v1250_v45 = vmul.f32 %v2129_v1, %v3549_v61 }
 0x2a6   :  { %v2131_v32 = vpop.eup %2130  ;;  %v1352_v14 = vadd.f32 %v1351_v51, %v1250_v45  ;;  %v4575_v51 = vld [vmem:[#allocation34_spill] sm:$0xff] }
 0x2a7   :  { %v2133_v53 = vpop.eup %2132  ;;  %v1256_v9 = vmul.f32 %v2131_v32, %v3561_v0 }
 0x2a8   :  { %v1353_v5 = vadd.f32 %v1352_v14, %v1252_v60  ;;  %v1254_v22 = vmul.f32 %v2133_v53, %v3564_v55 }
 0x2aa   :  { %v1354_v23 = vadd.f32 %v1353_v5, %v1254_v22 }
 0x2ac   :  { %v1355_v3 = vadd.f32 %v1354_v23, %v1256_v9  ;;  %v4576_v23 = vld [vmem:[#allocation35_spill] sm:$0xff] }
 0x2ae   :  { %v3855_v4 = vmul.f32 0.01, %v1355_v3 }
 0x2b0   :  { %1660 = vst [vmem:[#allocation8] sm:$0xff] %v3855_v4  ;;  %v3860_v62 = vsub.f32 %v3810_v26, %v3855_v4  ;;  %v3864_v21 = vsub.f32 %v3815_v33, %v3855_v4  ;;  %v3868_v61 = vsub.f32 %v3818_v42, %v3855_v4  ;;  %v3872_v0 = vsub.f32 %v3823_v18, %v3855_v4 }
 0x2b1   :  { %v3876_v55 = vsub.f32 %v3826_v46, %v3855_v4  ;;  %v3880_v5 = vsub.f32 %v3831_v49, %v3855_v4  ;;  %v3884_v26 = vsub.f32 %v3834_v58, %v3855_v4  ;;  %v3888_v42 = vsub.f32 %v3839_v7, %v3855_v4 }
 0x2b2   :  { %v3891_v33 = vsub.f32 %v1232_v19, %v3855_v4  ;;  %v3894_v18 = vsub.f32 %v1234_v43, %v3855_v4  ;;  %v3897_v46 = vsub.f32 %v1236_v16, %v3855_v4  ;;  %v3900_v49 = vsub.f32 %v1238_v57, %v3855_v4 }
 0x2b3   :  { %v3903_v52 = vsub.f32 %v1240_v36, %v3855_v4  ;;  %v3906_v58 = vsub.f32 %v1242_v6, %v3855_v4  ;;  %v3909_v7 = vsub.f32 %v1244_v27, %v3855_v4  ;;  %v3912_v19 = vsub.f32 %v1246_v28, %v3855_v4  ;;  %v4571_v36 = vld [vmem:[#allocation54_spill] sm:$0xff]  ;;  %v4572_v6 = vld [vmem:[#allocation57_spill] sm:$0xff]  ;;  %v4573_v27 = vld [vmem:[#allocation31_spill] sm:$0xff] }
 0x2b4   :  { %v3915_v43 = vsub.f32 %v1248_v25, %v3855_v4  ;;  %v3918_v16 = vsub.f32 %v1250_v45, %v3855_v4  ;;  %v3921_v57 = vsub.f32 %v1252_v60, %v3855_v4  ;;  %v1357_v30 = vsub.f32 %v4571_v36, %v3855_v4  ;;  %v4574_v25 = vld [vmem:[#allocation32_spill] sm:$0xff] }
 0x2b5   :  { %v1358_v12 = vsub.f32 %v4572_v6, %v3855_v4  ;;  %v1359_v8 = vsub.f32 %v4573_v27, %v3855_v4  ;;  %v1360_v1 = vsub.f32 %v4574_v25, %v3855_v4  ;;  %v1361_v45 = vsub.f32 %v4575_v51, %v3855_v4  ;;  %v4577_v6 = vld [vmem:[#allocation75_spill] sm:$0xff] }
 0x2b6   :  { %v1457_v28 = vmul.f32 %v1357_v30, %v1357_v30  ;;  %v3934_v14 = vsub.f32 %v1254_v22, %v3855_v4  ;;  %v3937_v53 = vsub.f32 %v1256_v9, %v3855_v4  ;;  %v1362_v3 = vsub.f32 %v4576_v23, %v3855_v4 }
 0x2b7   :  { %v1458_v40 = vmul.f32 %v1358_v12, %v1358_v12  ;;  %v1459_v32 = vmul.f32 %v1359_v8, %v1359_v8  ;;  %v1460_v36 = vmul.f32 %v1360_v1, %v1360_v1  ;;  %v1363_v12 = vsub.f32 %v4577_v6, %v3855_v4  ;;  %v4578_v6 = vld [vmem:[#allocation67_spill] sm:$0xff] }
 0x2b8   :  { %v1461_v27 = vmul.f32 %v1361_v45, %v1361_v45  ;;  %v1364_v8 = vsub.f32 %v3435_v29, %v3855_v4  ;;  %v1365_v22 = vsub.f32 %v3446_v2, %v3855_v4  ;;  %v1366_v23 = vsub.f32 %v3454_v17, %v3855_v4 }
 0x2b9   :  { %v1557_v60 = vadd.f32 %v1458_v40, %v1457_v28  ;;  %v1462_v28 = vmul.f32 %v1362_v3, %v1362_v3  ;;  %v1463_v9 = vmul.f32 %v1363_v12, %v1363_v12  ;;  %v1368_v29 = vsub.f32 %v3472_v54, %v3855_v4 }
 0x2ba   :  { %v1464_v1 = vmul.f32 %v1364_v8, %v1364_v8  ;;  %v1465_v45 = vmul.f32 %v1365_v22, %v1365_v22  ;;  %v1466_v3 = vmul.f32 %v1366_v23, %v1366_v23  ;;  %v1369_v2 = vsub.f32 %v4578_v6, %v3855_v4 }
 0x2bb   :  { %v1558_v30 = vadd.f32 %v1557_v60, %v1459_v32  ;;  %v1367_v60 = vsub.f32 %v3464_v48, %v3855_v4  ;;  %v1468_v8 = vmul.f32 %v1368_v29, %v1368_v29 }
 0x2bc   :  { %v1469_v22 = vmul.f32 %v1369_v2, %v1369_v2 }
 0x2bd   :  { %v1559_v25 = vadd.f32 %v1558_v30, %v1460_v36  ;;  %v1467_v12 = vmul.f32 %v1367_v60, %v1367_v60 }
 0x2bf   :  { %v1560_v40 = vadd.f32 %v1559_v25, %v1461_v27  ;;  %v4579_v25 = vld [vmem:[#allocation36_spill] sm:$0xff] }
 0x2c0   :  { %v1370_v17 = vsub.f32 %v4579_v25, %v3855_v4 }
 0x2c1   :  { %v1561_v51 = vadd.f32 %v1560_v40, %v1462_v28  ;;  %v4580_v40 = vld [vmem:[#allocation70_spill] sm:$0xff] }
 0x2c2   :  { %v1371_v48 = vsub.f32 %v4580_v40, %v3855_v4  ;;  %v1470_v23 = vmul.f32 %v1370_v17, %v1370_v17 }
 0x2c3   :  { %v1562_v32 = vadd.f32 %v1561_v51, %v1463_v9  ;;  %v4581_v51 = vld [vmem:[#allocation37_spill] sm:$0xff] }
 0x2c4   :  { %v1372_v54 = vsub.f32 %v4581_v51, %v3855_v4  ;;  %v1471_v60 = vmul.f32 %v1371_v48, %v1371_v48 }
 0x2c5   :  { %v1563_v36 = vadd.f32 %v1562_v32, %v1464_v1  ;;  %v4582_v32 = vld [vmem:[#allocation38_spill] sm:$0xff] }
 0x2c6   :  { %v1472_v29 = vmul.f32 %v1372_v54, %v1372_v54 }
 0x2c7   :  { %v1564_v30 = vadd.f32 %v1563_v36, %v1465_v45  ;;  %v1373_v45 = vsub.f32 %v4582_v32, %v3855_v4 }
 0x2c9   :  { %v1565_v27 = vadd.f32 %v1564_v30, %v1466_v3  ;;  %v4583_v3 = vld [vmem:[#allocation74_spill] sm:$0xff]  ;;  %v1473_v2 = vmul.f32 %v1373_v45, %v1373_v45 }
 0x2ca   :  { %v1374_v30 = vsub.f32 %v4583_v3, %v3855_v4  ;;  %v4588_v3 = vld [vmem:[#allocation43_spill] sm:$0xff] }
 0x2cb   :  { %v1566_v28 = vadd.f32 %v1565_v27, %v1467_v12  ;;  %v4584_v12 = vld [vmem:[#allocation39_spill] sm:$0xff] }
 0x2cc   :  { %v1375_v27 = vsub.f32 %v4584_v12, %v3855_v4  ;;  %v1474_v17 = vmul.f32 %v1374_v30, %v1374_v30  ;;  %v1381_v12 = vsub.f32 %v3580_v41, %v3855_v4  ;;  %v1385_v41 = vsub.f32 %v3600_v44, %v3855_v4 }
 0x2cd   :  { %v1567_v9 = vadd.f32 %v1566_v28, %v1468_v8  ;;  %v4585_v8 = vld [vmem:[#allocation40_spill] sm:$0xff]  ;;  %v1389_v44 = vsub.f32 %v3620_v59, %v3855_v4 }
 0x2ce   :  { %v1376_v28 = vsub.f32 %v4585_v8, %v3855_v4  ;;  %v1475_v48 = vmul.f32 %v1375_v27, %v1375_v27 }
 0x2cf   :  { %v1568_v1 = vadd.f32 %v1567_v9, %v1469_v22  ;;  %v4586_v22 = vld [vmem:[#allocation78_spill] sm:$0xff] }
 0x2d0   :  { %v1377_v9 = vsub.f32 %v4586_v22, %v3855_v4  ;;  %v1476_v54 = vmul.f32 %v1376_v28, %v1376_v28 }
 0x2d1   :  { %v1569_v36 = vadd.f32 %v1568_v1, %v1470_v23  ;;  %v4587_v23 = vld [vmem:[#allocation41_spill] sm:$0xff] }
 0x2d2   :  { %v1378_v1 = vsub.f32 %v4587_v23, %v3855_v4  ;;  %v1477_v45 = vmul.f32 %v1377_v9, %v1377_v9  ;;  %v4590_v9 = vld [vmem:[#allocation46_spill] sm:$0xff] }
 0x2d3   :  { %v1570_v6 = vadd.f32 %v1569_v36, %v1471_v60  ;;  %v1379_v60 = vsub.f32 %v3568_v39, %v3855_v4  ;;  %v1383_v39 = vsub.f32 %v3590_v10, %v3855_v4  ;;  %v1387_v10 = vsub.f32 %v3610_v50, %v3855_v4 }
 0x2d4   :  { %v1478_v30 = vmul.f32 %v1378_v1, %v1378_v1  ;;  %v1391_v50 = vsub.f32 %v3630_v35, %v3855_v4 }
 0x2d5   :  { %v1571_v25 = vadd.f32 %v1570_v6, %v1472_v29  ;;  %v1380_v29 = vsub.f32 %v4588_v3, %v3855_v4  ;;  %v1479_v27 = vmul.f32 %v1379_v60, %v1379_v60  ;;  %v1483_v1 = vmul.f32 %v1383_v39, %v1383_v39 }
 0x2d7   :  { %v1572_v40 = vadd.f32 %v1571_v25, %v1473_v2  ;;  %v4589_v25 = vld [vmem:[#allocation44_spill] sm:$0xff]  ;;  %v1480_v28 = vmul.f32 %v1380_v29, %v1380_v29  ;;  %v1388_v29 = vsub.f32 %v3615_v63, %v3855_v4 }
 0x2d8   :  { %v1382_v8 = vsub.f32 %v4589_v25, %v3855_v4 }
 0x2d9   :  { %v1573_v51 = vadd.f32 %v1572_v40, %v1474_v17  ;;  %v1481_v40 = vmul.f32 %v1381_v12, %v1381_v12  ;;  %v1487_v12 = vmul.f32 %v1387_v10, %v1387_v10 }
 0x2db   :  { %v1574_v32 = vadd.f32 %v1573_v51, %v1475_v48  ;;  %v1384_v48 = vsub.f32 %v4590_v9, %v3855_v4  ;;  %v1482_v51 = vmul.f32 %v1382_v8, %v1382_v8  ;;  %v1489_v8 = vmul.f32 %v1389_v44, %v1389_v44 }
 0x2dd   :  { %v1575_v36 = vadd.f32 %v1574_v32, %v1476_v54  ;;  %v1386_v32 = vsub.f32 %v3605_v13, %v3855_v4  ;;  %v1484_v60 = vmul.f32 %v1384_v48, %v1384_v48  ;;  %v1390_v13 = vsub.f32 %v3625_v47, %v3855_v4 }
 0x2df   :  { %v1576_v6 = vadd.f32 %v1575_v36, %v1477_v45  ;;  %v1485_v36 = vmul.f32 %v1385_v41, %v1385_v41 }
 0x2e1   :  { %v1577_v2 = vadd.f32 %v1576_v6, %v1478_v30  ;;  %v1486_v30 = vmul.f32 %v1386_v32, %v1386_v32 }
 0x2e3   :  { %v1578_v17 = vadd.f32 %v1577_v2, %v1479_v27  ;;  %v1488_v2 = vmul.f32 %v1388_v29, %v1388_v29 }
 0x2e5   :  { %v1579_v22 = vadd.f32 %v1578_v17, %v1480_v28 }
 0x2e7   :  { %v1580_v23 = vadd.f32 %v1579_v22, %v1481_v40 }
 0x2e9   :  { %v1581_v54 = vadd.f32 %v1580_v23, %v1482_v51 }
 0x2eb   :  { %v1582_v45 = vadd.f32 %v1581_v54, %v1483_v1 }
 0x2ed   :  { %v1583_v3 = vadd.f32 %v1582_v45, %v1484_v60 }
 0x2ef   :  { %v1584_v6 = vadd.f32 %v1583_v3, %v1485_v36 }
 0x2f1   :  { %v1585_v27 = vadd.f32 %v1584_v6, %v1486_v30 }
 0x2f3   :  { %v1586_v25 = vadd.f32 %v1585_v27, %v1487_v12 }
 0x2f5   :  { %v1587_v28 = vadd.f32 %v1586_v25, %v1488_v2 }
 0x2f6   :  { %2213 = shalt.err (!%p2210_p0)
}
 0x2f7   :  { %s2214_s29 = scalar_lea.hbm %s4156_s3, 128 }
 0x2f8   :  { %p2215_p1 = scmp.ne.s32.totalorder %s4156_s3, %s2214_s29  ;;  %p2218_p2 = scmp.lt.u32.totalorder %s2214_s29, %s4156_s3 }
 0x2fa   :  { %p2220_p3 = pnand %p2218_p2, %p2215_p1 }
 0x2fc   :  { %2223 = shalt.err (!%p2220_p3)
}
 0x2fd   :  { %1706 = dma.vmem_to_hbm [thread:$0]  %s1704_s25, 128, %s4156_s3, [#allocation4]   ;;  %v1392_v59 = vsub.f32 %v3634_v31, %v3855_v4  ;;  %v1490_v63 = vmul.f32 %v1390_v13, %v1390_v13  ;;  %v1588_v47 = vadd.f32 %v1587_v28, %v1489_v8  ;;  %v1393_v35 = vsub.f32 %v3638_v11, %v3855_v4  ;;  %v4591_v60 = vld [vmem:[#allocation47_spill] sm:$0xff]  ;;  %v4592_v36 = vld [vmem:[#allocation49_spill] sm:$0xff]  ;;  %v4593_v30 = vld [vmem:[#allocation50_spill] sm:$0xff] }
 0x2fe   :  { %v1491_v17 = vmul.f32 %v1391_v50, %v1391_v50  ;;  %v1394_v40 = vsub.f32 %v3642_v15, %v3855_v4  ;;  %v1395_v48 = vsub.f32 %v3646_v20, %v3855_v4  ;;  %v1396_v31 = vsub.f32 %v3650_v34, %v3855_v4  ;;  %v4594_v12 = vld [vmem:[#allocation52_spill] sm:$0xff]  ;;  %v4595_v2 = vld [vmem:[#allocation53_spill] sm:$0xff]  ;;  %s2260_s3 = smov [#allocation9]  }
 0x2ff   :  { %v1589_v39 = vadd.f32 %v1588_v47, %v1490_v63  ;;  %v1492_v22 = vmul.f32 %v1392_v59, %v1392_v59  ;;  %v1493_v51 = vmul.f32 %v1393_v35, %v1393_v35  ;;  %v1397_v11 = vsub.f32 %v3654_v38, %v3855_v4  ;;  %v4596_v47 = vld [vmem:[#allocation55_spill] sm:$0xff]  ;;  %s1713_s10 = sshll.u32 %s2260_s3, 4  ;;  %s1714_s10 = int_to_ptr.vmem [resolvable:$true] %s1713_s10 }
 0x300   :  { %v1494_v41 = vmul.f32 %v1394_v40, %v1394_v40  ;;  %v1495_v54 = vmul.f32 %v1395_v48, %v1395_v48  ;;  %v1398_v15 = vsub.f32 %v4591_v60, %v3855_v4  ;;  %v1496_v45 = vmul.f32 %v1396_v31, %v1396_v31  ;;  %v4597_v31 = vld [vmem:[#allocation56_spill] sm:$0xff]  ;;  %s2224_s1 = scalar_lea.vmem %s1714_s10, 128  ;;  %p2229_p5 = scmp.lt.s32.totalorder %s1714_s10, %s1714_s10 }
 0x301   :  { %v1590_v9 = vadd.f32 %v1589_v39, %v1491_v17  ;;  %v1399_v20 = vsub.f32 %v4592_v36, %v3855_v4  ;;  %v1497_v3 = vmul.f32 %v1397_v11, %v1397_v11  ;;  %v1400_v34 = vsub.f32 %v4593_v30, %v3855_v4  ;;  %v4598_v11 = vld [vmem:[#allocation58_spill] sm:$0xff]  ;;  %v4600_v36 = vld [vmem:[#allocation61_spill] sm:$0xff]  ;;  %p2225_p4 = scmp.ne.s32.totalorder %s1714_s10, %s2224_s1  ;;  %p2230_p6 = scmp.lt.s32.totalorder %s2224_s1, %s2224_s1 }
 0x302   :  { %v1498_v6 = vmul.f32 %v1398_v15, %v1398_v15  ;;  %v1401_v38 = vsub.f32 %v4594_v12, %v3855_v4  ;;  %v1402_v25 = vsub.f32 %v4595_v2, %v3855_v4  ;;  %v1403_v28 = vsub.f32 %v3678_v24, %v3855_v4  ;;  %v4599_v15 = vld [vmem:[#allocation59_spill] sm:$0xff] }
 0x303   :  { %v1591_v23 = vadd.f32 %v1590_v9, %v1492_v22  ;;  %v1499_v27 = vmul.f32 %v1399_v20, %v1399_v20  ;;  %v1500_v50 = vmul.f32 %v1400_v34, %v1400_v34  ;;  %v1404_v35 = vsub.f32 %v4596_v47, %v3855_v4  ;;  %v4605_v47 = vld [vmem:[#allocation69_spill] sm:$0xff]  ;;  %p2231_p7 = por %p2230_p6, %p2229_p5 }
 0x304   :  { %v1501_v59 = vmul.f32 %v1401_v38, %v1401_v38  ;;  %v1502_v17 = vmul.f32 %v1402_v25, %v1402_v25  ;;  %v1405_v40 = vsub.f32 %v3686_v56, %v3855_v4  ;;  %v1503_v22 = vmul.f32 %v1403_v28, %v1403_v28 }
 0x305   :  { %v1592_v1 = vadd.f32 %v1591_v23, %v1493_v51  ;;  %v1406_v48 = vsub.f32 %v3690_v37, %v3855_v4  ;;  %v1504_v51 = vmul.f32 %v1404_v35, %v1404_v35  ;;  %v1407_v24 = vsub.f32 %v4597_v31, %v3855_v4  ;;  %p2232_p8 = pnand %p2231_p7, %p2225_p4 }
 0x306   :  { %v1409_v56 = vsub.f32 %v4599_v15, %v3855_v4  ;;  %v1410_v37 = vsub.f32 %v4600_v36, %v3855_v4  ;;  %v1415_v35 = vsub.f32 %v4605_v47, %v3855_v4 }
 0x307   :  { %v1593_v32 = vadd.f32 %v1592_v1, %v1494_v41  ;;  %v1505_v41 = vmul.f32 %v1405_v40, %v1405_v40  ;;  %v4606_v40 = vld [vmem:[#allocation72_spill] sm:$0xff] }
 0x308   :  { %v1509_v34 = vmul.f32 %v1409_v56, %v1409_v56  ;;  %v1510_v38 = vmul.f32 %v1410_v37, %v1410_v37  ;;  %v1515_v31 = vmul.f32 %v1415_v35, %v1415_v35 }
 0x309   :  { %v1594_v10 = vadd.f32 %v1593_v32, %v1495_v54  ;;  %v1408_v54 = vsub.f32 %v4598_v11, %v3855_v4  ;;  %v1506_v32 = vmul.f32 %v1406_v48, %v1406_v48 }
 0x30b   :  { %v1595_v29 = vadd.f32 %v1594_v10, %v1496_v45  ;;  %v1507_v45 = vmul.f32 %v1407_v24, %v1407_v24  ;;  %v1508_v20 = vmul.f32 %v1408_v54, %v1408_v54 }
 0x30d   :  { %v1596_v44 = vadd.f32 %v1595_v29, %v1497_v3  ;;  %v4601_v29 = vld [vmem:[#allocation62_spill] sm:$0xff] }
 0x30e   :  { %v1411_v30 = vsub.f32 %v4601_v29, %v3855_v4 }
 0x30f   :  { %v1597_v13 = vadd.f32 %v1596_v44, %v1498_v6  ;;  %v4602_v44 = vld [vmem:[#allocation65_spill] sm:$0xff] }
 0x310   :  { %v1412_v12 = vsub.f32 %v4602_v44, %v3855_v4  ;;  %v1511_v25 = vmul.f32 %v1411_v30, %v1411_v30 }
 0x311   :  { %v1598_v8 = vadd.f32 %v1597_v13, %v1499_v27  ;;  %v4603_v13 = vld [vmem:[#allocation66_spill] sm:$0xff] }
 0x312   :  { %v1413_v2 = vsub.f32 %v4603_v13, %v3855_v4 }
 0x313   :  { %v1599_v63 = vadd.f32 %v1598_v8, %v1500_v50  ;;  %v4604_v8 = vld [vmem:[#allocation68_spill] sm:$0xff] }
 0x314   :  { %v1414_v28 = vsub.f32 %v4604_v8, %v3855_v4 }
 0x315   :  { %v1600_v39 = vadd.f32 %v1599_v63, %v1501_v59  ;;  %v1512_v59 = vmul.f32 %v1412_v12, %v1412_v12 }
 0x317   :  { %v1601_v9 = vadd.f32 %v1600_v39, %v1502_v17  ;;  %v1513_v17 = vmul.f32 %v1413_v2, %v1413_v2 }
 0x319   :  { %v1602_v23 = vadd.f32 %v1601_v9, %v1503_v22  ;;  %v1416_v22 = vsub.f32 %v4606_v40, %v3855_v4  ;;  %v1514_v9 = vmul.f32 %v1414_v28, %v1414_v28 }
 0x31b   :  { %v1603_v1 = vadd.f32 %v1602_v23, %v1504_v51  ;;  %v4607_v51 = vld [vmem:[#allocation73_spill] sm:$0xff]  ;;  %v1516_v11 = vmul.f32 %v1416_v22, %v1416_v22 }
 0x31c   :  { %v1417_v23 = vsub.f32 %v4607_v51, %v3855_v4 }
 0x31d   :  { %v1604_v60 = vadd.f32 %v1603_v1, %v1505_v41  ;;  %v4608_v41 = vld [vmem:[#allocation76_spill] sm:$0xff] }
 0x31e   :  { %v1418_v1 = vsub.f32 %v4608_v41, %v3855_v4  ;;  %v1517_v15 = vmul.f32 %v1417_v23, %v1417_v23 }
 0x31f   :  { %v1605_v10 = vadd.f32 %v1604_v60, %v1506_v32  ;;  %v4609_v32 = vld [vmem:[#allocation77_spill] sm:$0xff] }
 0x320   :  { %v1419_v60 = vsub.f32 %v4609_v32, %v3855_v4  ;;  %v1518_v36 = vmul.f32 %v1418_v1, %v1418_v1 }
 0x321   :  { %v1606_v3 = vadd.f32 %v1605_v10, %v1507_v45  ;;  %v4610_v45 = vld [vmem:[#allocation79_spill] sm:$0xff] }
 0x322   :  { %v1420_v10 = vsub.f32 %v4610_v45, %v3855_v4  ;;  %v1519_v29 = vmul.f32 %v1419_v60, %v1419_v60 }
 0x323   :  { %v1607_v6 = vadd.f32 %v1606_v3, %v1508_v20  ;;  %v4611_v20 = vld [vmem:[#allocation17_spill] sm:$0xff] }
 0x324   :  { %v1421_v3 = vsub.f32 %v4611_v20, %v3855_v4  ;;  %v1520_v44 = vmul.f32 %v1420_v10, %v1420_v10 }
 0x325   :  { %v1608_v27 = vadd.f32 %v1607_v6, %v1509_v34  ;;  %v4612_v34 = vld [vmem:[#allocation19_spill] sm:$0xff] }
 0x326   :  { %v1422_v6 = vsub.f32 %v4612_v34, %v3855_v4  ;;  %v1521_v13 = vmul.f32 %v1421_v3, %v1421_v3 }
 0x327   :  { %v1609_v50 = vadd.f32 %v1608_v27, %v1510_v38  ;;  %v4613_v38 = vld [vmem:[#allocation81_spill] sm:$0xff] }
 0x328   :  { %v1423_v27 = vsub.f32 %v4613_v38, %v3855_v4  ;;  %v1522_v8 = vmul.f32 %v1422_v6, %v1422_v6 }
 0x329   :  { %v1610_v63 = vadd.f32 %v1609_v50, %v1511_v25  ;;  %v4614_v25 = vld [vmem:[#allocation21_spill] sm:$0xff] }
 0x32a   :  { %v1424_v50 = vsub.f32 %v4614_v25, %v3855_v4  ;;  %v1523_v47 = vmul.f32 %v1423_v27, %v1423_v27 }
 0x32b   :  { %v1611_v39 = vadd.f32 %v1610_v63, %v1512_v59  ;;  %v4615_v59 = vld [vmem:[#allocation82_spill] sm:$0xff] }
 0x32c   :  { %v1425_v63 = vsub.f32 %v4615_v59, %v3855_v4  ;;  %v1524_v40 = vmul.f32 %v1424_v50, %v1424_v50 }
 0x32d   :  { %v1612_v48 = vadd.f32 %v1611_v39, %v1513_v17  ;;  %v4616_v17 = vld [vmem:[#allocation23_spill] sm:$0xff] }
 0x32e   :  { %v1426_v39 = vsub.f32 %v4616_v17, %v3855_v4  ;;  %v1525_v51 = vmul.f32 %v1425_v63, %v1425_v63 }
 0x32f   :  { %v1613_v24 = vadd.f32 %v1612_v48, %v1514_v9  ;;  %v4617_v9 = vld [vmem:[#allocation83_spill] sm:$0xff] }
 0x330   :  { %v1427_v48 = vsub.f32 %v4617_v9, %v3855_v4  ;;  %v1526_v41 = vmul.f32 %v1426_v39, %v1426_v39  ;;  %v1537_v9 = vmul.f32 %v3864_v21, %v3864_v21  ;;  %v1542_v21 = vmul.f32 %v3884_v26, %v3884_v26 }
 0x331   :  { %v1614_v54 = vadd.f32 %v1613_v24, %v1515_v31  ;;  %v4618_v31 = vld [vmem:[#allocation25_spill] sm:$0xff]  ;;  %v1547_v26 = vmul.f32 %v3900_v49, %v3900_v49  ;;  %v1552_v49 = vmul.f32 %v3915_v43, %v3915_v43 }
 0x332   :  { %v1428_v24 = vsub.f32 %v4618_v31, %v3855_v4  ;;  %v1527_v32 = vmul.f32 %v1427_v48, %v1427_v48 }
 0x333   :  { %v1615_v56 = vadd.f32 %v1614_v54, %v1516_v11  ;;  %v4619_v11 = vld [vmem:[#allocation84_spill] sm:$0xff] }
 0x334   :  { %v1429_v54 = vsub.f32 %v4619_v11, %v3855_v4  ;;  %v1528_v45 = vmul.f32 %v1428_v24, %v1428_v24  ;;  %v1540_v24 = vmul.f32 %v3876_v55, %v3876_v55  ;;  %v1545_v55 = vmul.f32 %v3894_v18, %v3894_v18 }
 0x335   :  { %v1616_v37 = vadd.f32 %v1615_v56, %v1517_v15  ;;  %v4620_v15 = vld [vmem:[#allocation27_spill] sm:$0xff]  ;;  %v1550_v18 = vmul.f32 %v3909_v7, %v3909_v7  ;;  %v1555_v7 = vmul.f32 %v3934_v14, %v3934_v14 }
 0x336   :  { %v1430_v56 = vsub.f32 %v4620_v15, %v3855_v4  ;;  %v1529_v20 = vmul.f32 %v1429_v54, %v1429_v54 }
 0x337   :  { %v1617_v30 = vadd.f32 %v1616_v37, %v1518_v36  ;;  %v4621_v36 = vld [vmem:[#allocation29_spill] sm:$0xff] }
 0x338   :  { %v1431_v37 = vsub.f32 %v4621_v36, %v3855_v4  ;;  %v1530_v34 = vmul.f32 %v1430_v56, %v1430_v56 }
 0x339   :  { %v1618_v12 = vadd.f32 %v1617_v30, %v1519_v29  ;;  %v4622_v29 = vld [vmem:[#allocation16_spill] sm:$0xff] }
 0x33a   :  { %v1432_v30 = vsub.f32 %v4622_v29, %v3855_v4  ;;  %v1531_v38 = vmul.f32 %v1431_v37, %v1431_v37 }
 0x33b   :  { %v1619_v2 = vadd.f32 %v1618_v12, %v1520_v44  ;;  %v4623_v44 = vld [vmem:[#allocation15_spill] sm:$0xff] }
 0x33c   :  { %v1433_v12 = vsub.f32 %v4623_v44, %v3855_v4  ;;  %v1532_v25 = vmul.f32 %v1432_v30, %v1432_v30 }
 0x33d   :  { %v1620_v28 = vadd.f32 %v1619_v2, %v1521_v13  ;;  %v4624_v13 = vld [vmem:[#allocation87_spill] sm:$0xff] }
 0x33e   :  { %v1434_v2 = vsub.f32 %v4624_v13, %v3855_v4  ;;  %v1533_v59 = vmul.f32 %v1433_v12, %v1433_v12 }
 0x33f   :  { %v1621_v35 = vadd.f32 %v1620_v28, %v1522_v8  ;;  %v4625_v8 = vld [vmem:[#allocation18_spill] sm:$0xff] }
 0x340   :  { %v1435_v28 = vsub.f32 %v4625_v8, %v3855_v4  ;;  %v1539_v4 = vmul.f32 %v3872_v0, %v3872_v0  ;;  %v1544_v0 = vmul.f32 %v3891_v33, %v3891_v33  ;;  %v1549_v33 = vmul.f32 %v3906_v58, %v3906_v58 }
 0x341   :  { %v1622_v22 = vadd.f32 %v1621_v35, %v1523_v47  ;;  %v1534_v47 = vmul.f32 %v1434_v2, %v1434_v2  ;;  %v1554_v58 = vmul.f32 %v3921_v57, %v3921_v57 }
 0x342   :  { %v1535_v17 = vmul.f32 %v1435_v28, %v1435_v28 }
 0x343   :  { %v1623_v23 = vadd.f32 %v1622_v22, %v1524_v40  ;;  %v1536_v40 = vmul.f32 %v3860_v62, %v3860_v62  ;;  %v1541_v62 = vmul.f32 %v3880_v5, %v3880_v5  ;;  %v1546_v5 = vmul.f32 %v3897_v46, %v3897_v46 }
 0x344   :  { %v1551_v46 = vmul.f32 %v3912_v19, %v3912_v19  ;;  %v1556_v19 = vmul.f32 %v3937_v53, %v3937_v53 }
 0x345   :  { %v1624_v1 = vadd.f32 %v1623_v23, %v1525_v51  ;;  %v1538_v51 = vmul.f32 %v3868_v61, %v3868_v61  ;;  %v1543_v61 = vmul.f32 %v3888_v42, %v3888_v42  ;;  %v1548_v42 = vmul.f32 %v3903_v52, %v3903_v52 }
 0x346   :  { %v1553_v52 = vmul.f32 %v3918_v16, %v3918_v16 }
 0x347   :  { %v1625_v60 = vadd.f32 %v1624_v1, %v1526_v41 }
 0x349   :  { %v1626_v10 = vadd.f32 %v1625_v60, %v1527_v32 }
 0x34b   :  { %v1627_v3 = vadd.f32 %v1626_v10, %v1528_v45 }
 0x34d   :  { %v1628_v6 = vadd.f32 %v1627_v3, %v1529_v20 }
 0x34f   :  { %v1629_v27 = vadd.f32 %v1628_v6, %v1530_v34 }
 0x351   :  { %v1630_v50 = vadd.f32 %v1629_v27, %v1531_v38 }
 0x353   :  { %v1631_v63 = vadd.f32 %v1630_v50, %v1532_v25 }
 0x355   :  { %v1632_v35 = vadd.f32 %v1631_v63, %v1533_v59 }
 0x357   :  { %v1633_v39 = vadd.f32 %v1632_v35, %v1534_v47 }
 0x359   :  { %v1634_v22 = vadd.f32 %v1633_v39, %v1535_v17 }
 0x35b   :  { %v1635_v48 = vadd.f32 %v1634_v22, %v1536_v40 }
 0x35d   :  { %v1636_v23 = vadd.f32 %v1635_v48, %v1537_v9 }
 0x35f   :  { %v1637_v31 = vadd.f32 %v1636_v23, %v1538_v51 }
 0x361   :  { %v1638_v41 = vadd.f32 %v1637_v31, %v1539_v4 }
 0x363   :  { %v1639_v1 = vadd.f32 %v1638_v41, %v1540_v24 }
 0x365   :  { %v1640_v11 = vadd.f32 %v1639_v1, %v1541_v62 }
 0x367   :  { %v1641_v54 = vadd.f32 %v1640_v11, %v1542_v21 }
 0x369   :  { %v1642_v32 = vadd.f32 %v1641_v54, %v1543_v61 }
 0x36b   :  { %v1643_v60 = vadd.f32 %v1642_v32, %v1544_v0 }
 0x36d   :  { %v1644_v15 = vadd.f32 %v1643_v60, %v1545_v55 }
 0x36f   :  { %v1645_v56 = vadd.f32 %v1644_v15, %v1546_v5 }
 0x371   :  { %v1646_v45 = vadd.f32 %v1645_v56, %v1547_v26 }
 0x373   :  { %v1647_v10 = vadd.f32 %v1646_v45, %v1548_v42 }
 0x375   :  { %v1648_v36 = vadd.f32 %v1647_v10, %v1549_v33 }
 0x377   :  { %v1649_v37 = vadd.f32 %v1648_v36, %v1550_v18 }
 0x379   :  { %v1650_v20 = vadd.f32 %v1649_v37, %v1551_v46 }
 0x37b   :  { %v1651_v3 = vadd.f32 %v1650_v20, %v1552_v49 }
 0x37d   :  { %v1652_v29 = vadd.f32 %v1651_v3, %v1553_v52 }
 0x37f   :  { %v1653_v30 = vadd.f32 %v1652_v29, %v1554_v58 }
 0x381   :  { %v1654_v34 = vadd.f32 %v1653_v30, %v1555_v7 }
 0x383   :  { %v1655_v43 = vadd.f32 %v1654_v34, %v1556_v19 }
 0x385   :  { %v1695_v6 = vmul.f32 0.01010101, %v1655_v43 }
 0x387   :  { %1696 = vst [vmem:[#allocation9] sm:$0xff] %v1695_v6 }
 0x388   :  { %2235 = shalt.err (!%p2232_p8)
}
 0x389   :  { %s2236_s13 = scalar_lea.hbm %s4157_s4, 128 }
 0x38a   :  { %p2237_p9 = scmp.ne.s32.totalorder %s4157_s4, %s2236_s13  ;;  %p2240_p10 = scmp.lt.u32.totalorder %s2236_s13, %s4157_s4 }
 0x38c   :  { %p2242_p11 = pnand %p2240_p10, %p2237_p9 }
 0x38e   :  { %2245 = shalt.err (!%p2242_p11)
}
 0x38f   :  { %1716 = dma.vmem_to_hbm [thread:$0]  %s1714_s10, 128, %s4157_s4, [#allocation10]  }
 0x390   :  { %2250 = dma.done.wait [#allocation4], 128  }
 0x391   :  { %2251 = vsyncadd [#allocation4], 4294967168 }
 0x392   :  { %2252 = dma.done.wait [#allocation10], 128  }
 0x393   :  { %2253 = vsyncadd [#allocation10], 4294967168 }
 0x394   :  { %1723 = vsyncpa [#allocation3], 1 }
 0x395   :  { %1724 = vsyncpa [#allocation6], 1 }
 0x396   :  { %1725 = vsyncpa [#allocation4], 1 }
 0x397   :  { %1726 = vsyncpa [#allocation10], 1 }

</bundles_post_ra>
